<compile_context>
chip_gen: v6e
topology: v6e:2x2x1
jax: 0.10.0
libtpu: 0.0.40
codegen_flags: <defaults>
</compile_context>

<pallas_src>
import functools

import jax
import jax.numpy as jnp
import numpy as np
from jax.experimental import pallas as pl
from jax.experimental.pallas import tpu as pltpu

KSIZE = 4
STRIDE = 2
PAD = 1
NEG_SLOPE = 0.2            # activation_fn = LeakyReLU(0.2) in WGAN_UNet's encoders
BN_EPS = 1e-5

TILE_M_CONV = 512          # rows (N*Ho*Wo) per grid step in the tiled fallback conv passes
TILE_M_AFFINE = 1024       # packed rows per grid step in the tiled fallback affine pass
FUSE_VMEM_BUDGET = 12 * 1024 * 1024   # layers whose working set fits here are fully fused
_MiB = 1024 * 1024


@functools.lru_cache(maxsize=1)
def _vmem_limit_bytes():
    """Generation-aware scoped-VMEM budget (~48 MiB on 128-MiB parts, ~28 MiB on v7x)."""
    cap = None
    try:
        cap = getattr(pltpu.get_tpu_info(), "vmem_capacity_bytes", None)
    except Exception:
        cap = None
    if not cap:
        cap = 64 * _MiB                      # conservative: assume the smallest (v7x) VMEM
    return int(min(48 * _MiB, max(16 * _MiB, (cap * 7) // 16)))


def _compiler_params(dim_sem):
    return pltpu.CompilerParams(dimension_semantics=dim_sem,
                                vmem_limit_bytes=_vmem_limit_bytes())


# ---------------------------------------------------------------------------
# Pallas kernels
# ---------------------------------------------------------------------------
def _conv_bias_act_kernel(p_ref, w_ref, b_ref, o_ref, *, neg_slope):
    """No-norm block: conv (im2col matmul, bf16 operands, f32 acc) + bias + LeakyReLU."""
    y = jnp.dot(p_ref[...], w_ref[...], preferred_element_type=jnp.float32)
    y = y + b_ref[...]
    o_ref[...] = jnp.where(y >= 0.0, y, neg_slope * y).astype(o_ref.dtype)


def _fused_conv_bn_act_kernel(p_ref, w_ref, g_ref, be_ref, o_ref, *, neg_slope, inv_m):
    """Whole BN block in one kernel: conv + batch stats + affine + LeakyReLU.

    The conv output never leaves VMEM, so there is no intermediate HBM round trip and
    no separate XLA stats reduction.  The conv bias is skipped (BatchNorm's mean
    subtraction cancels it exactly); variance is the stable two-pass (y - mean) form.
    """
    y = jnp.dot(p_ref[...], w_ref[...], preferred_element_type=jnp.float32)
    mean = jnp.sum(y, axis=0, keepdims=True) * inv_m              # (1, Cout)
    yc = y - mean
    var = jnp.sum(yc * yc, axis=0, keepdims=True) * inv_m
    a = g_ref[...] * jax.lax.rsqrt(var + BN_EPS)
    z = yc * a + be_ref[...]
    o_ref[...] = jnp.where(z >= 0.0, z, neg_slope * z).astype(o_ref.dtype)


def _conv_stats_kernel(p_ref, w_ref, y_ref, s_ref):
    """Tiled fallback, BN pass 1: conv + per-tile channel moments (f32), y stored bf16.

    Conv bias intentionally omitted: BatchNorm's mean subtraction cancels it.
    """
    y = jnp.dot(p_ref[...], w_ref[...], preferred_element_type=jnp.float32)
    # TODO(synk): lane-pack this store in-kernel ((tm, Cout) -> (tm/f, 128) relayout)
    #             so the fallback pass-1 writes are 128-lane dense instead of masked.
    y_ref[...] = y.astype(y_ref.dtype)
    ssum = jnp.sum(y, axis=0, keepdims=True)                      # (1, Cout)
    ssq = jnp.sum(y * y, axis=0, keepdims=True)                   # (1, Cout)
    s_ref[0] = jnp.concatenate([ssum, ssq], axis=0)               # (2, Cout)


def _affine_act_kernel(y_ref, a_ref, c_ref, o_ref, *, neg_slope):
    """Tiled fallback, BN pass 2: LeakyReLU(a*y + c) on lane-packed (rows, 128·) tiles."""
    y = y_ref[...].astype(jnp.float32) * a_ref[...] + c_ref[...]
    o_ref[...] = jnp.where(y >= 0.0, y, neg_slope * y).astype(o_ref.dtype)


# ---------------------------------------------------------------------------
# Tiling helpers
# ---------------------------------------------------------------------------
def _round_up(x, mult):
    return ((x + mult - 1) // mult) * mult


def _choose_tile(m, max_rows):
    """(tile_rows, padded_m): tile is a multiple of 8 and <= max_rows; padded_m is a
    multiple of the tile.  Prefers >= 2 evenly-sized grid steps (v7x has 2 TCs)."""
    if m <= max_rows:
        tm = _round_up((m + 1) // 2, 8) if m >= 16 else _round_up(m, 8)
    else:
        tm = max_rows
    return tm, _round_up(m, tm)


def _lane_pack_factor(m, cout):
    """Pack f row-groups along lanes so elementwise stores are 128-lane dense."""
    if cout >= 128 or 128 % cout != 0:
        return 1
    f = 128 // cout
    return f if m % f == 0 else 1


def _pick_row_tile(m, max_rows, multiple=8):
    """Largest divisor of m that is <= max_rows and a multiple of 8 (affine pass only;
    by construction its m is a multiple of 8, so this never degrades to a huge tile)."""
    if m <= max_rows:
        return m
    t = (max_rows // multiple) * multiple
    while t >= multiple:
        if m % t == 0:
            return t
        t -= multiple
    return m


# ---------------------------------------------------------------------------
# im2col for Conv2d(kernel=4, stride=2, padding=1, zeros); column order (kh, kw, cin)
# ---------------------------------------------------------------------------
def _im2col(x_nhwc):
    # TODO(synk): fuse this into the conv kernels via manual halo DMA of NHWC rows
    #             (k=4,s=2 im2col duplicates every input element ~4x in HBM).
    n, h, w, cin = x_nhwc.shape
    xp = jnp.pad(x_nhwc, ((0, 0), (PAD, PAD), (PAD, PAD), (0, 0)))
    ho = (h + 2 * PAD - KSIZE) // STRIDE + 1
    wo = (w + 2 * PAD - KSIZE) // STRIDE + 1
    cols = []
    for kh in range(KSIZE):
        for kw in range(KSIZE):
            cols.append(xp[:, kh::STRIDE, kw::STRIDE, :][:, :ho, :wo, :])
    p = jnp.stack(cols, axis=3)                                   # (N, Ho, Wo, 16, Cin)
    return p.reshape(n * ho * wo, KSIZE * KSIZE * cin), ho, wo


# ---------------------------------------------------------------------------
# One UNetBlock: conv(k4,s2,p1) -> [bn] -> leaky_relu.  w is torch layout (Cout,Cin,4,4)
# ---------------------------------------------------------------------------
def unet_block(x_nhwc, w, b, gamma, beta, *, use_bn, fuse_vmem_budget=FUSE_VMEM_BUDGET):
    n = x_nhwc.shape[0]
    cout = w.shape[0]

    patches, ho, wo = _im2col(x_nhwc.astype(jnp.bfloat16))
    m, k = patches.shape
    w_mat = jnp.transpose(w, (2, 3, 1, 0)).reshape(k, cout).astype(jnp.bfloat16)

    conv_cost = pl.CostEstimate(
        flops=2 * m * k * cout, transcendentals=0,
        bytes_accessed=m * k * 2 + k * cout * 2 + m * cout * 2)

    # ------------- no-norm layer: conv + bias + LeakyReLU, tiled "parallel" over M -------------
    if not use_bn:
        # TODO(synk): Cin=1 first layer fills <7% of the MXU; a VPU MAC path would also work.
        tm, m_pad = _choose_tile(m, TILE_M_CONV)
        if m_pad != m:
            patches = jnp.pad(patches, ((0, m_pad - m), (0, 0)))
        g = m_pad // tm
        out = pl.pallas_call(
            functools.partial(_conv_bias_act_kernel, neg_slope=NEG_SLOPE),
            out_shape=jax.ShapeDtypeStruct((m_pad, cout), jnp.bfloat16),
            grid=(g,),
            in_specs=[pl.BlockSpec((tm, k), lambda i: (i, 0)),
                      pl.BlockSpec((k, cout), lambda i: (0, 0)),   # VMEM-resident weights
                      pl.BlockSpec((1, cout), lambda i: (0, 0))],
            out_specs=pl.BlockSpec((tm, cout), lambda i: (i, 0)),
            compiler_params=_compiler_params(("parallel",)),
            cost_estimate=conv_cost,
        )(patches, w_mat, b.reshape(1, cout).astype(jnp.float32))
        return out[:m].reshape(n, ho, wo, cout)

    gamma_row = gamma.reshape(1, cout).astype(jnp.float32)
    beta_row = beta.reshape(1, cout).astype(jnp.float32)

    # ------------- fused path: whole BN block in a single pallas_call -------------
    # Working-set estimate: double-buffered bf16 patches + weights + f32 conv result
    # (+ temps) + double-buffered bf16 output.
    fused_bytes = 2 * m * k * 2 + k * cout * 2 + 3 * m * cout * 4 + 2 * m * cout * 2
    if fused_bytes <= min(fuse_vmem_budget, _vmem_limit_bytes() // 2):
        out = pl.pallas_call(
            functools.partial(_fused_conv_bn_act_kernel,
                              neg_slope=NEG_SLOPE, inv_m=1.0 / m),
            out_shape=jax.ShapeDtypeStruct((m, cout), jnp.bfloat16),
            grid=(1,),
            in_specs=[pl.BlockSpec((m, k), lambda i: (0, 0)),
                      pl.BlockSpec((k, cout), lambda i: (0, 0)),
                      pl.BlockSpec((1, cout), lambda i: (0, 0)),
                      pl.BlockSpec((1, cout), lambda i: (0, 0))],
            out_specs=pl.BlockSpec((m, cout), lambda i: (0, 0)),
            compiler_params=_compiler_params(("arbitrary",)),
            cost_estimate=pl.CostEstimate(
                flops=2 * m * k * cout + 8 * m * cout, transcendentals=cout,
                bytes_accessed=m * k * 2 + k * cout * 2 + m * cout * 2),
        )(patches, w_mat, gamma_row, beta_row)
        return out.reshape(n, ho, wo, cout)

    # ------------- tiled fallback: two-pass BN for layers too big to fuse -------------
    tm, m_pad = _choose_tile(m, TILE_M_CONV)
    if m_pad != m:
        patches = jnp.pad(patches, ((0, m_pad - m), (0, 0)))   # zero rows contribute 0 to sums
    g = m_pad // tm

    # pass 1: conv + per-tile channel moments
    y, part = pl.pallas_call(
        _conv_stats_kernel,
        out_shape=(jax.ShapeDtypeStruct((m_pad, cout), jnp.bfloat16),
                   jax.ShapeDtypeStruct((g, 2, cout), jnp.float32)),
        grid=(g,),
        in_specs=[pl.BlockSpec((tm, k), lambda i: (i, 0)),
                  pl.BlockSpec((k, cout), lambda i: (0, 0))],
        out_specs=(pl.BlockSpec((tm, cout), lambda i: (i, 0)),
                   pl.BlockSpec((1, 2, cout), lambda i: (i, 0, 0))),
        compiler_params=_compiler_params(("parallel",)),
        cost_estimate=conv_cost,
    )(patches, w_mat)

    # tiny per-channel fold (global training-mode stats over the true N*Ho*Wo rows)
    sums = jnp.sum(part, axis=0)                                  # (2, Cout)
    mean = sums[0] / m
    var = jnp.maximum(sums[1] / m - mean * mean, 0.0)   # TODO(synk): mean-shifted/Welford form
    a = gamma * jax.lax.rsqrt(var + BN_EPS)
    c = beta - a * mean

    # pass 2: lane-packed affine + LeakyReLU (128-lane-dense loads/stores for Cout=8..64)
    f = _lane_pack_factor(m_pad, cout)
    fc = f * cout
    mf = m_pad // f
    y_packed = y.reshape(mf, fc)                                  # free row-major regrouping
    a_packed = jnp.tile(a, (f,)).reshape(1, fc).astype(jnp.float32)
    c_packed = jnp.tile(c, (f,)).reshape(1, fc).astype(jnp.float32)
    tr = _pick_row_tile(mf, TILE_M_AFFINE)
    g2 = mf // tr
    out = pl.pallas_call(
        functools.partial(_affine_act_kernel, neg_slope=NEG_SLOPE),
        out_shape=jax.ShapeDtypeStruct((mf, fc), jnp.bfloat16),
        grid=(g2,),
        in_specs=[pl.BlockSpec((tr, fc), lambda i: (i, 0)),
                  pl.BlockSpec((1, fc), lambda i: (0, 0)),
                  pl.BlockSpec((1, fc), lambda i: (0, 0))],
        out_specs=pl.BlockSpec((tr, fc), lambda i: (i, 0)),
        compiler_params=_compiler_params(("parallel",)),
        cost_estimate=pl.CostEstimate(flops=3 * mf * fc, transcendentals=0,
                                      bytes_accessed=2 * mf * fc * 2 + 2 * fc * 4),
    )(y_packed, a_packed, c_packed)
    return out.reshape(m_pad, cout)[:m].reshape(n, ho, wo, cout)


# ---------------------------------------------------------------------------
# UNetEncoder forward (batch_norm=True path: first layer has no norm)
# ---------------------------------------------------------------------------
def unet_encoder(x_nchw, params, store_activations=True, batch_norm=True,
                 fuse_vmem_budget=FUSE_VMEM_BUDGET, out_layout="NCHW"):
    if not batch_norm:
        # TODO(synk): batch_norm=False uses InstanceNorm2d(affine=True) in the module.
        raise NotImplementedError("only the batch_norm=True encoder path is implemented")
    x = jnp.transpose(x_nchw, (0, 2, 3, 1)).astype(jnp.bfloat16)  # NCHW -> NHWC once
    feats = []
    nlayers = len(params)
    for i, (w, b, g, be) in enumerate(params):
        use_bn = (i != 0)                                         # first layer: norm=None
        x = unet_block(x, w, b, g, be, use_bn=use_bn, fuse_vmem_budget=fuse_vmem_budget)
        if store_activations and i < nlayers - 1:
            feats.append(x)                                       # keep bf16 NHWC in the loop
    # layout/dtype plumbing deferred to the end: one fused transpose+cast per tensor
    if out_layout == "NCHW":
        out = jnp.transpose(x, (0, 3, 1, 2)).astype(jnp.float32)
        feats = [jnp.transpose(f, (0, 3, 1, 2)).astype(jnp.float32) for f in feats]
    else:
        out = x.astype(jnp.float32)
        feats = [f.astype(jnp.float32) for f in feats]
    return out, feats[::-1]


# ---------------------------------------------------------------------------
# Deterministic parameter init (mirrors init_weights(): kaiming normal, bias=0.01)
# ---------------------------------------------------------------------------
def init_params(key, channels):
    params = []
    for i in range(len(channels) - 1):
        cin, cout = channels[i], channels[i + 1]
        key, sub = jax.random.split(key)
        fan_in = cin * KSIZE * KSIZE
        gain = (2.0 / (1.0 + 0.01 ** 2)) ** 0.5       # kaiming_normal_, 'leaky_relu'
        std = gain / (fan_in ** 0.5)
        w = std * jax.random.normal(sub, (cout, cin, KSIZE, KSIZE), jnp.float32)
        b = jnp.full((cout,), 0.01, jnp.float32)
        gamma = jnp.ones((cout,), jnp.float32)
        beta = jnp.zeros((cout,), jnp.float32)
        params.append((w, b, gamma, beta))
    return params


# ---------------------------------------------------------------------------
# Pure-JAX reference with matching numerics: bf16 conv operands (f32 accumulation),
# bf16 inter-layer activations, f32 BN / activation math.  round_y_bf16 additionally
# rounds the conv output to bf16 before BN (matches the tiled fallback's y store).
# ---------------------------------------------------------------------------
def ref_forward(x_nchw, params, round_y_bf16=False):
    x = x_nchw
    feats = []
    for i, (w, b, g, be) in enumerate(params):
        y = jax.lax.conv_general_dilated(
            x.astype(jnp.bfloat16), w.astype(jnp.bfloat16),
            window_strides=(STRIDE, STRIDE), padding=((PAD, PAD), (PAD, PAD)),
            dimension_numbers=('NCHW', 'OIHW', 'NCHW'),
            preferred_element_type=jnp.float32)
        y = y + b[None, :, None, None]
        if i != 0:
            if round_y_bf16:
                y = y.astype(jnp.bfloat16).astype(jnp.float32)
            mean = y.mean(axis=(0, 2, 3), keepdims=True)
            var = ((y - mean) ** 2).mean(axis=(0, 2, 3), keepdims=True)
            y = (y - mean) * jax.lax.rsqrt(var + BN_EPS)
            y = y * g[None, :, None, None] + be[None, :, None, None]
        y = jnp.where(y >= 0.0, y, NEG_SLOPE * y)
        x = y.astype(jnp.bfloat16).astype(jnp.float32)            # kernel activations are bf16
        if i < len(params) - 1:
            feats.append(x)
    return x, feats[::-1]


if __name__ == "__main__":
    key = jax.random.PRNGKey(0)
    k_par, k_inp = jax.random.split(key)

    # Small config consistent with the module (configurable channels tuple).
    channels = (1, 8, 16, 32, 64)                      # 4 UNetBlocks, each halves H, W
    params = init_params(k_par, channels)
    x = jax.random.normal(k_inp, (2, 1, 64, 64), jnp.float32)     # NCHW like nn.Conv2d

    # primary path: one fused pallas_call per layer
    fwd = jax.jit(functools.partial(unet_encoder, store_activations=True, batch_norm=True))
    out, feats = fwd(x, params)
    out = jax.block_until_ready(out)
    feats = [jax.block_until_ready(f) for f in feats]

    # sanity: shapes match the PyTorch forward
    assert out.shape == (2, 64, 4, 4)
    assert [f.shape for f in feats] == [(2, 32, 8, 8), (2, 16, 16, 16), (2, 8, 32, 32)]

    # numeric check against the matching-numerics pure-JAX reference
    out_ref, feats_ref = ref_forward(x, params)
    np.testing.assert_allclose(np.asarray(out), np.asarray(out_ref), rtol=2e-2, atol=2e-2)
    for fk, fr in zip(feats, feats_ref):
        np.testing.assert_allclose(np.asarray(fk), np.asarray(fr), rtol=2e-2, atol=2e-2)

    # also exercise the tiled two-pass fallback path (used when a layer is too big to
    # fuse, e.g. real 512x512 inputs) by forcing the fused-path budget to zero.
    fwd_tiled = jax.jit(functools.partial(unet_encoder, store_activations=True,
                                          batch_norm=True, fuse_vmem_budget=0))
    out_t, _feats_t = fwd_tiled(x, params)
    out_t = jax.block_until_ready(out_t)
    out_ref_t, _ = ref_forward(x, params, round_y_bf16=True)
    np.testing.assert_allclose(np.asarray(out_t), np.asarray(out_ref_t), rtol=3e-2, atol=3e-2)

    print("KERNEL_OK")
</pallas_src>

<mosaic_0001>
module attributes {stable_mosaic.version = 11 : i64} {
  func.func @_conv_bias_act_kernel(%arg0: i32, %arg1: memref<512x16xbf16, #tpu.memory_space<vmem>>, %arg2: memref<16x8xbf16, #tpu.memory_space<vmem>>, %arg3: memref<1x8xf32, #tpu.memory_space<vmem>>, %arg4: memref<512x8xbf16, #tpu.memory_space<vmem>>) attributes {dimension_semantics = [#tpu.dimension_semantics<parallel>], iteration_bounds = array<i64: 4>, scalar_prefetch = 0 : i64, scratch_operands = 0 : i64, tpu.core_type = #tpu.core_type<tc>, window_params = [{transform_indices = @transform_0, window_bounds = array<i64: 512, 16>}, {pipeline_mode = #tpu.pipeline_mode<synchronous>, transform_indices = @transform_1, window_bounds = array<i64: 16, 8>}, {pipeline_mode = #tpu.pipeline_mode<synchronous>, transform_indices = @transform_2, window_bounds = array<i64: 1, 8>}, {transform_indices = @transform_3, window_bounds = array<i64: 512, 8>}]} {
    %c0 = arith.constant 0 : index
    %c0_0 = arith.constant 0 : index
    %0 = vector.load %arg1[%c0, %c0_0] : memref<512x16xbf16, #tpu.memory_space<vmem>>, vector<512x16xbf16>
    %c0_1 = arith.constant 0 : index
    %c0_2 = arith.constant 0 : index
    %1 = vector.load %arg2[%c0_1, %c0_2] : memref<16x8xbf16, #tpu.memory_space<vmem>>, vector<16x8xbf16>
    %cst = arith.constant dense<0.000000e+00> : vector<512x8xf32>
    %2 = tpu.matmul %0, %1, %cst {dimension_numbers = #tpu.dot_dimension_numbers<[1], [0], [0], [1], [0, 0, 1, 1], [], []>} : vector<512x16xbf16>, vector<16x8xbf16>, vector<512x8xf32> -> vector<512x8xf32>
    %c0_3 = arith.constant 0 : index
    %c0_4 = arith.constant 0 : index
    %3 = vector.load %arg3[%c0_3, %c0_4] : memref<1x8xf32, #tpu.memory_space<vmem>>, vector<1x8xf32>
    %4 = vector.broadcast %3 : vector<1x8xf32> to vector<512x8xf32>
    %5 = arith.addf %2, %4 : vector<512x8xf32>
    %cst_5 = arith.constant 0.000000e+00 : f32
    %6 = vector.broadcast %cst_5 : f32 to vector<512x8xf32>
    %7 = arith.cmpf oge, %5, %6 : vector<512x8xf32>
    %cst_6 = arith.constant 2.000000e-01 : f32
    %8 = vector.broadcast %cst_6 : f32 to vector<512x8xf32>
    %9 = arith.mulf %8, %5 : vector<512x8xf32>
    %10 = arith.select %7, %5, %9 : vector<512x8xi1>, vector<512x8xf32>
    %11 = arith.truncf %10 : vector<512x8xf32> to vector<512x8xbf16>
    %c0_7 = arith.constant 0 : index
    %c0_8 = arith.constant 0 : index
    %12 = vector.load %arg4[%c0_7, %c0_8] : memref<512x8xbf16, #tpu.memory_space<vmem>>, vector<512x8xbf16>
    tpu.vector_store %arg4[%c0_7, %c0_8], %11 {strides = array<i32>} : memref<512x8xbf16, #tpu.memory_space<vmem>>, vector<512x8xbf16>,
    return
  }
  func.func @transform_0(%arg0: i32) -> (i32, i32) {
    %c0_i32 = arith.constant 0 : i32
    %c0_i32_0 = arith.constant 0 : i32
    return %arg0, %c0_i32 : i32, i32
  }
  func.func @transform_1(%arg0: i32) -> (i32, i32) {
    %c0_i32 = arith.constant 0 : i32
    %c0_i32_0 = arith.constant 0 : i32
    %c0_i32_1 = arith.constant 0 : i32
    return %c0_i32, %c0_i32_0 : i32, i32
  }
  func.func @transform_2(%arg0: i32) -> (i32, i32) {
    %c0_i32 = arith.constant 0 : i32
    %c0_i32_0 = arith.constant 0 : i32
    %c0_i32_1 = arith.constant 0 : i32
    return %c0_i32, %c0_i32_0 : i32, i32
  }
  func.func @transform_3(%arg0: i32) -> (i32, i32) {
    %c0_i32 = arith.constant 0 : i32
    %c0_i32_0 = arith.constant 0 : i32
    return %arg0, %c0_i32 : i32, i32
  }
}

module attributes {stable_mosaic.version = 11 : i64} {
  func.func @_fused_conv_bn_act_kernel(%arg0: i32, %arg1: memref<512x128xbf16, #tpu.memory_space<vmem>>, %arg2: memref<128x16xbf16, #tpu.memory_space<vmem>>, %arg3: memref<1x16xf32, #tpu.memory_space<vmem>>, %arg4: memref<1x16xf32, #tpu.memory_space<vmem>>, %arg5: memref<512x16xbf16, #tpu.memory_space<vmem>>) attributes {dimension_semantics = [#tpu.dimension_semantics<arbitrary>], iteration_bounds = array<i64: 1>, scalar_prefetch = 0 : i64, scratch_operands = 0 : i64, tpu.core_type = #tpu.core_type<tc>, window_params = [{pipeline_mode = #tpu.pipeline_mode<synchronous>, transform_indices = @transform_0, window_bounds = array<i64: 512, 128>}, {pipeline_mode = #tpu.pipeline_mode<synchronous>, transform_indices = @transform_1, window_bounds = array<i64: 128, 16>}, {pipeline_mode = #tpu.pipeline_mode<synchronous>, transform_indices = @transform_2, window_bounds = array<i64: 1, 16>}, {pipeline_mode = #tpu.pipeline_mode<synchronous>, transform_indices = @transform_3, window_bounds = array<i64: 1, 16>}, {pipeline_mode = #tpu.pipeline_mode<synchronous>, transform_indices = @transform_4, window_bounds = array<i64: 512, 16>}]} {
    %c0 = arith.constant 0 : index
    %c0_0 = arith.constant 0 : index
    %0 = vector.load %arg1[%c0, %c0_0] : memref<512x128xbf16, #tpu.memory_space<vmem>>, vector<512x128xbf16>
    %c0_1 = arith.constant 0 : index
    %c0_2 = arith.constant 0 : index
    %1 = vector.load %arg2[%c0_1, %c0_2] : memref<128x16xbf16, #tpu.memory_space<vmem>>, vector<128x16xbf16>
    %cst = arith.constant dense<0.000000e+00> : vector<512x16xf32>
    %2 = tpu.matmul %0, %1, %cst {dimension_numbers = #tpu.dot_dimension_numbers<[1], [0], [0], [1], [0, 0, 1, 1], [], []>} : vector<512x128xbf16>, vector<128x16xbf16>, vector<512x16xf32> -> vector<512x16xf32>
    %cst_3 = arith.constant dense<0.000000e+00> : vector<16xf32>
    %3 = vector.multi_reduction <add>, %2, %cst_3 [0] : vector<512x16xf32> to vector<16xf32>
    %4 = vector.shape_cast %3 : vector<16xf32> to vector<1x16xf32>
    %cst_4 = arith.constant 0.001953125 : f32
    %5 = vector.broadcast %cst_4 : f32 to vector<1x16xf32>
    %6 = arith.mulf %4, %5 : vector<1x16xf32>
    %7 = vector.broadcast %6 : vector<1x16xf32> to vector<512x16xf32>
    %8 = arith.subf %2, %7 : vector<512x16xf32>
    %9 = arith.mulf %8, %8 : vector<512x16xf32>
    %cst_5 = arith.constant dense<0.000000e+00> : vector<16xf32>
    %10 = vector.multi_reduction <add>, %9, %cst_5 [0] : vector<512x16xf32> to vector<16xf32>
    %11 = vector.shape_cast %10 : vector<16xf32> to vector<1x16xf32>
    %cst_6 = arith.constant 0.001953125 : f32
    %12 = vector.broadcast %cst_6 : f32 to vector<1x16xf32>
    %13 = arith.mulf %11, %12 : vector<1x16xf32>
    %c0_7 = arith.constant 0 : index
    %c0_8 = arith.constant 0 : index
    %14 = vector.load %arg3[%c0_7, %c0_8] : memref<1x16xf32, #tpu.memory_space<vmem>>, vector<1x16xf32>
    %cst_9 = arith.constant 9.99999974E-6 : f32
    %15 = vector.broadcast %cst_9 : f32 to vector<1x16xf32>
    %16 = arith.addf %13, %15 : vector<1x16xf32>
    %17 = math.rsqrt %16 : vector<1x16xf32>
    %18 = arith.mulf %14, %17 : vector<1x16xf32>
    %19 = vector.broadcast %18 : vector<1x16xf32> to vector<512x16xf32>
    %20 = arith.mulf %8, %19 : vector<512x16xf32>
    %c0_10 = arith.constant 0 : index
    %c0_11 = arith.constant 0 : index
    %21 = vector.load %arg4[%c0_10, %c0_11] : memref<1x16xf32, #tpu.memory_space<vmem>>, vector<1x16xf32>
    %22 = vector.broadcast %21 : vector<1x16xf32> to vector<512x16xf32>
    %23 = arith.addf %20, %22 : vector<512x16xf32>
    %cst_12 = arith.constant 0.000000e+00 : f32
    %24 = vector.broadcast %cst_12 : f32 to vector<512x16xf32>
    %25 = arith.cmpf oge, %23, %24 : vector<512x16xf32>
    %cst_13 = arith.constant 2.000000e-01 : f32
    %26 = vector.broadcast %cst_13 : f32 to vector<512x16xf32>
    %27 = arith.mulf %26, %23 : vector<512x16xf32>
    %28 = arith.select %25, %23, %27 : vector<512x16xi1>, vector<512x16xf32>
    %29 = arith.truncf %28 : vector<512x16xf32> to vector<512x16xbf16>
    %c0_14 = arith.constant 0 : index
    %c0_15 = arith.constant 0 : index
    %30 = vector.load %arg5[%c0_14, %c0_15] : memref<512x16xbf16, #tpu.memory_space<vmem>>, vector<512x16xbf16>
    tpu.vector_store %arg5[%c0_14, %c0_15], %29 {strides = array<i32>} : memref<512x16xbf16, #tpu.memory_space<vmem>>, vector<512x16xbf16>,
    return
  }
  func.func @transform_0(%arg0: i32) -> (i32, i32) {
    %c0_i32 = arith.constant 0 : i32
    %c0_i32_0 = arith.constant 0 : i32
    %c0_i32_1 = arith.constant 0 : i32
    return %c0_i32, %c0_i32_0 : i32, i32
  }
  func.func @transform_1(%arg0: i32) -> (i32, i32) {
    %c0_i32 = arith.constant 0 : i32
    %c0_i32_0 = arith.constant 0 : i32
    %c0_i32_1 = arith.constant 0 : i32
    return %c0_i32, %c0_i32_0 : i32, i32
  }
  func.func @transform_2(%arg0: i32) -> (i32, i32) {
    %c0_i32 = arith.constant 0 : i32
    %c0_i32_0 = arith.constant 0 : i32
    %c0_i32_1 = arith.constant 0 : i32
    return %c0_i32, %c0_i32_0 : i32, i32
  }
  func.func @transform_3(%arg0: i32) -> (i32, i32) {
    %c0_i32 = arith.constant 0 : i32
    %c0_i32_0 = arith.constant 0 : i32
    %c0_i32_1 = arith.constant 0 : i32
    return %c0_i32, %c0_i32_0 : i32, i32
  }
  func.func @transform_4(%arg0: i32) -> (i32, i32) {
    %c0_i32 = arith.constant 0 : i32
    %c0_i32_0 = arith.constant 0 : i32
    %c0_i32_1 = arith.constant 0 : i32
    return %c0_i32, %c0_i32_0 : i32, i32
  }
}

module attributes {stable_mosaic.version = 11 : i64} {
  func.func @_fused_conv_bn_act_kernel(%arg0: i32, %arg1: memref<128x256xbf16, #tpu.memory_space<vmem>>, %arg2: memref<256x32xbf16, #tpu.memory_space<vmem>>, %arg3: memref<1x32xf32, #tpu.memory_space<vmem>>, %arg4: memref<1x32xf32, #tpu.memory_space<vmem>>, %arg5: memref<128x32xbf16, #tpu.memory_space<vmem>>) attributes {dimension_semantics = [#tpu.dimension_semantics<arbitrary>], iteration_bounds = array<i64: 1>, scalar_prefetch = 0 : i64, scratch_operands = 0 : i64, tpu.core_type = #tpu.core_type<tc>, window_params = [{pipeline_mode = #tpu.pipeline_mode<synchronous>, transform_indices = @transform_0, window_bounds = array<i64: 128, 256>}, {pipeline_mode = #tpu.pipeline_mode<synchronous>, transform_indices = @transform_1, window_bounds = array<i64: 256, 32>}, {pipeline_mode = #tpu.pipeline_mode<synchronous>, transform_indices = @transform_2, window_bounds = array<i64: 1, 32>}, {pipeline_mode = #tpu.pipeline_mode<synchronous>, transform_indices = @transform_3, window_bounds = array<i64: 1, 32>}, {pipeline_mode = #tpu.pipeline_mode<synchronous>, transform_indices = @transform_4, window_bounds = array<i64: 128, 32>}]} {
    %c0 = arith.constant 0 : index
    %c0_0 = arith.constant 0 : index
    %0 = vector.load %arg1[%c0, %c0_0] : memref<128x256xbf16, #tpu.memory_space<vmem>>, vector<128x256xbf16>
    %c0_1 = arith.constant 0 : index
    %c0_2 = arith.constant 0 : index
    %1 = vector.load %arg2[%c0_1, %c0_2] : memref<256x32xbf16, #tpu.memory_space<vmem>>, vector<256x32xbf16>
    %cst = arith.constant dense<0.000000e+00> : vector<128x32xf32>
    %2 = tpu.matmul %0, %1, %cst {dimension_numbers = #tpu.dot_dimension_numbers<[1], [0], [0], [1], [0, 0, 1, 1], [], []>} : vector<128x256xbf16>, vector<256x32xbf16>, vector<128x32xf32> -> vector<128x32xf32>
    %cst_3 = arith.constant dense<0.000000e+00> : vector<32xf32>
    %3 = vector.multi_reduction <add>, %2, %cst_3 [0] : vector<128x32xf32> to vector<32xf32>
    %4 = vector.shape_cast %3 : vector<32xf32> to vector<1x32xf32>
    %cst_4 = arith.constant 7.812500e-03 : f32
    %5 = vector.broadcast %cst_4 : f32 to vector<1x32xf32>
    %6 = arith.mulf %4, %5 : vector<1x32xf32>
    %7 = vector.broadcast %6 : vector<1x32xf32> to vector<128x32xf32>
    %8 = arith.subf %2, %7 : vector<128x32xf32>
    %9 = arith.mulf %8, %8 : vector<128x32xf32>
    %cst_5 = arith.constant dense<0.000000e+00> : vector<32xf32>
    %10 = vector.multi_reduction <add>, %9, %cst_5 [0] : vector<128x32xf32> to vector<32xf32>
    %11 = vector.shape_cast %10 : vector<32xf32> to vector<1x32xf32>
    %cst_6 = arith.constant 7.812500e-03 : f32
    %12 = vector.broadcast %cst_6 : f32 to vector<1x32xf32>
    %13 = arith.mulf %11, %12 : vector<1x32xf32>
    %c0_7 = arith.constant 0 : index
    %c0_8 = arith.constant 0 : index
    %14 = vector.load %arg3[%c0_7, %c0_8] : memref<1x32xf32, #tpu.memory_space<vmem>>, vector<1x32xf32>
    %cst_9 = arith.constant 9.99999974E-6 : f32
    %15 = vector.broadcast %cst_9 : f32 to vector<1x32xf32>
    %16 = arith.addf %13, %15 : vector<1x32xf32>
    %17 = math.rsqrt %16 : vector<1x32xf32>
    %18 = arith.mulf %14, %17 : vector<1x32xf32>
    %19 = vector.broadcast %18 : vector<1x32xf32> to vector<128x32xf32>
    %20 = arith.mulf %8, %19 : vector<128x32xf32>
    %c0_10 = arith.constant 0 : index
    %c0_11 = arith.constant 0 : index
    %21 = vector.load %arg4[%c0_10, %c0_11] : memref<1x32xf32, #tpu.memory_space<vmem>>, vector<1x32xf32>
    %22 = vector.broadcast %21 : vector<1x32xf32> to vector<128x32xf32>
    %23 = arith.addf %20, %22 : vector<128x32xf32>
    %cst_12 = arith.constant 0.000000e+00 : f32
    %24 = vector.broadcast %cst_12 : f32 to vector<128x32xf32>
    %25 = arith.cmpf oge, %23, %24 : vector<128x32xf32>
    %cst_13 = arith.constant 2.000000e-01 : f32
    %26 = vector.broadcast %cst_13 : f32 to vector<128x32xf32>
    %27 = arith.mulf %26, %23 : vector<128x32xf32>
    %28 = arith.select %25, %23, %27 : vector<128x32xi1>, vector<128x32xf32>
    %29 = arith.truncf %28 : vector<128x32xf32> to vector<128x32xbf16>
    %c0_14 = arith.constant 0 : index
    %c0_15 = arith.constant 0 : index
    %30 = vector.load %arg5[%c0_14, %c0_15] : memref<128x32xbf16, #tpu.memory_space<vmem>>, vector<128x32xbf16>
    tpu.vector_store %arg5[%c0_14, %c0_15], %29 {strides = array<i32>} : memref<128x32xbf16, #tpu.memory_space<vmem>>, vector<128x32xbf16>,
    return
  }
  func.func @transform_0(%arg0: i32) -> (i32, i32) {
    %c0_i32 = arith.constant 0 : i32
    %c0_i32_0 = arith.constant 0 : i32
    %c0_i32_1 = arith.constant 0 : i32
    return %c0_i32, %c0_i32_0 : i32, i32
  }
  func.func @transform_1(%arg0: i32) -> (i32, i32) {
    %c0_i32 = arith.constant 0 : i32
    %c0_i32_0 = arith.constant 0 : i32
    %c0_i32_1 = arith.constant 0 : i32
    return %c0_i32, %c0_i32_0 : i32, i32
  }
  func.func @transform_2(%arg0: i32) -> (i32, i32) {
    %c0_i32 = arith.constant 0 : i32
    %c0_i32_0 = arith.constant 0 : i32
    %c0_i32_1 = arith.constant 0 : i32
    return %c0_i32, %c0_i32_0 : i32, i32
  }
  func.func @transform_3(%arg0: i32) -> (i32, i32) {
    %c0_i32 = arith.constant 0 : i32
    %c0_i32_0 = arith.constant 0 : i32
    %c0_i32_1 = arith.constant 0 : i32
    return %c0_i32, %c0_i32_0 : i32, i32
  }
  func.func @transform_4(%arg0: i32) -> (i32, i32) {
    %c0_i32 = arith.constant 0 : i32
    %c0_i32_0 = arith.constant 0 : i32
    %c0_i32_1 = arith.constant 0 : i32
    return %c0_i32, %c0_i32_0 : i32, i32
  }
}

module attributes {stable_mosaic.version = 11 : i64} {
  func.func @_fused_conv_bn_act_kernel(%arg0: i32, %arg1: memref<32x512xbf16, #tpu.memory_space<vmem>>, %arg2: memref<512x64xbf16, #tpu.memory_space<vmem>>, %arg3: memref<1x64xf32, #tpu.memory_space<vmem>>, %arg4: memref<1x64xf32, #tpu.memory_space<vmem>>, %arg5: memref<32x64xbf16, #tpu.memory_space<vmem>>) attributes {dimension_semantics = [#tpu.dimension_semantics<arbitrary>], iteration_bounds = array<i64: 1>, scalar_prefetch = 0 : i64, scratch_operands = 0 : i64, tpu.core_type = #tpu.core_type<tc>, window_params = [{pipeline_mode = #tpu.pipeline_mode<synchronous>, transform_indices = @transform_0, window_bounds = array<i64: 32, 512>}, {pipeline_mode = #tpu.pipeline_mode<synchronous>, transform_indices = @transform_1, window_bounds = array<i64: 512, 64>}, {pipeline_mode = #tpu.pipeline_mode<synchronous>, transform_indices = @transform_2, window_bounds = array<i64: 1, 64>}, {pipeline_mode = #tpu.pipeline_mode<synchronous>, transform_indices = @transform_3, window_bounds = array<i64: 1, 64>}, {pipeline_mode = #tpu.pipeline_mode<synchronous>, transform_indices = @transform_4, window_bounds = array<i64: 32, 64>}]} {
    %c0 = arith.constant 0 : index
    %c0_0 = arith.constant 0 : index
    %0 = vector.load %arg1[%c0, %c0_0] : memref<32x512xbf16, #tpu.memory_space<vmem>>, vector<32x512xbf16>
    %c0_1 = arith.constant 0 : index
    %c0_2 = arith.constant 0 : index
    %1 = vector.load %arg2[%c0_1, %c0_2] : memref<512x64xbf16, #tpu.memory_space<vmem>>, vector<512x64xbf16>
    %cst = arith.constant dense<0.000000e+00> : vector<32x64xf32>
    %2 = tpu.matmul %0, %1, %cst {dimension_numbers = #tpu.dot_dimension_numbers<[1], [0], [0], [1], [0, 0, 1, 1], [], []>} : vector<32x512xbf16>, vector<512x64xbf16>, vector<32x64xf32> -> vector<32x64xf32>
    %cst_3 = arith.constant dense<0.000000e+00> : vector<64xf32>
    %3 = vector.multi_reduction <add>, %2, %cst_3 [0] : vector<32x64xf32> to vector<64xf32>
    %4 = vector.shape_cast %3 : vector<64xf32> to vector<1x64xf32>
    %cst_4 = arith.constant 3.125000e-02 : f32
    %5 = vector.broadcast %cst_4 : f32 to vector<1x64xf32>
    %6 = arith.mulf %4, %5 : vector<1x64xf32>
    %7 = vector.broadcast %6 : vector<1x64xf32> to vector<32x64xf32>
    %8 = arith.subf %2, %7 : vector<32x64xf32>
    %9 = arith.mulf %8, %8 : vector<32x64xf32>
    %cst_5 = arith.constant dense<0.000000e+00> : vector<64xf32>
    %10 = vector.multi_reduction <add>, %9, %cst_5 [0] : vector<32x64xf32> to vector<64xf32>
    %11 = vector.shape_cast %10 : vector<64xf32> to vector<1x64xf32>
    %cst_6 = arith.constant 3.125000e-02 : f32
    %12 = vector.broadcast %cst_6 : f32 to vector<1x64xf32>
    %13 = arith.mulf %11, %12 : vector<1x64xf32>
    %c0_7 = arith.constant 0 : index
    %c0_8 = arith.constant 0 : index
    %14 = vector.load %arg3[%c0_7, %c0_8] : memref<1x64xf32, #tpu.memory_space<vmem>>, vector<1x64xf32>
    %cst_9 = arith.constant 9.99999974E-6 : f32
    %15 = vector.broadcast %cst_9 : f32 to vector<1x64xf32>
    %16 = arith.addf %13, %15 : vector<1x64xf32>
    %17 = math.rsqrt %16 : vector<1x64xf32>
    %18 = arith.mulf %14, %17 : vector<1x64xf32>
    %19 = vector.broadcast %18 : vector<1x64xf32> to vector<32x64xf32>
    %20 = arith.mulf %8, %19 : vector<32x64xf32>
    %c0_10 = arith.constant 0 : index
    %c0_11 = arith.constant 0 : index
    %21 = vector.load %arg4[%c0_10, %c0_11] : memref<1x64xf32, #tpu.memory_space<vmem>>, vector<1x64xf32>
    %22 = vector.broadcast %21 : vector<1x64xf32> to vector<32x64xf32>
    %23 = arith.addf %20, %22 : vector<32x64xf32>
    %cst_12 = arith.constant 0.000000e+00 : f32
    %24 = vector.broadcast %cst_12 : f32 to vector<32x64xf32>
    %25 = arith.cmpf oge, %23, %24 : vector<32x64xf32>
    %cst_13 = arith.constant 2.000000e-01 : f32
    %26 = vector.broadcast %cst_13 : f32 to vector<32x64xf32>
    %27 = arith.mulf %26, %23 : vector<32x64xf32>
    %28 = arith.select %25, %23, %27 : vector<32x64xi1>, vector<32x64xf32>
    %29 = arith.truncf %28 : vector<32x64xf32> to vector<32x64xbf16>
    %c0_14 = arith.constant 0 : index
    %c0_15 = arith.constant 0 : index
    %30 = vector.load %arg5[%c0_14, %c0_15] : memref<32x64xbf16, #tpu.memory_space<vmem>>, vector<32x64xbf16>
    tpu.vector_store %arg5[%c0_14, %c0_15], %29 {strides = array<i32>} : memref<32x64xbf16, #tpu.memory_space<vmem>>, vector<32x64xbf16>,
    return
  }
  func.func @transform_0(%arg0: i32) -> (i32, i32) {
    %c0_i32 = arith.constant 0 : i32
    %c0_i32_0 = arith.constant 0 : i32
    %c0_i32_1 = arith.constant 0 : i32
    return %c0_i32, %c0_i32_0 : i32, i32
  }
  func.func @transform_1(%arg0: i32) -> (i32, i32) {
    %c0_i32 = arith.constant 0 : i32
    %c0_i32_0 = arith.constant 0 : i32
    %c0_i32_1 = arith.constant 0 : i32
    return %c0_i32, %c0_i32_0 : i32, i32
  }
  func.func @transform_2(%arg0: i32) -> (i32, i32) {
    %c0_i32 = arith.constant 0 : i32
    %c0_i32_0 = arith.constant 0 : i32
    %c0_i32_1 = arith.constant 0 : i32
    return %c0_i32, %c0_i32_0 : i32, i32
  }
  func.func @transform_3(%arg0: i32) -> (i32, i32) {
    %c0_i32 = arith.constant 0 : i32
    %c0_i32_0 = arith.constant 0 : i32
    %c0_i32_1 = arith.constant 0 : i32
    return %c0_i32, %c0_i32_0 : i32, i32
  }
  func.func @transform_4(%arg0: i32) -> (i32, i32) {
    %c0_i32 = arith.constant 0 : i32
    %c0_i32_0 = arith.constant 0 : i32
    %c0_i32_1 = arith.constant 0 : i32
    return %c0_i32, %c0_i32_0 : i32, i32
  }
}

</mosaic_0001>

<bundles_post_ra>
// kernel: unet_encoder.4
= control target key start
LH: loop header
LB: loop body
LE: loop exit
PB: predicated region body
PF: predicated region fallthrough
CT: control target
= control target key end

     0   :  { %s1744_s12 = smov 0   ;;  %s2065_s0 = inlined_call_operand.vmem [shape: bf16[2048,16], index: 0, kind: input, shape index: {}]   ;;  %s2066_s1 = inlined_call_operand.vmem [shape: bf16[16,8], index: 1, kind: input, shape index: {}]   ;;  %s2067_s2 = inlined_call_operand.vmem [shape: f32[1,8], index: 2, kind: input, shape index: {}]   ;;  %s2068_s3 = inlined_call_operand.vmem [shape: bf16[2048,8], index: 3, kind: output, shape index: {}]  }
   0x1 LB: > { %s1369_s13 = sadd.s32 4294967295, %s1722_s12   ;;  %p1373_p0 = scmp.ge.s32.totalorder %s1722_s12, 1  ;;  %s1722_s12 = sphi %s1744_s12, %s13_s12  }
   0x2   : > { %p138_p1 = scmp.lt.s32.totalorder %s1722_s12, 5 }
   0x4   : > { %p139_p2 = pnand %p1373_p0, %p138_p1 }
   0x5   : > { %s1374_s16 = sshll.u32 (!%p139_p2), %s1369_s13, 6 }
   0x6   : > { %142 = sbr.rel (%p139_p2) target bundleno = 295 (0x127), region = 32  ;;  %p163_p3 = scmp.lt.s32.totalorder (!%p139_p2), %s1374_s16, 255 }
   0xb   : > { %v1683_v0 = vld [vmem:[%s2066_s1] sm:$0xff]   ;;  %s2070_s16 = smov (!%p163_p3, %s1374_s16), 255  ;;  %vm414_vm0 = vcmask 130048   ;;  %vm1248_vm2 = vcmask 60416  }
   0xc   : > { %1607 = vmatprep.subr.bf16.mxu0 %v1683_v0  ;;  %1673 = vmatprep.subr.bf16.mxu1 %v1683_v0  ;;  %s1375_s17 = sshll.u32 %s2070_s16, 2  ;;  %v1832_v33 = vld [vmem:[%s2067_s2] ss:$0 sm:$0xff] }
   0xd   : > { %1608 = vmatpush3.bf16.msra.mxu0 %v1683_v0  ;;  %1674 = vmatpush3.bf16.msra.mxu1 %v1683_v0  ;;  %s1763_s20 = scalar_lea.vmem %s2065_s0, %s1375_s17  ;;  %s1843_s25 = scalar_lea.vmem %s2068_s3, %s1375_s17 }
   0xe   : > { %v1684_v1 = vld [vmem:[%s1763_s20] sm:$0xff]   ;;  %v1686_v3 = vld [vmem:[%s1763_s20 + $0x8] sm:$0xff]   ;;  %v1688_v5 = vld [vmem:[%s1763_s20 + $0x10] sm:$0xff]  }
   0xf   : > { %v1685_v2 = vld [vmem:[%s1763_s20 + $0x80] sm:$0xff]   ;;  %1609 = vmatprep.mubr.msk.bf16.mxu0 %vm414_vm0, %v1684_v1  ;;  %v1687_v4 = vld [vmem:[%s1763_s20 + $0x88] sm:$0xff]   ;;  %v1689_v6 = vld [vmem:[%s1763_s20 + $0x90] sm:$0xff]  }
  0x10   : > { %1641 = vmatprep.mubr.msk.bf16.mxu1 %vm414_vm0, %v1685_v2  ;;  %1610 = vmatmul.mubr.msk.bf16.vlgmr.msra.gmra.mxu0 %vm414_vm0, %v1686_v3  ;;  %v1690_v7 = vld [vmem:[%s1763_s20 + $0x18] sm:$0xff]   ;;  %v1692_v9 = vld [vmem:[%s1763_s20 + $0x20] sm:$0xff]   ;;  %v1694_v11 = vld [vmem:[%s1763_s20 + $0x28] sm:$0xff]  }
  0x11   : > { %1642 = vmatmul.mubr.msk.bf16.vlgmr.msra.gmra.mxu1 %vm414_vm0, %v1687_v4  ;;  %1613 = vmatprep.mubr.msk.bf16.mxu0 %vm414_vm0, %v1688_v5  ;;  %v1691_v8 = vld [vmem:[%s1763_s20 + $0x98] sm:$0xff]   ;;  %v1693_v10 = vld [vmem:[%s1763_s20 + $0xa0] sm:$0xff]   ;;  %v1695_v12 = vld [vmem:[%s1763_s20 + $0xa8] sm:$0xff]  }
  0x12   : > { %1645 = vmatprep.mubr.msk.bf16.mxu1 %vm414_vm0, %v1689_v6  ;;  %v1696_v13 = vld [vmem:[%s1763_s20 + $0x30] sm:$0xff]   ;;  %v1698_v15 = vld [vmem:[%s1763_s20 + $0x38] sm:$0xff]   ;;  %v1700_v17 = vld [vmem:[%s1763_s20 + $0x40] sm:$0xff]  }
  0x13   : > { %v1697_v14 = vld [vmem:[%s1763_s20 + $0xb0] sm:$0xff]   ;;  %v1699_v16 = vld [vmem:[%s1763_s20 + $0xb8] sm:$0xff]   ;;  %v1701_v18 = vld [vmem:[%s1763_s20 + $0xc0] sm:$0xff]  }
  0x14   : > { %v1702_v19 = vld [vmem:[%s1763_s20 + $0x48] sm:$0xff]   ;;  %v1704_v21 = vld [vmem:[%s1763_s20 + $0x50] sm:$0xff]   ;;  %v1706_v23 = vld [vmem:[%s1763_s20 + $0x58] sm:$0xff]  }
  0x15   : > { %v1703_v20 = vld [vmem:[%s1763_s20 + $0xc8] sm:$0xff]   ;;  %v1705_v22 = vld [vmem:[%s1763_s20 + $0xd0] sm:$0xff]   ;;  %v1707_v24 = vld [vmem:[%s1763_s20 + $0xd8] sm:$0xff]  }
  0x16   : > { %v1708_v25 = vld [vmem:[%s1763_s20 + $0x60] sm:$0xff]   ;;  %v1710_v27 = vld [vmem:[%s1763_s20 + $0x68] sm:$0xff]   ;;  %v1712_v29 = vld [vmem:[%s1763_s20 + $0x70] sm:$0xff]  }
  0x17   : > { %v1709_v26 = vld [vmem:[%s1763_s20 + $0xe0] sm:$0xff]   ;;  %v1711_v28 = vld [vmem:[%s1763_s20 + $0xe8] sm:$0xff]   ;;  %v1713_v30 = vld [vmem:[%s1763_s20 + $0xf0] sm:$0xff]  }
  0x18   : > { %1614 = vmatmul.mubr.msk.bf16.gmra.mxu0 %vm414_vm0, %v1690_v7  ;;  %v1714_v31 = vld [vmem:[%s1763_s20 + $0x78] sm:$0xff]  }
  0x19   : > { %1646 = vmatmul.mubr.msk.bf16.gmra.mxu1 %vm414_vm0, %v1691_v8  ;;  %1617 = vmatprep.mubr.msk.bf16.mxu0 %vm414_vm0, %v1692_v9  ;;  %v1715_v32 = vld [vmem:[%s1763_s20 + $0xf8] sm:$0xff]  }
  0x1a   : > { %1649 = vmatprep.mubr.msk.bf16.mxu1 %vm414_vm0, %v1693_v10 }
  0x20   : > { %1618 = vmatmul.mubr.msk.bf16.gmra.mxu0 %vm414_vm0, %v1694_v11 }
  0x21   : > { %1650 = vmatmul.mubr.msk.bf16.gmra.mxu1 %vm414_vm0, %v1695_v12  ;;  %1621 = vmatprep.mubr.msk.bf16.mxu0 %vm414_vm0, %v1696_v13 }
  0x22   : > { %1653 = vmatprep.mubr.msk.bf16.mxu1 %vm414_vm0, %v1697_v14 }
  0x28   : > { %1622 = vmatmul.mubr.msk.bf16.gmra.mxu0 %vm414_vm0, %v1698_v15 }
  0x29   : > { %1654 = vmatmul.mubr.msk.bf16.gmra.mxu1 %vm414_vm0, %v1699_v16  ;;  %1625 = vmatprep.mubr.msk.bf16.mxu0 %vm414_vm0, %v1700_v17 }
  0x2a   : > { %1657 = vmatprep.mubr.msk.bf16.mxu1 %vm414_vm0, %v1701_v18 }
  0x30   : > { %1626 = vmatmul.mubr.msk.bf16.gmra.mxu0 %vm414_vm0, %v1702_v19 }
  0x31   : > { %1658 = vmatmul.mubr.msk.bf16.gmra.mxu1 %vm414_vm0, %v1703_v20  ;;  %1629 = vmatprep.mubr.msk.bf16.mxu0 %vm414_vm0, %v1704_v21 }
  0x32   : > { %1661 = vmatprep.mubr.msk.bf16.mxu1 %vm414_vm0, %v1705_v22 }
  0x38   : > { %1630 = vmatmul.mubr.msk.bf16.gmra.mxu0 %vm414_vm0, %v1706_v23 }
  0x39   : > { %1662 = vmatmul.mubr.msk.bf16.gmra.mxu1 %vm414_vm0, %v1707_v24  ;;  %1633 = vmatprep.mubr.msk.bf16.mxu0 %vm414_vm0, %v1708_v25 }
  0x3a   : > { %1665 = vmatprep.mubr.msk.bf16.mxu1 %vm414_vm0, %v1709_v26 }
  0x40   : > { %1634 = vmatmul.mubr.msk.bf16.gmra.mxu0 %vm414_vm0, %v1710_v27 }
  0x41   : > { %1666 = vmatmul.mubr.msk.bf16.gmra.mxu1 %vm414_vm0, %v1711_v28  ;;  %1637 = vmatprep.mubr.msk.bf16.mxu0 %vm414_vm0, %v1712_v29 }
  0x42   : > { %1669 = vmatprep.mubr.msk.bf16.mxu1 %vm414_vm0, %v1713_v30 }
  0x48   : > { %1638 = vmatmul.mubr.msk.bf16.gmra.mxu0 %vm414_vm0, %v1714_v31 }
  0x49   : > { %1670 = vmatmul.mubr.msk.bf16.gmra.mxu1 %vm414_vm0, %v1715_v32 }
  0xd0   : > { %v1611_v34 = vpop.f32.mrf.mxu0 }
  0xd1   : > { %v554_v35 = vadd.f32 %v1611_v34, %v1832_v33  ;;  %v1643_v36 = vpop.f32.mrf.mxu1 }
  0xd2   : > { %v682_v37 = vadd.f32 %v1643_v36, %v1832_v33  ;;  %v545_v38 = vpop.f32.mrf.mxu0 }
  0xd3   : > { %vm802_vm1 = vcmp.ge.f32.partialorder %v554_v35, 0.0  ;;  %v866_v39 = vmul.f32 0.2, %v554_v35  ;;  %v546_v40 = vadd.f32 %v1832_v33, %v545_v38  ;;  %v673_v41 = vpop.f32.mrf.mxu1 }
  0xd4   : > { %vm834_vm3 = vcmp.ge.f32.partialorder %v682_v37, 0.0  ;;  %v898_v42 = vmul.f32 0.2, %v682_v37  ;;  %v674_v43 = vadd.f32 %v1832_v33, %v673_v41  ;;  %v1612_v44 = vpop.f32.mrf.mxu0 }
  0xd5   : > { %v930_v45 = vsel %vm802_vm1, %v554_v35, %v866_v39  ;;  %vm800_vm4 = vcmp.ge.f32.partialorder %v546_v40, 0.0  ;;  %v864_v46 = vmul.f32 0.2, %v546_v40  ;;  %v557_v47 = vadd.f32 %v1612_v44, %v1832_v33  ;;  %v1644_v48 = vpop.f32.mrf.mxu1 }
  0xd6   : > { %v1512_v49 = vpack.c.bf16 %v930_v45, %v930_v45  ;;  %v962_v50 = vsel %vm834_vm3, %v682_v37, %v898_v42  ;;  %vm832_vm5 = vcmp.ge.f32.partialorder %v674_v43, 0.0  ;;  %v896_v51 = vmul.f32 0.2, %v674_v43  ;;  %v548_v52 = vpop.f32.mrf.mxu0 }
  0xd7   : > { %v1544_v53 = vpack.c.bf16 %v962_v50, %v962_v50  ;;  %v928_v54 = vsel %vm800_vm4, %v546_v40, %v864_v46  ;;  %vm803_vm6 = vcmp.ge.f32.partialorder %v557_v47, 0.0  ;;  %v867_v55 = vmul.f32 0.2, %v557_v47  ;;  %v676_v56 = vpop.f32.mrf.mxu1 }
  0xd8   : > { %1251 = vst.msk [vmem:[%s1843_s25 + $0x8] sm:$0xf] %vm1248_vm2, %v1512_v49  ;;  %v1510_v57 = vpack.c.bf16 %v928_v54, %v928_v54  ;;  %v960_v58 = vsel %vm832_vm5, %v674_v43, %v896_v51  ;;  %v685_v59 = vadd.f32 %v1644_v48, %v1832_v33  ;;  %v549_v60 = vadd.f32 %v1832_v33, %v548_v52  ;;  %v1615_v61 = vpop.f32.mrf.mxu0 }
  0xd9   : > { %1283 = vst.msk [vmem:[%s1843_s25 + $0x88] sm:$0xf] %vm1248_vm2, %v1544_v53  ;;  %v1542_v62 = vpack.c.bf16 %v960_v58, %v960_v58  ;;  %v931_v63 = vsel %vm803_vm6, %v557_v47, %v867_v55  ;;  %v677_v0 = vadd.f32 %v1832_v33, %v676_v56  ;;  %v570_v1 = vadd.f32 %v1615_v61, %v1832_v33  ;;  %v1647_v2 = vpop.f32.mrf.mxu1 }
  0xda   : > { %1249 = vst.msk [vmem:[%s1843_s25] sm:$0xf] %vm1248_vm2, %v1510_v57  ;;  %v1513_v3 = vpack.c.bf16 %v931_v63, %v931_v63  ;;  %vm835_vm7 = vcmp.ge.f32.partialorder %v685_v59, 0.0  ;;  %v899_v4 = vmul.f32 0.2, %v685_v59  ;;  %vm801_vm8 = vcmp.ge.f32.partialorder %v549_v60, 0.0  ;;  %v561_v5 = vpop.f32.mrf.mxu0 }
  0xdb   : > { %1281 = vst.msk [vmem:[%s1843_s25 + $0x80] sm:$0xf] %vm1248_vm2, %v1542_v62  ;;  %v865_v6 = vmul.f32 0.2, %v549_v60  ;;  %vm833_vm9 = vcmp.ge.f32.partialorder %v677_v0, 0.0  ;;  %vm806_vm10 = vcmp.ge.f32.partialorder %v570_v1, 0.0  ;;  %v689_v8 = vpop.f32.mrf.mxu1  ;;  %v698_v11 = vadd.f32 %v1647_v2, %v1832_v33 }
  0xdc   : > { %v897_v7 = vmul.f32 0.2, %v677_v0  ;;  %1252 = vst.msk [vmem:[%s1843_s25 + $0xc] sm:$0xf] %vm1248_vm2, %v1513_v3  ;;  %v963_v9 = vsel %vm835_vm7, %v685_v59, %v899_v4  ;;  %v870_v10 = vmul.f32 0.2, %v570_v1  ;;  %v562_v12 = vadd.f32 %v1832_v33, %v561_v5  ;;  %v1616_v13 = vpop.f32.mrf.mxu0 }
  0xdd   : > { %v1545_v14 = vpack.c.bf16 %v963_v9, %v963_v9  ;;  %v929_v15 = vsel %vm801_vm8, %v549_v60, %v865_v6  ;;  %v690_v17 = vadd.f32 %v1832_v33, %v689_v8  ;;  %v1648_v18 = vpop.f32.mrf.mxu1  ;;  %vm838_vm11 = vcmp.ge.f32.partialorder %v698_v11, 0.0 }
  0xde   : > { %v961_v16 = vsel %vm833_vm9, %v677_v0, %v897_v7  ;;  %v1511_v19 = vpack.c.bf16 %v929_v15, %v929_v15  ;;  %v934_v21 = vsel %vm806_vm10, %v570_v1, %v870_v10  ;;  %v564_v22 = vpop.f32.mrf.mxu0  ;;  %v902_v24 = vmul.f32 0.2, %v698_v11 }
  0xdf   : > { %v1543_v20 = vpack.c.bf16 %v961_v16, %v961_v16  ;;  %1284 = vst.msk [vmem:[%s1843_s25 + $0x8c] sm:$0xf] %vm1248_vm2, %v1545_v14  ;;  %v1516_v23 = vpack.c.bf16 %v934_v21, %v934_v21  ;;  %vm804_vm12 = vcmp.ge.f32.partialorder %v562_v12, 0.0  ;;  %v868_v25 = vmul.f32 0.2, %v562_v12  ;;  %v692_v26 = vpop.f32.mrf.mxu1 }
  0xe0   : > { %1250 = vst.msk [vmem:[%s1843_s25 + $0x4] sm:$0xf] %vm1248_vm2, %v1511_v19  ;;  %vm836_vm13 = vcmp.ge.f32.partialorder %v690_v17, 0.0  ;;  %v900_v27 = vmul.f32 0.2, %v690_v17  ;;  %v573_v28 = vadd.f32 %v1616_v13, %v1832_v33  ;;  %v701_v29 = vadd.f32 %v1648_v18, %v1832_v33  ;;  %v1619_v30 = vpop.f32.mrf.mxu0 }
  0xe1   : > { %1282 = vst.msk [vmem:[%s1843_s25 + $0x84] sm:$0xf] %vm1248_vm2, %v1543_v20  ;;  %1255 = vst.msk [vmem:[%s1843_s25 + $0x18] sm:$0xf] %vm1248_vm2, %v1516_v23  ;;  %v966_v31 = vsel %vm838_vm11, %v698_v11, %v902_v24  ;;  %v932_v32 = vsel %vm804_vm12, %v562_v12, %v868_v25  ;;  %v565_v34 = vadd.f32 %v1832_v33, %v564_v22  ;;  %v1651_v36 = vpop.f32.mrf.mxu1 }
  0xe2   : > { %v693_v35 = vadd.f32 %v1832_v33, %v692_v26  ;;  %v1548_v37 = vpack.c.bf16 %v966_v31, %v966_v31  ;;  %v1514_v38 = vpack.c.bf16 %v932_v32, %v932_v32  ;;  %v964_v39 = vsel %vm836_vm13, %v690_v17, %v900_v27  ;;  %v577_v40 = vpop.f32.mrf.mxu0 }
  0xe3   : > { %vm807_vm14 = vcmp.ge.f32.partialorder %v573_v28, 0.0  ;;  %v1546_v41 = vpack.c.bf16 %v964_v39, %v964_v39  ;;  %v871_v42 = vmul.f32 0.2, %v573_v28  ;;  %vm839_vm15 = vcmp.ge.f32.partialorder %v701_v29, 0.0  ;;  %v705_v44 = vpop.f32.mrf.mxu1 }
  0xe4   : > { %v903_v43 = vmul.f32 0.2, %v701_v29  ;;  %1287 = vst.msk [vmem:[%s1843_s25 + $0x98] sm:$0xf] %vm1248_vm2, %v1548_v37  ;;  %1253 = vst.msk [vmem:[%s1843_s25 + $0x10] sm:$0xf] %vm1248_vm2, %v1514_v38  ;;  %v1620_v47 = vpop.f32.mrf.mxu0  ;;  %v586_v50 = vadd.f32 %v1619_v30, %v1832_v33  ;;  %v714_v51 = vadd.f32 %v1651_v36, %v1832_v33  ;;  %v578_v63 = vadd.f32 %v1832_v33, %v577_v40 }
  0xe5   : > { %vm805_vm0 = vcmp.ge.f32.partialorder %v565_v34, 0.0  ;;  %v869_v45 = vmul.f32 0.2, %v565_v34  ;;  %vm837_vm1 = vcmp.ge.f32.partialorder %v693_v35, 0.0  ;;  %v901_v46 = vmul.f32 0.2, %v693_v35  ;;  %v1652_v52 = vpop.f32.mrf.mxu1 }
  0xe6   : > { %1285 = vst.msk [vmem:[%s1843_s25 + $0x90] sm:$0xf] %vm1248_vm2, %v1546_v41  ;;  %v935_v48 = vsel %vm807_vm14, %v573_v28, %v871_v42  ;;  %v967_v49 = vsel %vm839_vm15, %v701_v29, %v903_v43  ;;  %v580_v57 = vpop.f32.mrf.mxu0  ;;  %vm810_vm3 = vcmp.ge.f32.partialorder %v586_v50, 0.0  ;;  %v874_v60 = vmul.f32 0.2, %v586_v50 }
  0xe7   : > { %v1517_v53 = vpack.c.bf16 %v935_v48, %v935_v48  ;;  %v1549_v54 = vpack.c.bf16 %v967_v49, %v967_v49  ;;  %v933_v55 = vsel %vm805_vm0, %v565_v34, %v869_v45  ;;  %v965_v56 = vsel %vm837_vm1, %v693_v35, %v901_v46  ;;  %v708_v61 = vpop.f32.mrf.mxu1 }
  0xe8   : > { %v1515_v58 = vpack.c.bf16 %v933_v55, %v933_v55  ;;  %v1547_v59 = vpack.c.bf16 %v965_v56, %v965_v56  ;;  %vm842_vm4 = vcmp.ge.f32.partialorder %v714_v51, 0.0  ;;  %v906_v62 = vmul.f32 0.2, %v714_v51  ;;  %v1623_v1 = vpop.f32.mrf.mxu0 }
  0xe9   : > { %1256 = vst.msk [vmem:[%s1843_s25 + $0x1c] sm:$0xf] %vm1248_vm2, %v1517_v53  ;;  %1288 = vst.msk [vmem:[%s1843_s25 + $0x9c] sm:$0xf] %vm1248_vm2, %v1549_v54  ;;  %v706_v0 = vadd.f32 %v1832_v33, %v705_v44  ;;  %v938_v2 = vsel %vm810_vm3, %v586_v50, %v874_v60  ;;  %v589_v3 = vadd.f32 %v1620_v47, %v1832_v33  ;;  %v1655_v6 = vpop.f32.mrf.mxu1  ;;  %vm808_vm5 = vcmp.ge.f32.partialorder %v578_v63, 0.0 }
  0xea   : > { %1254 = vst.msk [vmem:[%s1843_s25 + $0x14] sm:$0xf] %vm1248_vm2, %v1515_v58  ;;  %1286 = vst.msk [vmem:[%s1843_s25 + $0x94] sm:$0xf] %vm1248_vm2, %v1547_v59  ;;  %v717_v4 = vadd.f32 %v1652_v52, %v1832_v33  ;;  %v581_v5 = vadd.f32 %v1832_v33, %v580_v57  ;;  %v1520_v7 = vpack.c.bf16 %v938_v2, %v938_v2  ;;  %v872_v9 = vmul.f32 0.2, %v578_v63  ;;  %v593_v10 = vpop.f32.mrf.mxu0 }
  0xeb   : > { %v970_v8 = vsel %vm842_vm4, %v714_v51, %v906_v62  ;;  %vm840_vm6 = vcmp.ge.f32.partialorder %v706_v0, 0.0  ;;  %v904_v12 = vmul.f32 0.2, %v706_v0  ;;  %vm811_vm7 = vcmp.ge.f32.partialorder %v589_v3, 0.0  ;;  %v721_v13 = vpop.f32.mrf.mxu1 }
  0xec   : > { %v1552_v11 = vpack.c.bf16 %v970_v8, %v970_v8  ;;  %1259 = vst.msk [vmem:[%s1843_s25 + $0x28] sm:$0xf] %vm1248_vm2, %v1520_v7  ;;  %v936_v14 = vsel %vm808_vm5, %v578_v63, %v872_v9  ;;  %v875_v15 = vmul.f32 0.2, %v589_v3  ;;  %vm843_vm8 = vcmp.ge.f32.partialorder %v717_v4, 0.0  ;;  %v1624_v17 = vpop.f32.mrf.mxu0 }
  0xed   : > { %v907_v16 = vmul.f32 0.2, %v717_v4  ;;  %v1518_v18 = vpack.c.bf16 %v936_v14, %v936_v14  ;;  %v968_v19 = vsel %vm840_vm6, %v706_v0, %v904_v12  ;;  %vm809_vm9 = vcmp.ge.f32.partialorder %v581_v5, 0.0  ;;  %v1656_v21 = vpop.f32.mrf.mxu1 }
  0xee   : > { %1291 = vst.msk [vmem:[%s1843_s25 + $0xa8] sm:$0xf] %vm1248_vm2, %v1552_v11  ;;  %v873_v20 = vmul.f32 0.2, %v581_v5  ;;  %v1550_v22 = vpack.c.bf16 %v968_v19, %v968_v19  ;;  %v939_v23 = vsel %vm811_vm7, %v589_v3, %v875_v15  ;;  %v709_v25 = vadd.f32 %v1832_v33, %v708_v61  ;;  %v596_v26 = vpop.f32.mrf.mxu0 }
  0xef   : > { %v971_v24 = vsel %vm843_vm8, %v717_v4, %v907_v16  ;;  %1257 = vst.msk [vmem:[%s1843_s25 + $0x20] sm:$0xf] %vm1248_vm2, %v1518_v18  ;;  %v1521_v27 = vpack.c.bf16 %v939_v23, %v939_v23  ;;  %v602_v30 = vadd.f32 %v1623_v1, %v1832_v33  ;;  %v724_v31 = vpop.f32.mrf.mxu1  ;;  %v730_v35 = vadd.f32 %v1655_v6, %v1832_v33 }
  0xf0   : > { %v1553_v28 = vpack.c.bf16 %v971_v24, %v971_v24  ;;  %v937_v29 = vsel %vm809_vm9, %v581_v5, %v873_v20  ;;  %1289 = vst.msk [vmem:[%s1843_s25 + $0xa0] sm:$0xf] %vm1248_vm2, %v1550_v22  ;;  %vm841_vm10 = vcmp.ge.f32.partialorder %v709_v25, 0.0  ;;  %v905_v34 = vmul.f32 0.2, %v709_v25  ;;  %v1627_v36 = vpop.f32.mrf.mxu0 }
  0xf1   : > { %v1519_v32 = vpack.c.bf16 %v937_v29, %v937_v29  ;;  %1260 = vst.msk [vmem:[%s1843_s25 + $0x2c] sm:$0xf] %vm1248_vm2, %v1521_v27  ;;  %vm814_vm11 = vcmp.ge.f32.partialorder %v602_v30, 0.0  ;;  %v878_v37 = vmul.f32 0.2, %v602_v30  ;;  %v594_v38 = vadd.f32 %v1832_v33, %v593_v10  ;;  %v1659_v40 = vpop.f32.mrf.mxu1 }
  0xf2   : > { %1292 = vst.msk [vmem:[%s1843_s25 + $0xac] sm:$0xf] %vm1248_vm2, %v1553_v28  ;;  %v722_v39 = vadd.f32 %v1832_v33, %v721_v13  ;;  %v969_v41 = vsel %vm841_vm10, %v709_v25, %v905_v34  ;;  %vm846_vm12 = vcmp.ge.f32.partialorder %v730_v35, 0.0  ;;  %v910_v42 = vmul.f32 0.2, %v730_v35  ;;  %v609_v44 = vpop.f32.mrf.mxu0 }
  0xf3   : > { %1258 = vst.msk [vmem:[%s1843_s25 + $0x24] sm:$0xf] %vm1248_vm2, %v1519_v32  ;;  %v605_v43 = vadd.f32 %v1624_v17, %v1832_v33  ;;  %v1551_v45 = vpack.c.bf16 %v969_v41, %v969_v41  ;;  %v942_v46 = vsel %vm814_vm11, %v602_v30, %v878_v37  ;;  %vm812_vm13 = vcmp.ge.f32.partialorder %v594_v38, 0.0  ;;  %v737_v48 = vpop.f32.mrf.mxu1 }
  0xf4   : > { %v876_v47 = vmul.f32 0.2, %v594_v38  ;;  %v1524_v49 = vpack.c.bf16 %v942_v46, %v942_v46  ;;  %v974_v50 = vsel %vm846_vm12, %v730_v35, %v910_v42  ;;  %vm844_vm14 = vcmp.ge.f32.partialorder %v722_v39, 0.0  ;;  %v1628_v52 = vpop.f32.mrf.mxu0 }
  0xf5   : > { %v908_v51 = vmul.f32 0.2, %v722_v39  ;;  %1290 = vst.msk [vmem:[%s1843_s25 + $0xa4] sm:$0xf] %vm1248_vm2, %v1551_v45  ;;  %v1556_v53 = vpack.c.bf16 %v974_v50, %v974_v50  ;;  %vm815_vm15 = vcmp.ge.f32.partialorder %v605_v43, 0.0  ;;  %v1660_v56 = vpop.f32.mrf.mxu1  ;;  %v733_v59 = vadd.f32 %v1656_v21, %v1832_v33 }
  0xf6   : > { %v940_v54 = vsel %vm812_vm13, %v594_v38, %v876_v47  ;;  %v879_v55 = vmul.f32 0.2, %v605_v43  ;;  %1263 = vst.msk [vmem:[%s1843_s25 + $0x38] sm:$0xf] %vm1248_vm2, %v1524_v49  ;;  %v597_v60 = vadd.f32 %v1832_v33, %v596_v26  ;;  %v612_v61 = vpop.f32.mrf.mxu0  ;;  %v725_v0 = vadd.f32 %v1832_v33, %v724_v31 }
  0xf7   : > { %v1522_v57 = vpack.c.bf16 %v940_v54, %v940_v54  ;;  %v972_v58 = vsel %vm844_vm14, %v722_v39, %v908_v51  ;;  %1295 = vst.msk [vmem:[%s1843_s25 + $0xb8] sm:$0xf] %vm1248_vm2, %v1556_v53  ;;  %v618_v1 = vadd.f32 %v1627_v36, %v1832_v33  ;;  %v740_v2 = vpop.f32.mrf.mxu1  ;;  %vm847_vm0 = vcmp.ge.f32.partialorder %v733_v59, 0.0 }
  0xf8   : > { %v1554_v62 = vpack.c.bf16 %v972_v58, %v972_v58  ;;  %v943_v63 = vsel %vm815_vm15, %v605_v43, %v879_v55  ;;  %v911_v4 = vmul.f32 0.2, %v733_v59  ;;  %vm813_vm1 = vcmp.ge.f32.partialorder %v597_v60, 0.0  ;;  %v1929_v5 = vpop.f32.mrf.mxu0 }
  0xf9   : > { %1261 = vst.msk [vmem:[%s1843_s25 + $0x30] sm:$0xf] %vm1248_vm2, %v1522_v57  ;;  %v1525_v3 = vpack.c.bf16 %v943_v63, %v943_v63  ;;  %v877_v6 = vmul.f32 0.2, %v597_v60  ;;  %vm845_vm3 = vcmp.ge.f32.partialorder %v725_v0, 0.0  ;;  %vm818_vm4 = vcmp.ge.f32.partialorder %v618_v1, 0.0  ;;  %v1663_v8 = vpop.f32.mrf.mxu1 }
  0xfa   : > { %1293 = vst.msk [vmem:[%s1843_s25 + $0xb0] sm:$0xf] %vm1248_vm2, %v1554_v62  ;;  %v909_v7 = vmul.f32 0.2, %v725_v0  ;;  %v975_v9 = vsel %vm847_vm0, %v733_v59, %v911_v4  ;;  %v882_v10 = vmul.f32 0.2, %v618_v1  ;;  %v746_v11 = vadd.f32 %v1659_v40, %v1832_v33  ;;  %v1937_v13 = vpop.f32.mrf.mxu0 }
  0xfb   : > { %1264 = vst.msk [vmem:[%s1843_s25 + $0x3c] sm:$0xf] %vm1248_vm2, %v1525_v3  ;;  %v610_v12 = vadd.f32 %v1832_v33, %v609_v44  ;;  %v1557_v14 = vpack.c.bf16 %v975_v9, %v975_v9  ;;  %v941_v15 = vsel %vm813_vm1, %v597_v60, %v877_v6  ;;  %v738_v17 = vadd.f32 %v1832_v33, %v737_v48  ;;  %v753_v18 = vpop.f32.mrf.mxu1 }
  0xfc   : > { %v973_v16 = vsel %vm845_vm3, %v725_v0, %v909_v7  ;;  %v1523_v19 = vpack.c.bf16 %v941_v15, %v941_v15  ;;  %v946_v21 = vsel %vm818_vm4, %v618_v1, %v882_v10  ;;  %vm850_vm5 = vcmp.ge.f32.partialorder %v746_v11, 0.0  ;;  %v1940_v22 = vpop.f32.mrf.mxu0 }
  0xfd   : > { %v1555_v20 = vpack.c.bf16 %v973_v16, %v973_v16  ;;  %1296 = vst.msk [vmem:[%s1843_s25 + $0xbc] sm:$0xf] %vm1248_vm2, %v1557_v14  ;;  %v1528_v23 = vpack.c.bf16 %v946_v21, %v946_v21  ;;  %v914_v24 = vmul.f32 0.2, %v746_v11  ;;  %vm816_vm6 = vcmp.ge.f32.partialorder %v610_v12, 0.0  ;;  %v1664_v26 = vpop.f32.mrf.mxu1 }
  0xfe   : > { %v880_v25 = vmul.f32 0.2, %v610_v12  ;;  %1262 = vst.msk [vmem:[%s1843_s25 + $0x34] sm:$0xf] %vm1248_vm2, %v1523_v19  ;;  %vm848_vm7 = vcmp.ge.f32.partialorder %v738_v17, 0.0  ;;  %v621_v28 = vadd.f32 %v1628_v52, %v1832_v33  ;;  %v749_v29 = vadd.f32 %v1660_v56, %v1832_v33  ;;  %v628_v30 = vpop.f32.mrf.mxu0 }
  0xff   : > { %1294 = vst.msk [vmem:[%s1843_s25 + $0xb4] sm:$0xf] %vm1248_vm2, %v1555_v20  ;;  %v912_v27 = vmul.f32 0.2, %v738_v17  ;;  %1267 = vst.msk [vmem:[%s1843_s25 + $0x48] sm:$0xf] %vm1248_vm2, %v1528_v23  ;;  %v978_v31 = vsel %vm850_vm5, %v746_v11, %v914_v24  ;;  %v613_v34 = vadd.f32 %v1832_v33, %v612_v61  ;;  %v741_v35 = vadd.f32 %v1832_v33, %v740_v2  ;;  %v1955_v36 = vpop.f32.mrf.mxu1 }
 0x100   : > { %v944_v32 = vsel %vm816_vm6, %v610_v12, %v880_v25  ;;  %v1560_v37 = vpack.c.bf16 %v978_v31, %v978_v31  ;;  %vm819_vm8 = vcmp.ge.f32.partialorder %v621_v28, 0.0  ;;  %v1957_v40 = vpop.f32.mrf.mxu0  ;;  %v883_v42 = vmul.f32 0.2, %v621_v28 }
 0x101   : > { %v1526_v38 = vpack.c.bf16 %v944_v32, %v944_v32  ;;  %v976_v39 = vsel %vm848_vm7, %v738_v17, %v912_v27  ;;  %vm851_vm9 = vcmp.ge.f32.partialorder %v749_v29, 0.0  ;;  %v915_v43 = vmul.f32 0.2, %v749_v29  ;;  %v1959_v44 = vpop.f32.mrf.mxu1 }
 0x102   : > { %v1558_v41 = vpack.c.bf16 %v976_v39, %v976_v39  ;;  %1299 = vst.msk [vmem:[%s1843_s25 + $0xc8] sm:$0xf] %vm1248_vm2, %v1560_v37  ;;  %vm817_vm10 = vcmp.ge.f32.partialorder %v613_v34, 0.0  ;;  %v881_v45 = vmul.f32 0.2, %v613_v34  ;;  %vm849_vm11 = vcmp.ge.f32.partialorder %v741_v35, 0.0  ;;  %v1965_v47 = vpop.f32.mrf.mxu0 }
 0x103   : > { %1265 = vst.msk [vmem:[%s1843_s25 + $0x40] sm:$0xf] %vm1248_vm2, %v1526_v38  ;;  %v913_v46 = vmul.f32 0.2, %v741_v35  ;;  %v947_v48 = vsel %vm819_vm8, %v621_v28, %v883_v42  ;;  %v979_v49 = vsel %vm851_vm9, %v749_v29, %v915_v43  ;;  %v634_v50 = vadd.f32 %v1929_v5, %v1832_v33  ;;  %v1972_v52 = vpop.f32.mrf.mxu1 }
 0x104   : > { %1297 = vst.msk [vmem:[%s1843_s25 + $0xc0] sm:$0xf] %vm1248_vm2, %v1558_v41  ;;  %v762_v51 = vadd.f32 %v1663_v8, %v1832_v33  ;;  %v1529_v53 = vpack.c.bf16 %v947_v48, %v947_v48  ;;  %v1561_v54 = vpack.c.bf16 %v979_v49, %v979_v49  ;;  %v945_v55 = vsel %vm817_vm10, %v613_v34, %v881_v45  ;;  %v1636_v63 = vpop.f32.mrf.mxu0 }
 0x105   : > { %v977_v56 = vsel %vm849_vm11, %v741_v35, %v913_v46  ;;  %v1527_v57 = vpack.c.bf16 %v945_v55, %v945_v55  ;;  %vm822_vm12 = vcmp.ge.f32.partialorder %v634_v50, 0.0  ;;  %v886_v59 = vmul.f32 0.2, %v634_v50  ;;  %v1981_v0 = vpop.f32.mrf.mxu1 }
 0x106   : > { %v1559_v58 = vpack.c.bf16 %v977_v56, %v977_v56  ;;  %1268 = vst.msk [vmem:[%s1843_s25 + $0x4c] sm:$0xf] %vm1248_vm2, %v1529_v53  ;;  %1300 = vst.msk [vmem:[%s1843_s25 + $0xcc] sm:$0xf] %vm1248_vm2, %v1561_v54  ;;  %vm854_vm13 = vcmp.ge.f32.partialorder %v762_v51, 0.0  ;;  %v626_v61 = vadd.f32 %v1832_v33, %v1937_v13  ;;  %v754_v62 = vadd.f32 %v1832_v33, %v753_v18  ;;  %v644_v13 = vpop.f32.mrf.mxu0 }
 0x107   : > { %v918_v60 = vmul.f32 0.2, %v762_v51  ;;  %1266 = vst.msk [vmem:[%s1843_s25 + $0x44] sm:$0xf] %vm1248_vm2, %v1527_v57  ;;  %v950_v1 = vsel %vm822_vm12, %v634_v50, %v886_v59  ;;  %v637_v2 = vadd.f32 %v1940_v22, %v1832_v33  ;;  %v765_v3 = vadd.f32 %v1664_v26, %v1832_v33  ;;  %v772_v14 = vpop.f32.mrf.mxu1 }
 0x108   : > { %1298 = vst.msk [vmem:[%s1843_s25 + $0xc4] sm:$0xf] %vm1248_vm2, %v1559_v58  ;;  %v629_v4 = vadd.f32 %v1832_v33, %v628_v30  ;;  %v1532_v5 = vpack.c.bf16 %v950_v1, %v950_v1  ;;  %vm820_vm14 = vcmp.ge.f32.partialorder %v626_v61, 0.0  ;;  %v884_v7 = vmul.f32 0.2, %v626_v61  ;;  %v1639_v29 = vpop.f32.mrf.mxu0 }
 0x109   : > { %v982_v6 = vsel %vm854_vm13, %v762_v51, %v918_v60  ;;  %vm852_vm15 = vcmp.ge.f32.partialorder %v754_v62, 0.0  ;;  %v916_v9 = vmul.f32 0.2, %v754_v62  ;;  %vm823_vm0 = vcmp.ge.f32.partialorder %v637_v2, 0.0  ;;  %v1671_v30 = vpop.f32.mrf.mxu1 }
 0x10a   : > { %v1564_v8 = vpack.c.bf16 %v982_v6, %v982_v6  ;;  %1271 = vst.msk [vmem:[%s1843_s25 + $0x58] sm:$0xf] %vm1248_vm2, %v1532_v5  ;;  %v948_v10 = vsel %vm820_vm14, %v626_v61, %v884_v7  ;;  %v887_v11 = vmul.f32 0.2, %v637_v2  ;;  %vm855_vm1 = vcmp.ge.f32.partialorder %v765_v3, 0.0 }
 0x10b   : > { %v919_v12 = vmul.f32 0.2, %v765_v3  ;;  %v1530_v15 = vpack.c.bf16 %v948_v10, %v948_v10  ;;  %v980_v16 = vsel %vm852_vm15, %v754_v62, %v916_v9  ;;  %vm821_vm3 = vcmp.ge.f32.partialorder %v629_v4, 0.0  ;;  %v785_v45 = vpop.f32.mrf.mxu1 }
 0x10c   : > { %1303 = vst.msk [vmem:[%s1843_s25 + $0xd8] sm:$0xf] %vm1248_vm2, %v1564_v8  ;;  %v885_v17 = vmul.f32 0.2, %v629_v4  ;;  %v1562_v18 = vpack.c.bf16 %v980_v16, %v980_v16  ;;  %v951_v19 = vsel %vm823_vm0, %v637_v2, %v887_v11  ;;  %v757_v21 = vadd.f32 %v1832_v33, %v1955_v36 }
 0x10d   : > { %v983_v20 = vsel %vm855_vm1, %v765_v3, %v919_v12  ;;  %1269 = vst.msk [vmem:[%s1843_s25 + $0x50] sm:$0xf] %vm1248_vm2, %v1530_v15  ;;  %v1533_v22 = vpack.c.bf16 %v951_v19, %v951_v19  ;;  %v650_v25 = vadd.f32 %v1957_v40, %v1832_v33  ;;  %v778_v28 = vadd.f32 %v1959_v44, %v1832_v33  ;;  %v657_v44 = vpop.f32.mrf.mxu0  ;;  %v1672_v60 = vpop.f32.mrf.mxu1 }
 0x10e   : > { %v1565_v23 = vpack.c.bf16 %v983_v20, %v983_v20  ;;  %v949_v24 = vsel %vm821_vm3, %v629_v4, %v885_v17  ;;  %1301 = vst.msk [vmem:[%s1843_s25 + $0xd0] sm:$0xf] %vm1248_vm2, %v1562_v18  ;;  %vm853_vm4 = vcmp.ge.f32.partialorder %v757_v21, 0.0  ;;  %v917_v27 = vmul.f32 0.2, %v757_v21 }
 0x10f   : > { %v1531_v26 = vpack.c.bf16 %v949_v24, %v949_v24  ;;  %1272 = vst.msk [vmem:[%s1843_s25 + $0x5c] sm:$0xf] %vm1248_vm2, %v1533_v22  ;;  %vm826_vm5 = vcmp.ge.f32.partialorder %v650_v25, 0.0  ;;  %v890_v31 = vmul.f32 0.2, %v650_v25  ;;  %v642_v32 = vadd.f32 %v1832_v33, %v1965_v47  ;;  %v1640_v59 = vpop.f32.mrf.mxu0  ;;  %v788_v11 = vpop.f32.mrf.mxu1 }
 0x110   : > { %1304 = vst.msk [vmem:[%s1843_s25 + $0xdc] sm:$0xf] %vm1248_vm2, %v1565_v23  ;;  %v770_v34 = vadd.f32 %v1832_v33, %v1972_v52  ;;  %v981_v35 = vsel %vm853_vm4, %v757_v21, %v917_v27  ;;  %vm858_vm6 = vcmp.ge.f32.partialorder %v778_v28, 0.0  ;;  %v922_v36 = vmul.f32 0.2, %v778_v28 }
 0x111   : > { %1270 = vst.msk [vmem:[%s1843_s25 + $0x54] sm:$0xf] %vm1248_vm2, %v1531_v26  ;;  %v653_v37 = vadd.f32 %v1636_v63, %v1832_v33  ;;  %v1563_v38 = vpack.c.bf16 %v981_v35, %v981_v35  ;;  %v954_v39 = vsel %vm826_vm5, %v650_v25, %v890_v31  ;;  %vm824_vm7 = vcmp.ge.f32.partialorder %v642_v32, 0.0  ;;  %v660_v10 = vpop.f32.mrf.mxu0 }
 0x112   : > { %v888_v40 = vmul.f32 0.2, %v642_v32  ;;  %v1536_v41 = vpack.c.bf16 %v954_v39, %v954_v39  ;;  %v986_v42 = vsel %vm858_vm6, %v778_v28, %v922_v36  ;;  %vm856_vm8 = vcmp.ge.f32.partialorder %v770_v34, 0.0 }
 0x113   : > { %v920_v43 = vmul.f32 0.2, %v770_v34  ;;  %1302 = vst.msk [vmem:[%s1843_s25 + $0xd4] sm:$0xf] %vm1248_vm2, %v1563_v38  ;;  %v1568_v46 = vpack.c.bf16 %v986_v42, %v986_v42  ;;  %vm827_vm9 = vcmp.ge.f32.partialorder %v653_v37, 0.0  ;;  %v781_v51 = vadd.f32 %v1981_v0, %v1832_v33 }
 0x114   : > { %v952_v47 = vsel %vm824_vm7, %v642_v32, %v888_v40  ;;  %v891_v48 = vmul.f32 0.2, %v653_v37  ;;  %1275 = vst.msk [vmem:[%s1843_s25 + $0x68] sm:$0xf] %vm1248_vm2, %v1536_v41  ;;  %v645_v52 = vadd.f32 %v1832_v33, %v644_v13  ;;  %v773_v55 = vadd.f32 %v1832_v33, %v772_v14 }
 0x115   : > { %v1534_v49 = vpack.c.bf16 %v952_v47, %v952_v47  ;;  %v984_v50 = vsel %vm856_vm8, %v770_v34, %v920_v43  ;;  %1307 = vst.msk [vmem:[%s1843_s25 + $0xe8] sm:$0xf] %vm1248_vm2, %v1568_v46  ;;  %v666_v56 = vadd.f32 %v1639_v29, %v1832_v33  ;;  %vm859_vm10 = vcmp.ge.f32.partialorder %v781_v51, 0.0 }
 0x116   : > { %v1566_v53 = vpack.c.bf16 %v984_v50, %v984_v50  ;;  %v955_v54 = vsel %vm827_vm9, %v653_v37, %v891_v48  ;;  %v923_v58 = vmul.f32 0.2, %v781_v51  ;;  %vm825_vm11 = vcmp.ge.f32.partialorder %v645_v52, 0.0 }
 0x117   : > { %1273 = vst.msk [vmem:[%s1843_s25 + $0x60] sm:$0xf] %vm1248_vm2, %v1534_v49  ;;  %v1537_v57 = vpack.c.bf16 %v955_v54, %v955_v54  ;;  %v889_v61 = vmul.f32 0.2, %v645_v52  ;;  %vm857_vm12 = vcmp.ge.f32.partialorder %v773_v55, 0.0  ;;  %vm830_vm13 = vcmp.ge.f32.partialorder %v666_v56, 0.0 }
 0x118   : > { %1305 = vst.msk [vmem:[%s1843_s25 + $0xe0] sm:$0xf] %vm1248_vm2, %v1566_v53  ;;  %v921_v62 = vmul.f32 0.2, %v773_v55  ;;  %v987_v63 = vsel %vm859_vm10, %v781_v51, %v923_v58  ;;  %v894_v0 = vmul.f32 0.2, %v666_v56  ;;  %v794_v1 = vadd.f32 %v1671_v30, %v1832_v33 }
 0x119   : > { %1276 = vst.msk [vmem:[%s1843_s25 + $0x6c] sm:$0xf] %vm1248_vm2, %v1537_v57  ;;  %v658_v2 = vadd.f32 %v1832_v33, %v657_v44  ;;  %v1569_v3 = vpack.c.bf16 %v987_v63, %v987_v63  ;;  %v953_v4 = vsel %vm825_vm11, %v645_v52, %v889_v61  ;;  %v786_v6 = vadd.f32 %v1832_v33, %v785_v45 }
 0x11a   : > { %v985_v5 = vsel %vm857_vm12, %v773_v55, %v921_v62  ;;  %v1535_v7 = vpack.c.bf16 %v953_v4, %v953_v4  ;;  %v958_v9 = vsel %vm830_vm13, %v666_v56, %v894_v0  ;;  %vm862_vm14 = vcmp.ge.f32.partialorder %v794_v1, 0.0 }
 0x11b   : > { %v1567_v8 = vpack.c.bf16 %v985_v5, %v985_v5  ;;  %1308 = vst.msk [vmem:[%s1843_s25 + $0xec] sm:$0xf] %vm1248_vm2, %v1569_v3  ;;  %v1540_v12 = vpack.c.bf16 %v958_v9, %v958_v9  ;;  %v926_v13 = vmul.f32 0.2, %v794_v1  ;;  %vm828_vm15 = vcmp.ge.f32.partialorder %v658_v2, 0.0 }
 0x11c   : > { %v892_v14 = vmul.f32 0.2, %v658_v2  ;;  %1274 = vst.msk [vmem:[%s1843_s25 + $0x64] sm:$0xf] %vm1248_vm2, %v1535_v7  ;;  %vm860_vm0 = vcmp.ge.f32.partialorder %v786_v6, 0.0  ;;  %v669_v16 = vadd.f32 %v1640_v59, %v1832_v33  ;;  %v797_v17 = vadd.f32 %v1672_v60, %v1832_v33 }
 0x11d   : > { %1306 = vst.msk [vmem:[%s1843_s25 + $0xe4] sm:$0xf] %vm1248_vm2, %v1567_v8  ;;  %v924_v15 = vmul.f32 0.2, %v786_v6  ;;  %1279 = vst.msk [vmem:[%s1843_s25 + $0x78] sm:$0xf] %vm1248_vm2, %v1540_v12  ;;  %v990_v18 = vsel %vm862_vm14, %v794_v1, %v926_v13  ;;  %v661_v20 = vadd.f32 %v1832_v33, %v660_v10  ;;  %v789_v21 = vadd.f32 %v1832_v33, %v788_v11 }
 0x11e   : > { %v956_v19 = vsel %vm828_vm15, %v658_v2, %v892_v14  ;;  %v1572_v22 = vpack.c.bf16 %v990_v18, %v990_v18  ;;  %vm831_vm1 = vcmp.ge.f32.partialorder %v669_v16, 0.0  ;;  %v895_v26 = vmul.f32 0.2, %v669_v16 }
 0x11f   : > { %v1538_v23 = vpack.c.bf16 %v956_v19, %v956_v19  ;;  %v988_v24 = vsel %vm860_vm0, %v786_v6, %v924_v15  ;;  %vm863_vm3 = vcmp.ge.f32.partialorder %v797_v17, 0.0  ;;  %v927_v27 = vmul.f32 0.2, %v797_v17 }
 0x120   : > { %v1570_v25 = vpack.c.bf16 %v988_v24, %v988_v24  ;;  %1311 = vst.msk [vmem:[%s1843_s25 + $0xf8] sm:$0xf] %vm1248_vm2, %v1572_v22  ;;  %vm829_vm4 = vcmp.ge.f32.partialorder %v661_v20, 0.0  ;;  %v893_v28 = vmul.f32 0.2, %v661_v20  ;;  %vm861_vm5 = vcmp.ge.f32.partialorder %v789_v21, 0.0 }
 0x121   : > { %1277 = vst.msk [vmem:[%s1843_s25 + $0x70] sm:$0xf] %vm1248_vm2, %v1538_v23  ;;  %v925_v33 = vmul.f32 0.2, %v789_v21  ;;  %v959_v29 = vsel %vm831_vm1, %v669_v16, %v895_v26  ;;  %v991_v30 = vsel %vm863_vm3, %v797_v17, %v927_v27 }
 0x122   : > { %1309 = vst.msk [vmem:[%s1843_s25 + $0xf0] sm:$0xf] %vm1248_vm2, %v1570_v25  ;;  %v1541_v31 = vpack.c.bf16 %v959_v29, %v959_v29  ;;  %v1573_v32 = vpack.c.bf16 %v991_v30, %v991_v30  ;;  %v957_v34 = vsel %vm829_vm4, %v661_v20, %v893_v28 }
 0x123   : > { %v989_v35 = vsel %vm861_vm5, %v789_v21, %v925_v33  ;;  %v1539_v36 = vpack.c.bf16 %v957_v34, %v957_v34 }
 0x124   : > { %v1571_v37 = vpack.c.bf16 %v989_v35, %v989_v35  ;;  %1280 = vst.msk [vmem:[%s1843_s25 + $0x7c] sm:$0xf] %vm1248_vm2, %v1541_v31  ;;  %1312 = vst.msk [vmem:[%s1843_s25 + $0xfc] sm:$0xf] %vm1248_vm2, %v1573_v32 }
 0x125   : > { %1278 = vst.msk [vmem:[%s1843_s25 + $0x74] sm:$0xf] %vm1248_vm2, %v1539_v36 }
 0x126   : > { %1310 = vst.msk [vmem:[%s1843_s25 + $0xf4] sm:$0xf] %vm1248_vm2, %v1571_v37 }
 0x127 PF: > { %s13_s12 = sadd.s32 1, %s1722_s12  }
 0x128   : > { %p10_p4 = scmp.ge.s32.totalorder %s13_s12, 6  }
 0x12a   :  { %12 = sbr.rel (!%p10_p4) target bundleno = 1 (0x1), region = 62 }

// kernel: unet_encoder.5
= control target key start
LH: loop header
LB: loop body
LE: loop exit
PB: predicated region body
PF: predicated region fallthrough
CT: control target
= control target key end

     0   :  { %vm627_vm0 = vcmask 130048   ;;  %s4362_s1 = inlined_call_operand.vmem [shape: bf16[128,16], index: 1, kind: input, shape index: {}]   ;;  %s4363_s0 = inlined_call_operand.vmem [shape: bf16[512,128], index: 0, kind: input, shape index: {}]   ;;  %s4364_s2 = inlined_call_operand.vmem [shape: f32[1,16], index: 2, kind: input, shape index: {}]   ;;  %s4365_s3 = inlined_call_operand.vmem [shape: f32[1,16], index: 3, kind: input, shape index: {}]   ;;  %s4366_s4 = inlined_call_operand.vmem [shape: bf16[512,16], index: 4, kind: output, shape index: {}]  }
   0x1   :  { %v1991_v0 = vld [vmem:[%s4362_s1 + $0x38] sm:$0xff]   ;;  %v1992_v1 = vld [vmem:[%s4362_s1 + $0x30] sm:$0xff]   ;;  %v1993_v2 = vld [vmem:[%s4362_s1 + $0x28] sm:$0xff]  }
   0x2   :  { %1895 = vmatprep.subr.bf16.mxu0 %v1991_v0  ;;  %1975 = vmatprep.subr.bf16.mxu1 %v1991_v0  ;;  %v1994_v3 = vld [vmem:[%s4362_s1 + $0x20] sm:$0xff]   ;;  %v1995_v5 = vld [vmem:[%s4362_s1 + $0x18] sm:$0xff]   ;;  %v1996_v6 = vld [vmem:[%s4362_s1 + $0x10] sm:$0xff]  }
   0x3   :  { %1896 = vmatpush3.bf16.msra.mxu0 %v1991_v0  ;;  %1983 = vmatpush3.bf16.msra.mxu1 %v1991_v0  ;;  %v1999_v4 = vld [vmem:[%s4363_s0] sm:$0xff]   ;;  %v1997_v7 = vld [vmem:[%s4362_s1 + $0x8] sm:$0xff]   ;;  %v2001_v11 = vld [vmem:[%s4363_s0 + $0x10] sm:$0xff]  }
   0x4   :  { %1897 = vmatprep.subr.bf16.mxu0 %v1992_v1  ;;  %1976 = vmatprep.subr.bf16.mxu1 %v1992_v1  ;;  %v1998_v8 = vld [vmem:[%s4362_s1] sm:$0xff]   ;;  %v2000_v10 = vld [vmem:[%s4363_s0 + $0x8] sm:$0xff]   ;;  %v2017_v13 = vld [vmem:[%s4363_s0 + $0x90] sm:$0xff]  }
   0x5   :  { %1911 = vmatprep.mubr.bf16.mxu0 %v1999_v4  ;;  %v2015_v9 = vld [vmem:[%s4363_s0 + $0x80] sm:$0xff]   ;;  %v2016_v12 = vld [vmem:[%s4363_s0 + $0x88] sm:$0xff]   ;;  %v2002_v14 = vld [vmem:[%s4363_s0 + $0x18] sm:$0xff]  }
   0x6   :  { %1943 = vmatprep.mubr.bf16.mxu1 %v2015_v9  ;;  %v2003_v15 = vld [vmem:[%s4363_s0 + $0x20] sm:$0xff]   ;;  %v2018_v16 = vld [vmem:[%s4363_s0 + $0x98] sm:$0xff]   ;;  %v2004_v18 = vld [vmem:[%s4363_s0 + $0x28] sm:$0xff]  }
   0x7   :  { %1898 = vmatpush3.bf16.msra.mxu0 %v1992_v1  ;;  %1984 = vmatpush3.bf16.msra.mxu1 %v1992_v1  ;;  %v2019_v17 = vld [vmem:[%s4363_s0 + $0xa0] sm:$0xff]   ;;  %v2020_v19 = vld [vmem:[%s4363_s0 + $0xa8] sm:$0xff]   ;;  %v2005_v20 = vld [vmem:[%s4363_s0 + $0x30] sm:$0xff]  }
   0x8   :  { %1899 = vmatprep.subr.bf16.mxu0 %v1993_v2  ;;  %1977 = vmatprep.subr.bf16.mxu1 %v1993_v2  ;;  %v2021_v21 = vld [vmem:[%s4363_s0 + $0xb0] sm:$0xff]   ;;  %v2006_v22 = vld [vmem:[%s4363_s0 + $0x38] sm:$0xff]   ;;  %v2007_v24 = vld [vmem:[%s4363_s0 + $0x40] sm:$0xff]  }
   0x9   :  { %v2022_v23 = vld [vmem:[%s4363_s0 + $0xb8] sm:$0xff]   ;;  %v2023_v25 = vld [vmem:[%s4363_s0 + $0xc0] sm:$0xff]   ;;  %v2008_v26 = vld [vmem:[%s4363_s0 + $0x48] sm:$0xff]  }
   0xa   :  { %v2024_v27 = vld [vmem:[%s4363_s0 + $0xc8] sm:$0xff]   ;;  %v2009_v28 = vld [vmem:[%s4363_s0 + $0x50] sm:$0xff]   ;;  %v2010_v30 = vld [vmem:[%s4363_s0 + $0x58] sm:$0xff]  }
   0xb   :  { %1900 = vmatpush3.bf16.msra.mxu0 %v1993_v2  ;;  %1985 = vmatpush3.bf16.msra.mxu1 %v1993_v2  ;;  %v2025_v29 = vld [vmem:[%s4363_s0 + $0xd0] sm:$0xff]   ;;  %v2026_v31 = vld [vmem:[%s4363_s0 + $0xd8] sm:$0xff]   ;;  %v2011_v32 = vld [vmem:[%s4363_s0 + $0x60] sm:$0xff]  }
   0xc   :  { %1901 = vmatprep.subr.bf16.mxu0 %v1994_v3  ;;  %1978 = vmatprep.subr.bf16.mxu1 %v1994_v3  ;;  %v2027_v33 = vld [vmem:[%s4363_s0 + $0xe0] sm:$0xff]   ;;  %v2012_v34 = vld [vmem:[%s4363_s0 + $0x68] sm:$0xff]   ;;  %v2013_v36 = vld [vmem:[%s4363_s0 + $0x70] sm:$0xff]  }
   0xd   :  { %v2028_v35 = vld [vmem:[%s4363_s0 + $0xe8] sm:$0xff]   ;;  %v2029_v37 = vld [vmem:[%s4363_s0 + $0xf0] sm:$0xff]   ;;  %v2014_v38 = vld [vmem:[%s4363_s0 + $0x78] sm:$0xff]  }
   0xe   :  { %v2030_v39 = vld [vmem:[%s4363_s0 + $0xf8] sm:$0xff]  }
   0xf   :  { %1902 = vmatpush3.bf16.msra.mxu0 %v1994_v3  ;;  %1986 = vmatpush3.bf16.msra.mxu1 %v1994_v3 }
  0x10   :  { %1903 = vmatprep.subr.bf16.mxu0 %v1995_v5  ;;  %1979 = vmatprep.subr.bf16.mxu1 %v1995_v5 }
  0x13   :  { %1904 = vmatpush3.bf16.msra.mxu0 %v1995_v5  ;;  %1987 = vmatpush3.bf16.msra.mxu1 %v1995_v5 }
  0x14   :  { %1905 = vmatprep.subr.bf16.mxu0 %v1996_v6  ;;  %1980 = vmatprep.subr.bf16.mxu1 %v1996_v6 }
  0x17   :  { %1906 = vmatpush3.bf16.msra.mxu0 %v1996_v6  ;;  %1988 = vmatpush3.bf16.msra.mxu1 %v1996_v6 }
  0x18   :  { %1907 = vmatprep.subr.bf16.mxu0 %v1997_v7  ;;  %1981 = vmatprep.subr.bf16.mxu1 %v1997_v7 }
  0x1b   :  { %1908 = vmatpush3.bf16.msra.mxu0 %v1997_v7  ;;  %1989 = vmatpush3.bf16.msra.mxu1 %v1997_v7 }
  0x1c   :  { %1909 = vmatprep.subr.bf16.mxu0 %v1998_v8  ;;  %1982 = vmatprep.subr.bf16.mxu1 %v1998_v8 }
  0x1f   :  { %1910 = vmatpush3.bf16.msra.mxu0 %v1998_v8  ;;  %1990 = vmatpush3.bf16.msra.mxu1 %v1998_v8 }
  0x22   :  { %1912 = vmatmul.mubr.bf16.vlgmr.msra.gmra.mxu0 %v2000_v10  ;;  %1944 = vmatmul.mubr.bf16.vlgmr.msra.gmra.mxu1 %v2016_v12 }
  0x23   :  { %1915 = vmatprep.mubr.bf16.mxu0 %v2001_v11  ;;  %1947 = vmatprep.mubr.bf16.mxu1 %v2017_v13 }
  0x2a   :  { %1916 = vmatmul.mubr.bf16.gmra.mxu0 %v2002_v14  ;;  %1948 = vmatmul.mubr.bf16.gmra.mxu1 %v2018_v16 }
  0x2b   :  { %1919 = vmatprep.mubr.bf16.mxu0 %v2003_v15  ;;  %1951 = vmatprep.mubr.bf16.mxu1 %v2019_v17 }
  0x32   :  { %1920 = vmatmul.mubr.bf16.gmra.mxu0 %v2004_v18  ;;  %1952 = vmatmul.mubr.bf16.gmra.mxu1 %v2020_v19 }
  0x33   :  { %1923 = vmatprep.mubr.bf16.mxu0 %v2005_v20  ;;  %1955 = vmatprep.mubr.bf16.mxu1 %v2021_v21 }
  0x3a   :  { %1924 = vmatmul.mubr.bf16.gmra.mxu0 %v2006_v22  ;;  %1956 = vmatmul.mubr.bf16.gmra.mxu1 %v2022_v23 }
  0x3b   :  { %1927 = vmatprep.mubr.bf16.mxu0 %v2007_v24  ;;  %1959 = vmatprep.mubr.bf16.mxu1 %v2023_v25 }
  0x42   :  { %1928 = vmatmul.mubr.bf16.gmra.mxu0 %v2008_v26  ;;  %1960 = vmatmul.mubr.bf16.gmra.mxu1 %v2024_v27 }
  0x43   :  { %1931 = vmatprep.mubr.bf16.mxu0 %v2009_v28  ;;  %1963 = vmatprep.mubr.bf16.mxu1 %v2025_v29 }
  0x4a   :  { %1932 = vmatmul.mubr.bf16.gmra.mxu0 %v2010_v30  ;;  %1964 = vmatmul.mubr.bf16.gmra.mxu1 %v2026_v31 }
  0x4b   :  { %1935 = vmatprep.mubr.bf16.mxu0 %v2011_v32  ;;  %1967 = vmatprep.mubr.bf16.mxu1 %v2027_v33 }
  0x52   :  { %1936 = vmatmul.mubr.bf16.gmra.mxu0 %v2012_v34  ;;  %1968 = vmatmul.mubr.bf16.gmra.mxu1 %v2028_v35 }
  0x53   :  { %1939 = vmatprep.mubr.bf16.mxu0 %v2013_v36  ;;  %1971 = vmatprep.mubr.bf16.mxu1 %v2029_v37 }
  0x5a   :  { %1940 = vmatmul.mubr.bf16.gmra.mxu0 %v2014_v38  ;;  %1972 = vmatmul.mubr.bf16.gmra.mxu1 %v2030_v39 }
  0xe2   :  { %v2178_v40 = vpop.f32.mrf.mxu0  ;;  %v2184_v43 = vpop.f32.mrf.mxu1 }
  0xe3   :  { %v631_v50 = vsel %vm627_vm0, %v2178_v40, 0.0 }
  0xe4   :  { %v2180_v41 = vpop.f32.mrf.mxu0  ;;  %v2194_v49 = vpop.f32.mrf.mxu1 }
  0xe5   :  { %v628_v45 = vsel %vm627_vm0, %v2180_v41, 0.0 }
  0xe6   :  { %v2182_v42 = vpop.f32.mrf.mxu0  ;;  %v2204_v56 = vpop.f32.mrf.mxu1 }
  0xe7   :  { %v633_v53 = vsel %vm627_vm0, %v2182_v42, 0.0 }
  0xe8   :  { %v2186_v44 = vpop.f32.mrf.mxu0  ;;  %v2214_v63 = vpop.f32.mrf.mxu1 }
  0xe9   :  { %v629_v46 = vsel %vm627_vm0, %v2186_v44, 0.0 }
  0xea   :  { %v630_v47 = vadd.f32 %v629_v46, %v628_v45  ;;  %v2192_v48 = vpop.f32.mrf.mxu0  ;;  %v2224_v6 = vpop.f32.mrf.mxu1 }
  0xeb   :  { %v639_v0 = vsel %vm627_vm0, %v2192_v48, 0.0 }
  0xec   :  { %v632_v51 = vadd.f32 %v631_v50, %v630_v47  ;;  %v2198_v52 = vpop.f32.mrf.mxu0  ;;  %v2234_v13 = vpop.f32.mrf.mxu1 }
  0xed   :  { %v635_v57 = vsel %vm627_vm0, %v2198_v52, 0.0 }
  0xee   :  { %v634_v54 = vadd.f32 %v633_v53, %v632_v51  ;;  %v2202_v55 = vpop.f32.mrf.mxu0  ;;  %v2244_v20 = vpop.f32.mrf.mxu1 }
  0xef   :  { %v641_v3 = vsel %vm627_vm0, %v2202_v55, 0.0 }
  0xf0   :  { %v636_v58 = vadd.f32 %v635_v57, %v634_v54  ;;  %v2208_v59 = vpop.f32.mrf.mxu0  ;;  %v2254_v27 = vpop.f32.mrf.mxu1 }
  0xf1   :  { %v637_v60 = vsel %vm627_vm0, %v2208_v59, 0.0 }
  0xf2   :  { %v638_v61 = vadd.f32 %v637_v60, %v636_v58  ;;  %v2212_v62 = vpop.f32.mrf.mxu0  ;;  %v2264_v34 = vpop.f32.mrf.mxu1 }
  0xf3   :  { %v647_v14 = vsel %vm627_vm0, %v2212_v62, 0.0  ;;  %4436 = vst [vmem:[#allocation2_spill] sm:$0xff] %v2264_v34 }
  0xf4   :  { %v640_v1 = vadd.f32 %v639_v0, %v638_v61  ;;  %v2218_v2 = vpop.f32.mrf.mxu0  ;;  %v2274_v46 = vpop.f32.mrf.mxu1 }
  0xf5   :  { %v643_v7 = vsel %vm627_vm0, %v2218_v2, 0.0  ;;  %4437 = vst [vmem:[#allocation3_spill] sm:$0xff] %v2274_v46 }
  0xf6   :  { %v642_v4 = vadd.f32 %v641_v3, %v640_v1  ;;  %v2222_v5 = vpop.f32.mrf.mxu0  ;;  %v2284_v58 = vpop.f32.mrf.mxu1 }
  0xf7   :  { %v649_v17 = vsel %vm627_vm0, %v2222_v5, 0.0 }
  0xf8   :  { %v644_v8 = vadd.f32 %v643_v7, %v642_v4  ;;  %v2228_v9 = vpop.f32.mrf.mxu0  ;;  %v2294_v7 = vpop.f32.mrf.mxu1 }
  0xf9   :  { %v645_v10 = vsel %vm627_vm0, %v2228_v9, 0.0 }
  0xfa   :  { %v646_v11 = vadd.f32 %v645_v10, %v644_v8  ;;  %v2232_v12 = vpop.f32.mrf.mxu0 }
  0xfb   :  { %v655_v28 = vsel %vm627_vm0, %v2232_v12, 0.0 }
  0xfc   :  { %v648_v15 = vadd.f32 %v647_v14, %v646_v11  ;;  %v2238_v16 = vpop.f32.mrf.mxu0 }
  0xfd   :  { %v651_v21 = vsel %vm627_vm0, %v2238_v16, 0.0 }
  0xfe   :  { %v650_v18 = vadd.f32 %v649_v17, %v648_v15  ;;  %v2242_v19 = vpop.f32.mrf.mxu0 }
  0xff   :  { %v657_v31 = vsel %vm627_vm0, %v2242_v19, 0.0 }
 0x100   :  { %v652_v22 = vadd.f32 %v651_v21, %v650_v18  ;;  %v2248_v23 = vpop.f32.mrf.mxu0  ;;  %v2304_v18 = vpop.f32.mrf.mxu1 }
 0x101   :  { %v653_v24 = vsel %vm627_vm0, %v2248_v23, 0.0  ;;  %4438 = vst [vmem:[#allocation4_spill] sm:$0xff] %v2304_v18 }
 0x102   :  { %v654_v25 = vadd.f32 %v653_v24, %v652_v22  ;;  %v2252_v26 = vpop.f32.mrf.mxu0 }
 0x103   :  { %v663_v47 = vsel %vm627_vm0, %v2252_v26, 0.0 }
 0x104   :  { %v656_v29 = vadd.f32 %v655_v28, %v654_v25  ;;  %v2258_v30 = vpop.f32.mrf.mxu0 }
 0x105   :  { %v659_v35 = vsel %vm627_vm0, %v2258_v30, 0.0 }
 0x106   :  { %v658_v32 = vadd.f32 %v657_v31, %v656_v29  ;;  %v2262_v33 = vpop.f32.mrf.mxu0  ;;  %v2314_v31 = vpop.f32.mrf.mxu1 }
 0x107   :  { %v665_v53 = vsel %vm627_vm0, %v2262_v33, 0.0  ;;  %4439 = vst [vmem:[#allocation5_spill] sm:$0xff] %v2314_v31 }
 0x108   :  { %v660_v36 = vadd.f32 %v659_v35, %v658_v32  ;;  %v2268_v37 = vpop.f32.mrf.mxu0 }
 0x109   :  { %v661_v38 = vsel %vm627_vm0, %v2268_v37, 0.0 }
 0x10a   :  { %v662_v39 = vadd.f32 %v661_v38, %v660_v36  ;;  %v2272_v45 = vpop.f32.mrf.mxu0 }
 0x10b   :  { %v671_v8 = vsel %vm627_vm0, %v2272_v45, 0.0 }
 0x10c   :  { %v664_v50 = vadd.f32 %v663_v47, %v662_v39  ;;  %v2278_v51 = vpop.f32.mrf.mxu0 }
 0x10d   :  { %v667_v60 = vsel %vm627_vm0, %v2278_v51, 0.0 }
 0x10e   :  { %v666_v54 = vadd.f32 %v665_v53, %v664_v50  ;;  %v2282_v57 = vpop.f32.mrf.mxu0  ;;  %v2324_v50 = vpop.f32.mrf.mxu1 }
 0x10f   :  { %v673_v14 = vsel %vm627_vm0, %v2282_v57, 0.0 }
 0x110   :  { %v668_v61 = vadd.f32 %v667_v60, %v666_v54  ;;  %v2288_v0 = vpop.f32.mrf.mxu0 }
 0x111   :  { %v669_v1 = vsel %vm627_vm0, %v2288_v0, 0.0 }
 0x112   :  { %v670_v3 = vadd.f32 %v669_v1, %v668_v61  ;;  %v2292_v4 = vpop.f32.mrf.mxu0 }
 0x113   :  { %v679_v32 = vsel %vm627_vm0, %v2292_v4, 0.0 }
 0x114   :  { %v672_v10 = vadd.f32 %v671_v8, %v670_v3  ;;  %v2298_v11 = vpop.f32.mrf.mxu0  ;;  %v2332_v3 = vpop.f32.mrf.mxu1 }
 0x115   :  { %v675_v21 = vsel %vm627_vm0, %v2298_v11, 0.0 }
 0x116   :  { %v674_v15 = vadd.f32 %v673_v14, %v672_v10  ;;  %v2302_v17 = vpop.f32.mrf.mxu0 }
 0x117   :  { %v681_v38 = vsel %vm627_vm0, %v2302_v17, 0.0 }
 0x118   :  { %v676_v22 = vadd.f32 %v675_v21, %v674_v15  ;;  %v2308_v24 = vpop.f32.mrf.mxu0  ;;  %v2338_v21 = vpop.f32.mrf.mxu1 }
 0x119   :  { %v677_v25 = vsel %vm627_vm0, %v2308_v24, 0.0  ;;  %4440 = vst [vmem:[#allocation6_spill] sm:$0xff] %v2338_v21 }
 0x11a   :  { %v678_v28 = vadd.f32 %v677_v25, %v676_v22  ;;  %v2312_v29 = vpop.f32.mrf.mxu0  ;;  %v691_v22 = vsel %vm627_vm0, %v2194_v49, 0.0 }
 0x11b   :  { %v687_v8 = vsel %vm627_vm0, %v2312_v29, 0.0 }
 0x11c   :  { %v680_v35 = vadd.f32 %v679_v32, %v678_v28  ;;  %v2318_v36 = vpop.f32.mrf.mxu0  ;;  %v693_v28 = vsel %vm627_vm0, %v2214_v63, 0.0 }
 0x11d   :  { %v683_v53 = vsel %vm627_vm0, %v2318_v36, 0.0 }
 0x11e   :  { %v682_v39 = vadd.f32 %v681_v38, %v680_v35  ;;  %v2322_v47 = vpop.f32.mrf.mxu0  ;;  %v2344_v35 = vpop.f32.mrf.mxu1  ;;  %v695_v38 = vsel %vm627_vm0, %v2184_v43, 0.0 }
 0x11f   :  { %v689_v14 = vsel %vm627_vm0, %v2322_v47, 0.0  ;;  %4441 = vst [vmem:[#allocation7_spill] sm:$0xff] %v2344_v35 }
 0x120   :  { %v684_v54 = vadd.f32 %v683_v53, %v682_v39  ;;  %v2328_v60 = vpop.f32.mrf.mxu0  ;;  %v697_v53 = vsel %vm627_vm0, %v2204_v56, 0.0 }
 0x121   :  { %v685_v61 = vsel %vm627_vm0, %v2328_v60, 0.0 }
 0x122   :  { %v686_v1 = vadd.f32 %v685_v61, %v684_v54  ;;  %v2350_v61 = vpop.f32.mrf.mxu1 }
 0x124   :  { %v688_v10 = vadd.f32 %v687_v8, %v686_v1  ;;  %v699_v1 = vsel %vm627_vm0, %v2234_v13, 0.0 }
 0x126   :  { %v690_v15 = vadd.f32 %v689_v14, %v688_v10  ;;  %v701_v10 = vsel %vm627_vm0, %v2254_v27, 0.0 }
 0x128   :  { %v692_v25 = vadd.f32 %v691_v22, %v690_v15  ;;  %v2356_v15 = vpop.f32.mrf.mxu1  ;;  %v703_v22 = vsel %vm627_vm0, %v2224_v6, 0.0 }
 0x12a   :  { %v694_v32 = vadd.f32 %v693_v28, %v692_v25  ;;  %v705_v28 = vsel %vm627_vm0, %v2244_v20, 0.0 }
 0x12c   :  { %v696_v39 = vadd.f32 %v695_v38, %v694_v32  ;;  %v2362_v38 = vpop.f32.mrf.mxu1 }
 0x12d   :  { %4442 = vst [vmem:[#allocation8_spill] sm:$0xff] %v2362_v38 }
 0x12e   :  { %v698_v54 = vadd.f32 %v697_v53, %v696_v39  ;;  %v707_v39 = vsel %vm627_vm0, %v2274_v46, 0.0  ;;  %v715_v46 = vsel %vm627_vm0, %v2314_v31, 0.0  ;;  %v723_v31 = vsel %vm627_vm0, %v2344_v35, 0.0 }
 0x130   :  { %v700_v8 = vadd.f32 %v699_v1, %v698_v54  ;;  %v709_v54 = vsel %vm627_vm0, %v2294_v7, 0.0 }
 0x132   :  { %v702_v14 = vadd.f32 %v701_v10, %v700_v8  ;;  %v2368_v8 = vpop.f32.mrf.mxu1  ;;  %v711_v10 = vsel %vm627_vm0, %v2264_v34, 0.0  ;;  %v719_v34 = vsel %vm627_vm0, %v2304_v18, 0.0  ;;  %v727_v18 = vsel %vm627_vm0, %v2338_v21, 0.0 }
 0x133   :  { %4443 = vst [vmem:[#allocation9_spill] sm:$0xff] %v2368_v8  ;;  %v731_v35 = vsel %vm627_vm0, %v2368_v8, 0.0  ;;  %v735_v21 = vsel %vm627_vm0, %v2362_v38, 0.0 }
 0x134   :  { %v704_v25 = vadd.f32 %v703_v22, %v702_v14  ;;  %v713_v22 = vsel %vm627_vm0, %v2284_v58, 0.0 }
 0x136   :  { %v706_v32 = vadd.f32 %v705_v28, %v704_v25  ;;  %v2374_v28 = vpop.f32.mrf.mxu1 }
 0x137   :  { %4444 = vst [vmem:[#allocation10_spill] sm:$0xff] %v2374_v28 }
 0x138   :  { %v708_v53 = vadd.f32 %v707_v39, %v706_v32  ;;  %v717_v39 = vsel %vm627_vm0, %v2332_v3, 0.0 }
 0x13a   :  { %v710_v1 = vadd.f32 %v709_v54, %v708_v53  ;;  %v2380_v54 = vpop.f32.mrf.mxu1 }
 0x13c   :  { %v712_v14 = vadd.f32 %v711_v10, %v710_v1  ;;  %v721_v10 = vsel %vm627_vm0, %v2324_v50, 0.0 }
 0x13e   :  { %v714_v25 = vadd.f32 %v713_v22, %v712_v14  ;;  %v2386_v22 = vpop.f32.mrf.mxu1 }
 0x13f   :  { %4445 = vst [vmem:[#allocation11_spill] sm:$0xff] %v2386_v22  ;;  %v743_v38 = vsel %vm627_vm0, %v2386_v22, 0.0 }
 0x140   :  { %v716_v32 = vadd.f32 %v715_v46, %v714_v25  ;;  %v725_v25 = vsel %vm627_vm0, %v2356_v15, 0.0 }
 0x142   :  { %v718_v53 = vadd.f32 %v717_v39, %v716_v32  ;;  %v2392_v39 = vpop.f32.mrf.mxu1 }
 0x143   :  { %4446 = vst [vmem:[#allocation12_spill] sm:$0xff] %v2392_v39  ;;  %v739_v8 = vsel %vm627_vm0, %v2392_v39, 0.0 }
 0x144   :  { %v720_v1 = vadd.f32 %v719_v34, %v718_v53  ;;  %v729_v53 = vsel %vm627_vm0, %v2350_v61, 0.0 }
 0x146   :  { %v722_v14 = vadd.f32 %v721_v10, %v720_v1  ;;  %v2398_v10 = vpop.f32.mrf.mxu1 }
 0x147   :  { %4447 = vst [vmem:[#allocation13_spill] sm:$0xff] %v2398_v10 }
 0x148   :  { %v724_v46 = vadd.f32 %v723_v31, %v722_v14  ;;  %v733_v14 = vsel %vm627_vm0, %v2380_v54, 0.0 }
 0x14a   :  { %v726_v32 = vadd.f32 %v725_v25, %v724_v46  ;;  %v2404_v25 = vpop.f32.mrf.mxu1 }
 0x14b   :  { %4448 = vst [vmem:[#allocation14_spill] sm:$0xff] %v2404_v25 }
 0x14c   :  { %v728_v34 = vadd.f32 %v727_v18, %v726_v32  ;;  %v737_v32 = vsel %vm627_vm0, %v2374_v28, 0.0 }
 0x14e   :  { %v730_v1 = vadd.f32 %v729_v53, %v728_v34  ;;  %v2410_v53 = vpop.f32.mrf.mxu1 }
 0x14f   :  { %v751_v22 = vsel %vm627_vm0, %v2410_v53, 0.0 }
 0x150   :  { %v732_v31 = vadd.f32 %v731_v35, %v730_v1  ;;  %v741_v1 = vsel %vm627_vm0, %v2404_v25, 0.0 }
 0x152   :  { %v734_v46 = vadd.f32 %v733_v14, %v732_v31  ;;  %v2416_v14 = vpop.f32.mrf.mxu1 }
 0x153   :  { %4449 = vst [vmem:[#allocation15_spill] sm:$0xff] %v2416_v14  ;;  %v747_v39 = vsel %vm627_vm0, %v2416_v14, 0.0 }
 0x154   :  { %v736_v18 = vadd.f32 %v735_v21, %v734_v46  ;;  %v745_v46 = vsel %vm627_vm0, %v2398_v10, 0.0 }
 0x156   :  { %v738_v34 = vadd.f32 %v737_v32, %v736_v18  ;;  %v2422_v32 = vpop.f32.mrf.mxu1 }
 0x158   :  { %v740_v35 = vadd.f32 %v739_v8, %v738_v34  ;;  %v2426_v34 = vpop.f32.mrf.mxu1 }
 0x159   :  { %4450 = vst [vmem:[#allocation16_spill] sm:$0xff] %v2426_v34 }
 0x15a   :  { %v742_v31 = vadd.f32 %v741_v1, %v740_v35  ;;  %v749_v35 = vsel %vm627_vm0, %v2426_v34, 0.0 }
 0x15c   :  { %v744_v21 = vadd.f32 %v743_v38, %v742_v31  ;;  %v753_v31 = vsel %vm627_vm0, %v2422_v32, 0.0 }
 0x15e   :  { %v746_v18 = vadd.f32 %v745_v46, %v744_v21 }
 0x160   :  { %v748_v8 = vadd.f32 %v747_v39, %v746_v18 }
 0x162   :  { %v750_v1 = vadd.f32 %v749_v35, %v748_v8 }
 0x164   :  { %v752_v38 = vadd.f32 %v751_v22, %v750_v1 }
 0x166   :  { %v754_v21 = vadd.f32 %v753_v31, %v752_v38 }
 0x168   :  { %v755_v46 = vrot.slane %v754_v21, 4 }
 0x16a   :  { %v756_v10 = vadd.f32 %v755_v46, %v754_v21 }
 0x16c   :  { %v757_v25 = vrot.slane %v756_v10, 2 }
 0x16e   :  { %v758_v28 = vadd.f32 %v757_v25, %v756_v10 }
 0x170   :  { %v759_v14 = vrot.slane %v758_v28, 1 }
 0x172   :  { %v760_v39 = vadd.f32 %v759_v14, %v758_v28 }
 0x174   :  { %v2434_v18 = vmul.f32 0.001953125, %v760_v39 }
 0x176   :  { %v2438_v34 = vsub.f32 %v2180_v41, %v2434_v18  ;;  %v2442_v8 = vsub.f32 %v2186_v44, %v2434_v18  ;;  %v2446_v22 = vsub.f32 %v2178_v40, %v2434_v18  ;;  %v2450_v35 = vsub.f32 %v2182_v42, %v2434_v18 }
 0x177   :  { %v2458_v41 = vsub.f32 %v2198_v52, %v2434_v18  ;;  %v2464_v40 = vsub.f32 %v2208_v59, %v2434_v18  ;;  %v2472_v38 = vsub.f32 %v2192_v48, %v2434_v18  ;;  %v2479_v59 = vsub.f32 %v2202_v55, %v2434_v18 }
 0x178   :  { %v826_v28 = vmul.f32 %v2438_v34, %v2438_v34  ;;  %v827_v10 = vmul.f32 %v2442_v8, %v2442_v8  ;;  %v828_v44 = vmul.f32 %v2446_v22, %v2446_v22  ;;  %v829_v42 = vmul.f32 %v2450_v35, %v2450_v35 }
 0x179   :  { %v830_v52 = vmul.f32 %v2458_v41, %v2458_v41  ;;  %v831_v46 = vmul.f32 %v2464_v40, %v2464_v40  ;;  %v2486_v48 = vsub.f32 %v2218_v2, %v2434_v18  ;;  %v2493_v55 = vsub.f32 %v2228_v9, %v2434_v18 }
 0x17a   :  { %v890_v25 = vsel %vm627_vm0, %v826_v28, 0.0  ;;  %v891_v14 = vsel %vm627_vm0, %v827_v10, 0.0  ;;  %v893_v31 = vsel %vm627_vm0, %v828_v44, 0.0  ;;  %v895_v39 = vsel %vm627_vm0, %v829_v42, 0.0 }
 0x17b   :  { %v892_v1 = vadd.f32 %v891_v14, %v890_v25  ;;  %v832_v10 = vmul.f32 %v2472_v38, %v2472_v38  ;;  %v897_v44 = vsel %vm627_vm0, %v830_v52, 0.0  ;;  %v833_v14 = vmul.f32 %v2479_v59, %v2479_v59 }
 0x17c   :  { %v899_v42 = vsel %vm627_vm0, %v831_v46, 0.0  ;;  %v2500_v2 = vsub.f32 %v2212_v62, %v2434_v18  ;;  %v2507_v9 = vsub.f32 %v2222_v5, %v2434_v18  ;;  %v2514_v62 = vsub.f32 %v2238_v16, %v2434_v18 }
 0x17d   :  { %v894_v21 = vadd.f32 %v893_v31, %v892_v1  ;;  %v834_v31 = vmul.f32 %v2486_v48, %v2486_v48  ;;  %v901_v52 = vsel %vm627_vm0, %v832_v10, 0.0  ;;  %v903_v46 = vsel %vm627_vm0, %v833_v14, 0.0 }
 0x17e   :  { %v2521_v5 = vsub.f32 %v2248_v23, %v2434_v18  ;;  %v2528_v16 = vsub.f32 %v2232_v12, %v2434_v18  ;;  %v2535_v23 = vsub.f32 %v2242_v19, %v2434_v18  ;;  %v2542_v12 = vsub.f32 %v2258_v30, %v2434_v18 }
 0x17f   :  { %v896_v28 = vadd.f32 %v895_v39, %v894_v21  ;;  %v835_v39 = vmul.f32 %v2493_v55, %v2493_v55  ;;  %v905_v10 = vsel %vm627_vm0, %v834_v31, 0.0  ;;  %v2549_v19 = vsub.f32 %v2268_v37, %v2434_v18 }
 0x180   :  { %v2556_v30 = vsub.f32 %v2252_v26, %v2434_v18  ;;  %v2563_v37 = vsub.f32 %v2262_v33, %v2434_v18  ;;  %v2570_v26 = vsub.f32 %v2278_v51, %v2434_v18  ;;  %v2577_v33 = vsub.f32 %v2288_v0, %v2434_v18 }
 0x181   :  { %v898_v25 = vadd.f32 %v897_v44, %v896_v28  ;;  %v836_v44 = vmul.f32 %v2500_v2, %v2500_v2  ;;  %v907_v14 = vsel %vm627_vm0, %v835_v39, 0.0  ;;  %v2584_v51 = vsub.f32 %v2272_v45, %v2434_v18 }
 0x182   :  { %v2591_v0 = vsub.f32 %v2282_v57, %v2434_v18  ;;  %v2598_v45 = vsub.f32 %v2298_v11, %v2434_v18  ;;  %v2605_v57 = vsub.f32 %v2308_v24, %v2434_v18  ;;  %v2612_v11 = vsub.f32 %v2292_v4, %v2434_v18 }
 0x183   :  { %v900_v1 = vadd.f32 %v899_v42, %v898_v25  ;;  %v837_v42 = vmul.f32 %v2507_v9, %v2507_v9  ;;  %v909_v31 = vsel %vm627_vm0, %v836_v44, 0.0  ;;  %v2619_v24 = vsub.f32 %v2302_v17, %v2434_v18 }
 0x184   :  { %v2626_v4 = vsub.f32 %v2318_v36, %v2434_v18  ;;  %v2633_v17 = vsub.f32 %v2328_v60, %v2434_v18  ;;  %v2640_v36 = vsub.f32 %v2312_v29, %v2434_v18  ;;  %v2647_v60 = vsub.f32 %v2322_v47, %v2434_v18 }
 0x185   :  { %v902_v21 = vadd.f32 %v901_v52, %v900_v1  ;;  %v838_v52 = vmul.f32 %v2514_v62, %v2514_v62  ;;  %v911_v39 = vsel %vm627_vm0, %v837_v42, 0.0  ;;  %v2654_v29 = vsub.f32 %v2194_v49, %v2434_v18 }
 0x186   :  { %v2661_v47 = vsub.f32 %v2214_v63, %v2434_v18  ;;  %v2668_v49 = vsub.f32 %v2184_v43, %v2434_v18  ;;  %v2675_v63 = vsub.f32 %v2204_v56, %v2434_v18  ;;  %v2682_v43 = vsub.f32 %v2234_v13, %v2434_v18 }
 0x187   :  { %v904_v28 = vadd.f32 %v903_v46, %v902_v21  ;;  %v839_v46 = vmul.f32 %v2521_v5, %v2521_v5  ;;  %v913_v44 = vsel %vm627_vm0, %v838_v52, 0.0  ;;  %v2689_v56 = vsub.f32 %v2254_v27, %v2434_v18 }
 0x188   :  { %v2696_v13 = vsub.f32 %v2224_v6, %v2434_v18  ;;  %v2703_v27 = vsub.f32 %v2244_v20, %v2434_v18  ;;  %v2717_v20 = vsub.f32 %v2294_v7, %v2434_v18  ;;  %v2731_v7 = vsub.f32 %v2284_v58, %v2434_v18 }
 0x189   :  { %v906_v25 = vadd.f32 %v905_v10, %v904_v28  ;;  %v840_v10 = vmul.f32 %v2528_v16, %v2528_v16  ;;  %v915_v42 = vsel %vm627_vm0, %v839_v46, 0.0  ;;  %v2745_v58 = vsub.f32 %v2332_v3, %v2434_v18 }
 0x18a   :  { %v2759_v3 = vsub.f32 %v2324_v50, %v2434_v18  ;;  %v2773_v50 = vsub.f32 %v2356_v15, %v2434_v18  ;;  %v2787_v15 = vsub.f32 %v2350_v61, %v2434_v18  ;;  %v2801_v61 = vsub.f32 %v2380_v54, %v2434_v18 }
 0x18b   :  { %v908_v1 = vadd.f32 %v907_v14, %v906_v25  ;;  %v841_v14 = vmul.f32 %v2535_v23, %v2535_v23  ;;  %v917_v52 = vsel %vm627_vm0, %v840_v10, 0.0  ;;  %4457 = vst [vmem:[#allocation17_spill] sm:$0xff] %v2745_v58 }
 0x18c   :  { %4460 = vst [vmem:[#allocation18_spill] sm:$0xff] %v2759_v3  ;;  %4463 = vst [vmem:[#allocation19_spill] sm:$0xff] %v2773_v50 }
 0x18d   :  { %v910_v21 = vadd.f32 %v909_v31, %v908_v1  ;;  %v842_v31 = vmul.f32 %v2542_v12, %v2542_v12  ;;  %v919_v46 = vsel %vm627_vm0, %v841_v14, 0.0  ;;  %4466 = vst [vmem:[#allocation20_spill] sm:$0xff] %v2787_v15  ;;  %4469 = vst [vmem:[#allocation21_spill] sm:$0xff] %v2801_v61 }
 0x18f   :  { %v912_v28 = vadd.f32 %v911_v39, %v910_v21  ;;  %v843_v39 = vmul.f32 %v2549_v19, %v2549_v19  ;;  %v921_v10 = vsel %vm627_vm0, %v842_v31, 0.0 }
 0x191   :  { %v914_v25 = vadd.f32 %v913_v44, %v912_v28  ;;  %v844_v44 = vmul.f32 %v2556_v30, %v2556_v30  ;;  %v923_v14 = vsel %vm627_vm0, %v843_v39, 0.0 }
 0x193   :  { %v916_v1 = vadd.f32 %v915_v42, %v914_v25  ;;  %v845_v42 = vmul.f32 %v2563_v37, %v2563_v37  ;;  %v925_v31 = vsel %vm627_vm0, %v844_v44, 0.0 }
 0x195   :  { %v918_v21 = vadd.f32 %v917_v52, %v916_v1  ;;  %v846_v52 = vmul.f32 %v2570_v26, %v2570_v26  ;;  %v927_v39 = vsel %vm627_vm0, %v845_v42, 0.0 }
 0x197   :  { %v920_v28 = vadd.f32 %v919_v46, %v918_v21  ;;  %v847_v46 = vmul.f32 %v2577_v33, %v2577_v33  ;;  %v929_v44 = vsel %vm627_vm0, %v846_v52, 0.0 }
 0x199   :  { %v922_v25 = vadd.f32 %v921_v10, %v920_v28  ;;  %v848_v10 = vmul.f32 %v2584_v51, %v2584_v51  ;;  %v931_v42 = vsel %vm627_vm0, %v847_v46, 0.0 }
 0x19b   :  { %v924_v1 = vadd.f32 %v923_v14, %v922_v25  ;;  %v849_v14 = vmul.f32 %v2591_v0, %v2591_v0  ;;  %v933_v52 = vsel %vm627_vm0, %v848_v10, 0.0 }
 0x19d   :  { %v926_v21 = vadd.f32 %v925_v31, %v924_v1  ;;  %v850_v31 = vmul.f32 %v2598_v45, %v2598_v45  ;;  %v935_v46 = vsel %vm627_vm0, %v849_v14, 0.0 }
 0x19f   :  { %v928_v28 = vadd.f32 %v927_v39, %v926_v21  ;;  %v851_v39 = vmul.f32 %v2605_v57, %v2605_v57  ;;  %v937_v10 = vsel %vm627_vm0, %v850_v31, 0.0 }
 0x1a1   :  { %v930_v25 = vadd.f32 %v929_v44, %v928_v28  ;;  %v852_v44 = vmul.f32 %v2612_v11, %v2612_v11  ;;  %v939_v14 = vsel %vm627_vm0, %v851_v39, 0.0 }
 0x1a3   :  { %v932_v1 = vadd.f32 %v931_v42, %v930_v25  ;;  %v853_v42 = vmul.f32 %v2619_v24, %v2619_v24  ;;  %v941_v31 = vsel %vm627_vm0, %v852_v44, 0.0 }
 0x1a5   :  { %v934_v21 = vadd.f32 %v933_v52, %v932_v1  ;;  %v854_v52 = vmul.f32 %v2626_v4, %v2626_v4  ;;  %v943_v39 = vsel %vm627_vm0, %v853_v42, 0.0 }
 0x1a7   :  { %v936_v28 = vadd.f32 %v935_v46, %v934_v21  ;;  %v855_v46 = vmul.f32 %v2633_v17, %v2633_v17  ;;  %v945_v44 = vsel %vm627_vm0, %v854_v52, 0.0 }
 0x1a9   :  { %v938_v25 = vadd.f32 %v937_v10, %v936_v28  ;;  %v856_v10 = vmul.f32 %v2640_v36, %v2640_v36  ;;  %v947_v42 = vsel %vm627_vm0, %v855_v46, 0.0 }
 0x1ab   :  { %v940_v1 = vadd.f32 %v939_v14, %v938_v25  ;;  %v857_v14 = vmul.f32 %v2647_v60, %v2647_v60  ;;  %v949_v52 = vsel %vm627_vm0, %v856_v10, 0.0 }
 0x1ad   :  { %v942_v21 = vadd.f32 %v941_v31, %v940_v1  ;;  %v858_v31 = vmul.f32 %v2654_v29, %v2654_v29  ;;  %v951_v46 = vsel %vm627_vm0, %v857_v14, 0.0 }
 0x1af   :  { %v944_v28 = vadd.f32 %v943_v39, %v942_v21  ;;  %v859_v39 = vmul.f32 %v2661_v47, %v2661_v47  ;;  %v953_v10 = vsel %vm627_vm0, %v858_v31, 0.0 }
 0x1b1   :  { %v946_v25 = vadd.f32 %v945_v44, %v944_v28  ;;  %v860_v44 = vmul.f32 %v2668_v49, %v2668_v49  ;;  %v955_v14 = vsel %vm627_vm0, %v859_v39, 0.0 }
 0x1b3   :  { %v948_v1 = vadd.f32 %v947_v42, %v946_v25  ;;  %v861_v42 = vmul.f32 %v2675_v63, %v2675_v63  ;;  %v957_v31 = vsel %vm627_vm0, %v860_v44, 0.0 }
 0x1b5   :  { %v950_v21 = vadd.f32 %v949_v52, %v948_v1  ;;  %v862_v52 = vmul.f32 %v2682_v43, %v2682_v43  ;;  %v959_v39 = vsel %vm627_vm0, %v861_v42, 0.0 }
 0x1b7   :  { %v952_v28 = vadd.f32 %v951_v46, %v950_v21  ;;  %v863_v46 = vmul.f32 %v2689_v56, %v2689_v56  ;;  %v961_v44 = vsel %vm627_vm0, %v862_v52, 0.0 }
 0x1b9   :  { %v954_v25 = vadd.f32 %v953_v10, %v952_v28  ;;  %v4451_v10 = vld [vmem:[#allocation3_spill] sm:$0xff]  ;;  %v963_v42 = vsel %vm627_vm0, %v863_v46, 0.0 }
 0x1ba   :  { %v2710_v6 = vsub.f32 %v4451_v10, %v2434_v18 }
 0x1bb   :  { %v956_v1 = vadd.f32 %v955_v14, %v954_v25  ;;  %v864_v25 = vmul.f32 %v2696_v13, %v2696_v13 }
 0x1bc   :  { %4452 = vst [vmem:[#allocation3_spill] sm:$0xff] %v2710_v6  ;;  %v866_v10 = vmul.f32 %v2710_v6, %v2710_v6 }
 0x1bd   :  { %v958_v21 = vadd.f32 %v957_v31, %v956_v1  ;;  %v865_v1 = vmul.f32 %v2703_v27, %v2703_v27  ;;  %v965_v52 = vsel %vm627_vm0, %v864_v25, 0.0 }
 0x1be   :  { %v969_v25 = vsel %vm627_vm0, %v866_v10, 0.0 }
 0x1bf   :  { %v960_v28 = vadd.f32 %v959_v39, %v958_v21  ;;  %v4453_v21 = vld [vmem:[#allocation2_spill] sm:$0xff]  ;;  %v967_v46 = vsel %vm627_vm0, %v865_v1, 0.0 }
 0x1c0   :  { %v2724_v39 = vsub.f32 %v4453_v21, %v2434_v18 }
 0x1c1   :  { %v962_v14 = vadd.f32 %v961_v44, %v960_v28  ;;  %v867_v44 = vmul.f32 %v2717_v20, %v2717_v20 }
 0x1c2   :  { %4454 = vst [vmem:[#allocation2_spill] sm:$0xff] %v2724_v39  ;;  %v868_v6 = vmul.f32 %v2724_v39, %v2724_v39 }
 0x1c3   :  { %v964_v31 = vadd.f32 %v963_v42, %v962_v14  ;;  %v4455_v42 = vld [vmem:[#allocation5_spill] sm:$0xff]  ;;  %v971_v1 = vsel %vm627_vm0, %v867_v44, 0.0 }
 0x1c4   :  { %v2738_v21 = vsub.f32 %v4455_v42, %v2434_v18  ;;  %v973_v10 = vsel %vm627_vm0, %v868_v6, 0.0 }
 0x1c5   :  { %v966_v28 = vadd.f32 %v965_v52, %v964_v31  ;;  %v869_v52 = vmul.f32 %v2731_v7, %v2731_v7 }
 0x1c6   :  { %4456 = vst [vmem:[#allocation5_spill] sm:$0xff] %v2738_v21  ;;  %v870_v39 = vmul.f32 %v2738_v21, %v2738_v21 }
 0x1c7   :  { %v968_v14 = vadd.f32 %v967_v46, %v966_v28  ;;  %v4458_v46 = vld [vmem:[#allocation4_spill] sm:$0xff]  ;;  %v975_v44 = vsel %vm627_vm0, %v869_v52, 0.0 }
 0x1c8   :  { %v2752_v42 = vsub.f32 %v4458_v46, %v2434_v18  ;;  %v977_v6 = vsel %vm627_vm0, %v870_v39, 0.0 }
 0x1c9   :  { %v970_v31 = vadd.f32 %v969_v25, %v968_v14  ;;  %v871_v25 = vmul.f32 %v2745_v58, %v2745_v58 }
 0x1ca   :  { %4459 = vst [vmem:[#allocation4_spill] sm:$0xff] %v2752_v42  ;;  %v872_v21 = vmul.f32 %v2752_v42, %v2752_v42 }
 0x1cb   :  { %v972_v28 = vadd.f32 %v971_v1, %v970_v31  ;;  %v4461_v1 = vld [vmem:[#allocation7_spill] sm:$0xff]  ;;  %v979_v52 = vsel %vm627_vm0, %v871_v25, 0.0 }
 0x1cc   :  { %v2766_v46 = vsub.f32 %v4461_v1, %v2434_v18  ;;  %v981_v39 = vsel %vm627_vm0, %v872_v21, 0.0 }
 0x1cd   :  { %v974_v14 = vadd.f32 %v973_v10, %v972_v28  ;;  %v873_v10 = vmul.f32 %v2759_v3, %v2759_v3 }
 0x1ce   :  { %4462 = vst [vmem:[#allocation7_spill] sm:$0xff] %v2766_v46  ;;  %v874_v42 = vmul.f32 %v2766_v46, %v2766_v46 }
 0x1cf   :  { %v976_v31 = vadd.f32 %v975_v44, %v974_v14  ;;  %v4464_v44 = vld [vmem:[#allocation6_spill] sm:$0xff]  ;;  %v983_v25 = vsel %vm627_vm0, %v873_v10, 0.0 }
 0x1d0   :  { %v2780_v1 = vsub.f32 %v4464_v44, %v2434_v18  ;;  %v985_v21 = vsel %vm627_vm0, %v874_v42, 0.0 }
 0x1d1   :  { %v978_v28 = vadd.f32 %v977_v6, %v976_v31  ;;  %v875_v6 = vmul.f32 %v2773_v50, %v2773_v50 }
 0x1d2   :  { %4465 = vst [vmem:[#allocation6_spill] sm:$0xff] %v2780_v1  ;;  %v876_v46 = vmul.f32 %v2780_v1, %v2780_v1 }
 0x1d3   :  { %v980_v14 = vadd.f32 %v979_v52, %v978_v28  ;;  %v4467_v52 = vld [vmem:[#allocation9_spill] sm:$0xff]  ;;  %v987_v10 = vsel %vm627_vm0, %v875_v6, 0.0 }
 0x1d4   :  { %v2794_v44 = vsub.f32 %v4467_v52, %v2434_v18  ;;  %v989_v42 = vsel %vm627_vm0, %v876_v46, 0.0 }
 0x1d5   :  { %v982_v31 = vadd.f32 %v981_v39, %v980_v14  ;;  %v877_v39 = vmul.f32 %v2787_v15, %v2787_v15  ;;  %v879_v15 = vmul.f32 %v2801_v61, %v2801_v61 }
 0x1d6   :  { %4468 = vst [vmem:[#allocation9_spill] sm:$0xff] %v2794_v44  ;;  %v878_v1 = vmul.f32 %v2794_v44, %v2794_v44 }
 0x1d7   :  { %v984_v28 = vadd.f32 %v983_v25, %v982_v31  ;;  %v4470_v25 = vld [vmem:[#allocation8_spill] sm:$0xff]  ;;  %v991_v6 = vsel %vm627_vm0, %v877_v39, 0.0  ;;  %v995_v39 = vsel %vm627_vm0, %v879_v15, 0.0 }
 0x1d8   :  { %v2808_v52 = vsub.f32 %v4470_v25, %v2434_v18  ;;  %v993_v46 = vsel %vm627_vm0, %v878_v1, 0.0 }
 0x1d9   :  { %v986_v14 = vadd.f32 %v985_v21, %v984_v28  ;;  %v4472_v21 = vld [vmem:[#allocation10_spill] sm:$0xff] }
 0x1da   :  { %4471 = vst [vmem:[#allocation8_spill] sm:$0xff] %v2808_v52  ;;  %v2815_v54 = vsub.f32 %v4472_v21, %v2434_v18  ;;  %v880_v44 = vmul.f32 %v2808_v52, %v2808_v52 }
 0x1db   :  { %v988_v31 = vadd.f32 %v987_v10, %v986_v14  ;;  %v4474_v10 = vld [vmem:[#allocation12_spill] sm:$0xff] }
 0x1dc   :  { %4473 = vst [vmem:[#allocation10_spill] sm:$0xff] %v2815_v54  ;;  %v2822_v25 = vsub.f32 %v4474_v10, %v2434_v18  ;;  %v881_v61 = vmul.f32 %v2815_v54, %v2815_v54  ;;  %v997_v52 = vsel %vm627_vm0, %v880_v44, 0.0  ;;  %v4483_v44 = vld [vmem:[#allocation16_spill] sm:$0xff] }
 0x1dd   :  { %v990_v28 = vadd.f32 %v989_v42, %v988_v31  ;;  %v4476_v42 = vld [vmem:[#allocation14_spill] sm:$0xff] }
 0x1de   :  { %4475 = vst [vmem:[#allocation12_spill] sm:$0xff] %v2822_v25  ;;  %v2829_v21 = vsub.f32 %v4476_v42, %v2434_v18  ;;  %v882_v50 = vmul.f32 %v2822_v25, %v2822_v25  ;;  %v999_v54 = vsel %vm627_vm0, %v881_v61, 0.0  ;;  %v2860_v61 = vsub.f32 %v2410_v53, %v2434_v18 }
 0x1df   :  { %v992_v14 = vadd.f32 %v991_v6, %v990_v28  ;;  %v4478_v6 = vld [vmem:[#allocation11_spill] sm:$0xff] }
 0x1e0   :  { %4477 = vst [vmem:[#allocation14_spill] sm:$0xff] %v2829_v21  ;;  %v820_v10 = vsub.f32 %v4478_v6, %v2434_v18  ;;  %v883_v42 = vmul.f32 %v2829_v21, %v2829_v21  ;;  %v1001_v25 = vsel %vm627_vm0, %v882_v50, 0.0  ;;  %4485 = vst [vmem:[#allocation16_spill] sm:$0xff] %v2860_v61  ;;  %v888_v53 = vmul.f32 %v2860_v61, %v2860_v61 }
 0x1e1   :  { %v994_v31 = vadd.f32 %v993_v46, %v992_v14  ;;  %v4479_v14 = vld [vmem:[#allocation13_spill] sm:$0xff] }
 0x1e2   :  { %v2841_v46 = vsub.f32 %v4479_v14, %v2434_v18  ;;  %v884_v6 = vmul.f32 %v820_v10, %v820_v10  ;;  %v1003_v14 = vsel %vm627_vm0, %v883_v42, 0.0 }
 0x1e3   :  { %v996_v28 = vadd.f32 %v995_v39, %v994_v31  ;;  %v4481_v31 = vld [vmem:[#allocation15_spill] sm:$0xff] }
 0x1e4   :  { %4480 = vst [vmem:[#allocation11_spill] sm:$0xff] %v2841_v46  ;;  %v2848_v39 = vsub.f32 %v4481_v31, %v2434_v18  ;;  %v1005_v50 = vsel %vm627_vm0, %v884_v6, 0.0 }
 0x1e5   :  { %v998_v1 = vadd.f32 %v997_v52, %v996_v28  ;;  %v2853_v52 = vsub.f32 %v4483_v44, %v2434_v18  ;;  %v885_v28 = vmul.f32 %v2841_v46, %v2841_v46 }
 0x1e6   :  { %4482 = vst [vmem:[#allocation13_spill] sm:$0xff] %v2848_v39 }
 0x1e7   :  { %v1000_v15 = vadd.f32 %v999_v54, %v998_v1  ;;  %4484 = vst [vmem:[#allocation15_spill] sm:$0xff] %v2853_v52  ;;  %v886_v54 = vmul.f32 %v2848_v39, %v2848_v39  ;;  %v2867_v1 = vsub.f32 %v2422_v32, %v2434_v18  ;;  %v1007_v42 = vsel %vm627_vm0, %v885_v28, 0.0 }
 0x1e8   :  { %v1013_v32 = vsel %vm627_vm0, %v888_v53, 0.0 }
 0x1e9   :  { %v1002_v3 = vadd.f32 %v1001_v25, %v1000_v15  ;;  %4486 = vst [vmem:[#allocation22_spill] sm:$0xff] %v2867_v1  ;;  %v887_v15 = vmul.f32 %v2853_v52, %v2853_v52  ;;  %v1009_v31 = vsel %vm627_vm0, %v886_v54, 0.0  ;;  %v889_v6 = vmul.f32 %v2867_v1, %v2867_v1 }
 0x1eb   :  { %v1004_v21 = vadd.f32 %v1003_v14, %v1002_v3 }
 0x1ed   :  { %v1006_v25 = vadd.f32 %v1005_v50, %v1004_v21  ;;  %v1011_v21 = vsel %vm627_vm0, %v887_v15, 0.0  ;;  %v1015_v50 = vsel %vm627_vm0, %v889_v6, 0.0  ;;  %v1024_v15 = vld [vmem:[%s4364_s2] sm:$0x1] }
 0x1ef   :  { %v1008_v3 = vadd.f32 %v1007_v42, %v1006_v25 }
 0x1f1   :  { %v1010_v44 = vadd.f32 %v1009_v31, %v1008_v3  ;;  %v1029_v31 = vlaneseq }
 0x1f3   :  { %v1012_v14 = vadd.f32 %v1011_v21, %v1010_v44  ;;  %v1030_v1 = vshrl.u32 %v1029_v31, 7  ;;  %v4489_v21 = vld [vmem:[#allocation2_spill] sm:$0xff] }
 0x1f4   :  { %v4496_v31 = vld [vmem:[#allocation6_spill] sm:$0xff] }
 0x1f5   :  { %v1014_v18 = vadd.f32 %v1013_v32, %v1012_v14  ;;  %v1031_v44 = vsub.s32 0, %v1030_v1  ;;  %v4490_v14 = vld [vmem:[#allocation5_spill] sm:$0xff] }
 0x1f6   :  { %v4491_v32 = vld [vmem:[#allocation17_spill] sm:$0xff] }
 0x1f7   :  { %v1016_v52 = vadd.f32 %v1015_v50, %v1014_v18  ;;  %v4492_v50 = vld [vmem:[#allocation4_spill] sm:$0xff] }
 0x1f9   :  { %v1017_v28 = vrot.slane %v1016_v52, 4 }
 0x1fb   :  { %v1018_v25 = vadd.f32 %v1017_v28, %v1016_v52  ;;  %v4493_v28 = vld [vmem:[#allocation18_spill] sm:$0xff] }
 0x1fd   :  { %v1019_v42 = vrot.slane %v1018_v25, 2 }
 0x1ff   :  { %v1020_v39 = vadd.f32 %v1019_v42, %v1018_v25  ;;  %v4494_v42 = vld [vmem:[#allocation7_spill] sm:$0xff] }
 0x201   :  { %v1021_v61 = vrot.slane %v1020_v39, 1 }
 0x203   :  { %v1022_v46 = vadd.f32 %v1021_v61, %v1020_v39 }
 0x205   :  { %v1023_v54 = vmul.f32 0.001953125, %v1022_v46 }
 0x207   :  { %v1025_v3 = vadd.f32 1e-05, %v1023_v54  ;;  %v4495_v54 = vld [vmem:[#allocation19_spill] sm:$0xff] }
 0x209   :  { %2031 = vrsqrt.f32 %v1025_v3 }
 0x216   :  { %v2032_v58 = vpop.eup %2031 }
 0x217   :  { %v1027_v53 = vmul.f32 %v2032_v58, %v1024_v15 }
 0x219   :  { %v2883_v6 = vrot.slane %v1027_v53, %v1031_v44  ;;  %v4497_v53 = vld [vmem:[#allocation20_spill] sm:$0xff] }
 0x21b   :  { %v2887_v52 = vmul.f32 %v2883_v6, %v2438_v34  ;;  %v2891_v46 = vmul.f32 %v2883_v6, %v2442_v8  ;;  %v2894_v39 = vmul.f32 %v2883_v6, %v820_v10  ;;  %v2898_v61 = vmul.f32 %v2883_v6, %v2446_v22  ;;  %v4488_v10 = vld [vmem:[#allocation3_spill] sm:$0xff] }
 0x21c   :  { %v2902_v58 = vmul.f32 %v2883_v6, %v2450_v35  ;;  %v2906_v1 = vmul.f32 %v2883_v6, %v2458_v41  ;;  %v2910_v34 = vmul.f32 %v2883_v6, %v2464_v40  ;;  %v2914_v8 = vmul.f32 %v2883_v6, %v2472_v38 }
 0x21d   :  { %4487 = vst [vmem:[#allocation23_spill] sm:$0xff] %v2894_v39  ;;  %v2918_v22 = vmul.f32 %v2883_v6, %v2479_v59  ;;  %v2922_v35 = vmul.f32 %v2883_v6, %v2486_v48  ;;  %v2926_v41 = vmul.f32 %v2883_v6, %v2493_v55  ;;  %v2930_v40 = vmul.f32 %v2883_v6, %v2500_v2  ;;  %v4509_v39 = vld [vmem:[#allocation14_spill] sm:$0xff] }
 0x21e   :  { %v2934_v38 = vmul.f32 %v2883_v6, %v2507_v9  ;;  %v2938_v59 = vmul.f32 %v2883_v6, %v2514_v62  ;;  %v2942_v48 = vmul.f32 %v2883_v6, %v2521_v5  ;;  %v2946_v55 = vmul.f32 %v2883_v6, %v2528_v16 }
 0x21f   :  { %v2950_v2 = vmul.f32 %v2883_v6, %v2535_v23  ;;  %v2954_v9 = vmul.f32 %v2883_v6, %v2542_v12  ;;  %v2958_v62 = vmul.f32 %v2883_v6, %v2549_v19  ;;  %v2962_v5 = vmul.f32 %v2883_v6, %v2556_v30 }
 0x220   :  { %v2966_v16 = vmul.f32 %v2883_v6, %v2563_v37  ;;  %v2970_v23 = vmul.f32 %v2883_v6, %v2570_v26  ;;  %v2974_v12 = vmul.f32 %v2883_v6, %v2577_v33  ;;  %v2978_v19 = vmul.f32 %v2883_v6, %v2584_v51 }
 0x221   :  { %v2982_v30 = vmul.f32 %v2883_v6, %v2591_v0  ;;  %v2986_v37 = vmul.f32 %v2883_v6, %v2598_v45  ;;  %v2990_v26 = vmul.f32 %v2883_v6, %v2605_v57  ;;  %v2994_v33 = vmul.f32 %v2883_v6, %v2612_v11 }
 0x222   :  { %v2998_v51 = vmul.f32 %v2883_v6, %v2619_v24  ;;  %v3002_v0 = vmul.f32 %v2883_v6, %v2626_v4  ;;  %v3006_v45 = vmul.f32 %v2883_v6, %v2633_v17  ;;  %v3010_v57 = vmul.f32 %v2883_v6, %v2640_v36 }
 0x223   :  { %v3014_v11 = vmul.f32 %v2883_v6, %v2647_v60  ;;  %v3018_v24 = vmul.f32 %v2883_v6, %v2654_v29  ;;  %v3022_v4 = vmul.f32 %v2883_v6, %v2661_v47  ;;  %v3026_v17 = vmul.f32 %v2883_v6, %v2668_v49 }
 0x224   :  { %v3030_v36 = vmul.f32 %v2883_v6, %v2675_v63  ;;  %v3034_v60 = vmul.f32 %v2883_v6, %v2682_v43  ;;  %v3038_v29 = vmul.f32 %v2883_v6, %v2689_v56  ;;  %v3042_v47 = vmul.f32 %v2883_v6, %v2696_v13 }
 0x225   :  { %v3046_v49 = vmul.f32 %v2883_v6, %v2703_v27  ;;  %v3050_v63 = vmul.f32 %v2883_v6, %v4488_v10  ;;  %v3054_v43 = vmul.f32 %v2883_v6, %v2717_v20  ;;  %v3058_v56 = vmul.f32 %v2883_v6, %v4489_v21  ;;  %v4499_v10 = vld [vmem:[#allocation9_spill] sm:$0xff] }
 0x226   :  { %v3062_v13 = vmul.f32 %v2883_v6, %v2731_v7  ;;  %v3066_v27 = vmul.f32 %v2883_v6, %v4490_v14  ;;  %v3070_v18 = vmul.f32 %v2883_v6, %v4491_v32  ;;  %v3074_v20 = vmul.f32 %v2883_v6, %v4492_v50  ;;  %v4501_v14 = vld [vmem:[#allocation21_spill] sm:$0xff]  ;;  %v3107_v50 = vld [vmem:[%s4365_s3] ss:$0 sm:$0xff] }
 0x227   :  { %v3078_v25 = vmul.f32 %v2883_v6, %v4493_v28  ;;  %v3082_v7 = vmul.f32 %v2883_v6, %v4494_v42  ;;  %v3086_v3 = vmul.f32 %v2883_v6, %v4495_v54  ;;  %v3090_v15 = vmul.f32 %v2883_v6, %v4496_v31  ;;  %v4503_v28 = vld [vmem:[#allocation8_spill] sm:$0xff]  ;;  %v4505_v54 = vld [vmem:[#allocation10_spill] sm:$0xff] }
 0x228   :  { %v3094_v44 = vmul.f32 %v2883_v6, %v4497_v53  ;;  %v3098_v21 = vmul.f32 %v2883_v6, %v4499_v10  ;;  %v3102_v32 = vmul.f32 %v2883_v6, %v4501_v14  ;;  %v3111_v42 = vmul.f32 %v2883_v6, %v4503_v28  ;;  %v4507_v53 = vld [vmem:[#allocation12_spill] sm:$0xff] }
 0x229   :  { %v3115_v31 = vmul.f32 %v2883_v6, %v4505_v54  ;;  %v3119_v10 = vmul.f32 %v2883_v6, %v4507_v53  ;;  %v3123_v14 = vmul.f32 %v2883_v6, %v4509_v39 }
 0x22a   :  { %4498 = vst [vmem:[#allocation3_spill] sm:$0xff] %v3094_v44  ;;  %4500 = vst [vmem:[#allocation2_spill] sm:$0xff] %v3098_v21  ;;  %v4511_v44 = vld [vmem:[#allocation13_spill] sm:$0xff] }
 0x22b   :  { %4502 = vst [vmem:[#allocation5_spill] sm:$0xff] %v3102_v32  ;;  %4504 = vst [vmem:[#allocation17_spill] sm:$0xff] %v3111_v42  ;;  %v4510_v32 = vld [vmem:[#allocation11_spill] sm:$0xff]  ;;  %v3131_v28 = vmul.f32 %v2883_v6, %v4511_v44  ;;  %v3151_v44 = vadd.f32 %v3107_v50, %v2891_v46  ;;  %v3171_v46 = vadd.f32 %v3107_v50, %v2914_v8 }
 0x22c   :  { %4506 = vst [vmem:[#allocation4_spill] sm:$0xff] %v3115_v31  ;;  %4508 = vst [vmem:[#allocation18_spill] sm:$0xff] %v3119_v10  ;;  %v3127_v21 = vmul.f32 %v2883_v6, %v4510_v32  ;;  %v4512_v42 = vld [vmem:[#allocation15_spill] sm:$0xff]  ;;  %v4513_v31 = vld [vmem:[#allocation16_spill] sm:$0xff]  ;;  %v3147_v32 = vadd.f32 %v3107_v50, %v2887_v52  ;;  %v3167_v52 = vadd.f32 %v3107_v50, %v2910_v34 }
 0x22d   :  { %v3135_v54 = vmul.f32 %v2883_v6, %v4512_v42  ;;  %v3139_v53 = vmul.f32 %v2883_v6, %v4513_v31  ;;  %v4514_v10 = vld [vmem:[#allocation22_spill] sm:$0xff]  ;;  %v3155_v42 = vadd.f32 %v3107_v50, %v2898_v61  ;;  %v3159_v31 = vadd.f32 %v3107_v50, %v2902_v58 }
 0x22e   :  { %v3143_v39 = vmul.f32 %v2883_v6, %v4514_v10  ;;  %v3163_v6 = vadd.f32 %v3107_v50, %v2906_v1  ;;  %v3175_v61 = vadd.f32 %v3107_v50, %v2918_v22  ;;  %v3179_v58 = vadd.f32 %v3107_v50, %v2922_v35 }
 0x22f   :  { %v3183_v1 = vadd.f32 %v3107_v50, %v2926_v41  ;;  %v3187_v34 = vadd.f32 %v3107_v50, %v2930_v40  ;;  %v3191_v8 = vadd.f32 %v3107_v50, %v2934_v38  ;;  %v3195_v22 = vadd.f32 %v3107_v50, %v2938_v59 }
 0x230   :  { %v3199_v35 = vadd.f32 %v3107_v50, %v2942_v48  ;;  %v3203_v41 = vadd.f32 %v3107_v50, %v2946_v55  ;;  %v3207_v40 = vadd.f32 %v3107_v50, %v2950_v2  ;;  %v3211_v38 = vadd.f32 %v3107_v50, %v2954_v9 }
 0x231   :  { %v3215_v59 = vadd.f32 %v3107_v50, %v2958_v62  ;;  %v3219_v48 = vadd.f32 %v3107_v50, %v2962_v5  ;;  %v3223_v55 = vadd.f32 %v3107_v50, %v2966_v16  ;;  %v3227_v2 = vadd.f32 %v3107_v50, %v2970_v23  ;;  %v4521_v10 = vld [vmem:[#allocation3_spill] sm:$0xff] }
 0x232   :  { %v3231_v9 = vadd.f32 %v3107_v50, %v2974_v12  ;;  %v3235_v62 = vadd.f32 %v3107_v50, %v2978_v19  ;;  %v3239_v5 = vadd.f32 %v3107_v50, %v2982_v30  ;;  %v3243_v16 = vadd.f32 %v3107_v50, %v2986_v37 }
 0x233   :  { %v3247_v23 = vadd.f32 %v3107_v50, %v2990_v26  ;;  %v3251_v12 = vadd.f32 %v3107_v50, %v2994_v33  ;;  %v3255_v19 = vadd.f32 %v3107_v50, %v2998_v51  ;;  %v3259_v30 = vadd.f32 %v3107_v50, %v3002_v0 }
 0x234   :  { %v3263_v37 = vadd.f32 %v3107_v50, %v3006_v45  ;;  %v3267_v26 = vadd.f32 %v3107_v50, %v3010_v57  ;;  %v3271_v33 = vadd.f32 %v3107_v50, %v3014_v11  ;;  %v3275_v51 = vadd.f32 %v3107_v50, %v3018_v24 }
 0x235   :  { %v3279_v0 = vadd.f32 %v3107_v50, %v3022_v4  ;;  %v3283_v45 = vadd.f32 %v3107_v50, %v3026_v17  ;;  %v3287_v57 = vadd.f32 %v3107_v50, %v3030_v36  ;;  %v3291_v11 = vadd.f32 %v3107_v50, %v3034_v60 }
 0x236   :  { %v3295_v24 = vadd.f32 %v3107_v50, %v3038_v29  ;;  %v3299_v4 = vadd.f32 %v3107_v50, %v3042_v47  ;;  %v3303_v17 = vadd.f32 %v3107_v50, %v3046_v49  ;;  %v3307_v36 = vadd.f32 %v3107_v50, %v3050_v63 }
 0x237   :  { %v3311_v60 = vadd.f32 %v3107_v50, %v3054_v43  ;;  %v3315_v29 = vadd.f32 %v3107_v50, %v3058_v56  ;;  %v3319_v47 = vadd.f32 %v3107_v50, %v3062_v13  ;;  %v3323_v49 = vadd.f32 %v3107_v50, %v3066_v27 }
 0x238   :  { %v3327_v63 = vadd.f32 %v3107_v50, %v3070_v18  ;;  %v3331_v43 = vadd.f32 %v3107_v50, %v3074_v20  ;;  %v3335_v56 = vadd.f32 %v3107_v50, %v3078_v25  ;;  %v3339_v13 = vadd.f32 %v3107_v50, %v3082_v7 }
 0x239   :  { %4515 = vst [vmem:[#allocation7_spill] sm:$0xff] %v3311_v60  ;;  %v3343_v27 = vadd.f32 %v3107_v50, %v3086_v3  ;;  %v3347_v18 = vadd.f32 %v3107_v50, %v3090_v15  ;;  %v3351_v20 = vadd.f32 %v3107_v50, %v4521_v10  ;;  %vm1169_vm1 = vcmp.ge.f32.partialorder %v3147_v32, 0.0 }
 0x23a   :  { %4516 = vst [vmem:[#allocation19_spill] sm:$0xff] %v3331_v43  ;;  %4517 = vst [vmem:[#allocation6_spill] sm:$0xff] %v3335_v56  ;;  %v4523_v43 = vld [vmem:[#allocation2_spill] sm:$0xff]  ;;  %v4525_v56 = vld [vmem:[#allocation5_spill] sm:$0xff]  ;;  %vm1170_vm2 = vcmp.ge.f32.partialorder %v3151_v44, 0.0  ;;  %vm1171_vm3 = vcmp.ge.f32.partialorder %v3155_v42, 0.0 }
 0x23b   :  { %4518 = vst [vmem:[#allocation20_spill] sm:$0xff] %v3339_v13  ;;  %4519 = vst [vmem:[#allocation9_spill] sm:$0xff] %v3343_v27  ;;  %v3355_v25 = vadd.f32 %v3107_v50, %v4523_v43  ;;  %v3359_v7 = vadd.f32 %v3107_v50, %v4525_v56  ;;  %v4527_v13 = vld [vmem:[#allocation17_spill] sm:$0xff]  ;;  %v4529_v27 = vld [vmem:[#allocation4_spill] sm:$0xff]  ;;  %v3375_v43 = vadd.f32 %v3107_v50, %v3123_v14  ;;  %vm1172_vm4 = vcmp.ge.f32.partialorder %v3159_v31, 0.0 }
 0x23c   :  { %4520 = vst [vmem:[#allocation21_spill] sm:$0xff] %v3347_v18  ;;  %4522 = vst [vmem:[#allocation8_spill] sm:$0xff] %v3351_v20  ;;  %v3363_v3 = vadd.f32 %v3107_v50, %v4527_v13  ;;  %v3367_v15 = vadd.f32 %v3107_v50, %v4529_v27  ;;  %v4531_v18 = vld [vmem:[#allocation18_spill] sm:$0xff]  ;;  %v3383_v13 = vadd.f32 %v3107_v50, %v3127_v21  ;;  %vm1173_vm5 = vcmp.ge.f32.partialorder %v3163_v6, 0.0 }
 0x23d   :  { %4524 = vst [vmem:[#allocation10_spill] sm:$0xff] %v3355_v25  ;;  %4526 = vst [vmem:[#allocation12_spill] sm:$0xff] %v3359_v7  ;;  %v3371_v10 = vadd.f32 %v3107_v50, %v4531_v18  ;;  %v4534_v25 = vld [vmem:[#allocation23_spill] sm:$0xff]  ;;  %v3387_v27 = vadd.f32 %v3107_v50, %v3131_v28  ;;  %v3391_v18 = vadd.f32 %v3107_v50, %v3135_v54  ;;  %vm1174_vm6 = vcmp.ge.f32.partialorder %v3167_v52, 0.0 }
 0x23e   :  { %4528 = vst [vmem:[#allocation14_spill] sm:$0xff] %v3363_v3  ;;  %4530 = vst [vmem:[#allocation11_spill] sm:$0xff] %v3367_v15  ;;  %v3379_v56 = vadd.f32 %v3107_v50, %v4534_v25  ;;  %vm1175_vm7 = vcmp.ge.f32.partialorder %v3171_v46, 0.0  ;;  %vm1176_vm8 = vcmp.ge.f32.partialorder %v3175_v61, 0.0  ;;  %vm1177_vm9 = vcmp.ge.f32.partialorder %v3179_v58, 0.0 }
 0x23f   :  { %4532 = vst [vmem:[#allocation13_spill] sm:$0xff] %v3371_v10  ;;  %4533 = vst [vmem:[#allocation15_spill] sm:$0xff] %v3375_v43  ;;  %v3404_v21 = vadd.f32 %v3107_v50, %v3139_v53  ;;  %vm1178_vm10 = vcmp.ge.f32.partialorder %v3183_v1, 0.0  ;;  %v1233_v14 = vmul.f32 0.2, %v3147_v32  ;;  %v3412_v25 = vadd.f32 %v3107_v50, %v3143_v39 }
 0x240   :  { %4535 = vst [vmem:[#allocation16_spill] sm:$0xff] %v3379_v56  ;;  %4536 = vst [vmem:[#allocation22_spill] sm:$0xff] %v3383_v13  ;;  %v1234_v28 = vmul.f32 0.2, %v3151_v44  ;;  %v1235_v54 = vmul.f32 0.2, %v3155_v42 }
 0x241   :  { %4537 = vst [vmem:[#allocation3_spill] sm:$0xff] %v3387_v27  ;;  %4538 = vst [vmem:[#allocation2_spill] sm:$0xff] %v3391_v18  ;;  %vm1179_vm11 = vcmp.ge.f32.partialorder %v3187_v34, 0.0  ;;  %v1236_v18 = vmul.f32 0.2, %v3159_v31  ;;  %vm1180_vm12 = vcmp.ge.f32.partialorder %v3191_v8, 0.0  ;;  %v3425_v50 = vsel %vm1169_vm1, %v3147_v32, %v1233_v14 }
 0x242   :  { %4539 = vst [vmem:[#allocation5_spill] sm:$0xff] %v3404_v21  ;;  %4540 = vst [vmem:[#allocation17_spill] sm:$0xff] %v3412_v25  ;;  %v1237_v27 = vmul.f32 0.2, %v3163_v6  ;;  %v1238_v53 = vmul.f32 0.2, %v3167_v52  ;;  %v3436_v10 = vsel %vm1170_vm2, %v3151_v44, %v1234_v28 }
 0x243   :  { %v1239_v21 = vmul.f32 0.2, %v3171_v46  ;;  %v1240_v13 = vmul.f32 0.2, %v3175_v61  ;;  %v1241_v56 = vmul.f32 0.2, %v3179_v58  ;;  %v3466_v3 = vsel %vm1172_vm4, %v3159_v31, %v1236_v18 }
 0x244   :  { %4541 = vst [vmem:[#allocation4_spill] sm:$0xff] %v3425_v50  ;;  %vm1181_vm13 = vcmp.ge.f32.partialorder %v3195_v22, 0.0  ;;  %v1242_v39 = vmul.f32 0.2, %v3183_v1  ;;  %v1243_v25 = vmul.f32 0.2, %v3187_v34  ;;  %v3451_v50 = vsel %vm1171_vm3, %v3155_v42, %v1235_v54 }
 0x245   :  { %v3431_v43 = vmul.f32 0.2, %v3191_v8  ;;  %4542 = vst [vmem:[#allocation18_spill] sm:$0xff] %v3436_v10  ;;  %vm1182_vm14 = vcmp.ge.f32.partialorder %v3199_v35, 0.0  ;;  %v3440_v15 = vmul.f32 0.2, %v3195_v22 }
 0x246   :  { %v3443_v32 = vmul.f32 0.2, %v3199_v35  ;;  %v3446_v14 = vmul.f32 0.2, %v3203_v41  ;;  %4543 = vst [vmem:[#allocation23_spill] sm:$0xff] %v3451_v50  ;;  %vm1183_vm15 = vcmp.ge.f32.partialorder %v3203_v41, 0.0 }
 0x247   :  { %v3455_v44 = vmul.f32 0.2, %v3207_v40  ;;  %v3458_v28 = vmul.f32 0.2, %v3211_v38  ;;  %v3461_v10 = vmul.f32 0.2, %v3215_v59 }
 0x248   :  { %4545 = vst [vmem:[#allocation25_spill] sm:$0xff] %v3466_v3  ;;  %vm1184_vm0 = vcmp.ge.f32.partialorder %v3207_v40, 0.0  ;;  %v3470_v42 = vmul.f32 0.2, %v3219_v48  ;;  %v3473_v54 = vmul.f32 0.2, %v3223_v55 }
 0x249   :  { %4544 = vst [vmem:[#allocation24_spill] sm:$0xff] %v3461_v10  ;;  %v3476_v50 = vmul.f32 0.2, %v3227_v2  ;;  %v3481_v10 = vsel %vm1173_vm5, %v3163_v6, %v1237_v27  ;;  %vm1185_vm1 = vcmp.ge.f32.partialorder %v3211_v38, 0.0  ;;  %v3485_v31 = vmul.f32 0.2, %v3231_v9 }
 0x24a   :  { %4547 = vst [vmem:[#allocation27_spill] sm:$0xff] %v3481_v10  ;;  %v3488_v18 = vmul.f32 0.2, %v3235_v62  ;;  %v3491_v3 = vmul.f32 0.2, %v3239_v5  ;;  %vm1186_vm2 = vcmp.ge.f32.partialorder %v3215_v59, 0.0 }
 0x24b   :  { %4546 = vst [vmem:[#allocation26_spill] sm:$0xff] %v3476_v50  ;;  %v3496_v50 = vsel %vm1174_vm6, %v3167_v52, %v1238_v53  ;;  %v3500_v6 = vmul.f32 0.2, %v3243_v16  ;;  %v3503_v27 = vmul.f32 0.2, %v3247_v23  ;;  %vm1187_vm3 = vcmp.ge.f32.partialorder %v3219_v48, 0.0 }
 0x24c   :  { %4548 = vst [vmem:[#allocation28_spill] sm:$0xff] %v3491_v3  ;;  %4549 = vst [vmem:[#allocation29_spill] sm:$0xff] %v3496_v50  ;;  %v3506_v10 = vmul.f32 0.2, %v3251_v12  ;;  %v3511_v3 = vsel %vm1175_vm7, %v3171_v46, %v1239_v21  ;;  %v3515_v52 = vmul.f32 0.2, %v3255_v19 }
 0x24d   :  { %4551 = vst [vmem:[#allocation31_spill] sm:$0xff] %v3511_v3  ;;  %v3518_v53 = vmul.f32 0.2, %v3259_v30  ;;  %v3521_v50 = vmul.f32 0.2, %v3263_v37  ;;  %vm1188_vm4 = vcmp.ge.f32.partialorder %v3223_v55, 0.0 }
 0x24e   :  { %4550 = vst [vmem:[#allocation30_spill] sm:$0xff] %v3506_v10  ;;  %v3526_v10 = vsel %vm1176_vm8, %v3175_v61, %v1240_v13  ;;  %v3532_v46 = vmul.f32 0.2, %v3267_v26  ;;  %v3535_v21 = vmul.f32 0.2, %v3271_v33  ;;  %v3543_v61 = vsel %vm1177_vm9, %v3179_v58, %v1241_v56 }
 0x24f   :  { %4552 = vst [vmem:[#allocation32_spill] sm:$0xff] %v3526_v10  ;;  %v3538_v3 = vmul.f32 0.2, %v3275_v51  ;;  %4554 = vst [vmem:[#allocation34_spill] sm:$0xff] %v3543_v61  ;;  %vm1191_vm7 = vcmp.ge.f32.partialorder %v3235_v62, 0.0  ;;  %v3561_v58 = vsel %vm1178_vm10, %v3183_v1, %v1242_v39  ;;  %vm1195_vm9 = vcmp.ge.f32.partialorder %v3251_v12, 0.0 }
 0x250   :  { %v3550_v13 = vmul.f32 0.2, %v3279_v0  ;;  %v3553_v10 = vmul.f32 0.2, %v3283_v45  ;;  %4556 = vst [vmem:[#allocation36_spill] sm:$0xff] %v3561_v58  ;;  %v3579_v1 = vsel %vm1179_vm11, %v3187_v34, %v1243_v25  ;;  %vm1199_vm10 = vcmp.ge.f32.partialorder %v3267_v26, 0.0 }
 0x251   :  { %4553 = vst [vmem:[#allocation33_spill] sm:$0xff] %v3538_v3  ;;  %v3556_v3 = vmul.f32 0.2, %v3287_v57  ;;  %v3568_v56 = vmul.f32 0.2, %v3291_v11  ;;  %4558 = vst [vmem:[#allocation38_spill] sm:$0xff] %v3579_v1  ;;  %v3598_v34 = vsel %vm1180_vm12, %v3191_v8, %v3431_v43  ;;  %v3617_v8 = vsel %vm1181_vm13, %v3195_v22, %v3440_v15 }
 0x252   :  { %v3571_v61 = vmul.f32 0.2, %v3295_v24  ;;  %v3586_v39 = vmul.f32 0.2, %v3303_v17  ;;  %v3589_v58 = vmul.f32 0.2, %v3307_v36  ;;  %v3636_v22 = vsel %vm1182_vm14, %v3199_v35, %v3443_v32 }
 0x253   :  { %4555 = vst [vmem:[#allocation35_spill] sm:$0xff] %v3556_v3  ;;  %v3574_v3 = vmul.f32 0.2, %v3299_v4  ;;  %4560 = vst [vmem:[#allocation40_spill] sm:$0xff] %v3598_v34  ;;  %vm1203_vm11 = vcmp.ge.f32.partialorder %v3283_v45, 0.0  ;;  %vm1207_vm12 = vcmp.ge.f32.partialorder %v3299_v4, 0.0  ;;  %v3655_v35 = vsel %vm1183_vm15, %v3203_v41, %v3446_v14 }
 0x254   :  { %v3605_v25 = vmul.f32 0.2, %v3315_v29  ;;  %v3608_v1 = vmul.f32 0.2, %v3319_v47  ;;  %4564 = vst [vmem:[#allocation44_spill] sm:$0xff] %v3617_v8  ;;  %v4566_v34 = vld [vmem:[#allocation19_spill] sm:$0xff]  ;;  %v3674_v41 = vsel %vm1184_vm0, %v3207_v40, %v3455_v44  ;;  %v3687_v40 = vsel %vm1185_vm1, %v3211_v38, %v3458_v28 }
 0x255   :  { %4557 = vst [vmem:[#allocation37_spill] sm:$0xff] %v3574_v3  ;;  %v3592_v3 = vmul.f32 0.2, %v3311_v60  ;;  %v3624_v43 = vmul.f32 0.2, %v3327_v63  ;;  %4570 = vst [vmem:[#allocation46_spill] sm:$0xff] %v3636_v22 }
 0x256   :  { %4561 = vst [vmem:[#allocation41_spill] sm:$0xff] %v3605_v25  ;;  %4562 = vst [vmem:[#allocation42_spill] sm:$0xff] %v3608_v1  ;;  %v3627_v1 = vmul.f32 0.2, %v4566_v34  ;;  %vm1211_vm13 = vcmp.ge.f32.partialorder %v3315_v29, 0.0  ;;  %v4571_v15 = vld [vmem:[#allocation20_spill] sm:$0xff] }
 0x257   :  { %4559 = vst [vmem:[#allocation39_spill] sm:$0xff] %v3592_v3  ;;  %v3611_v3 = vmul.f32 0.2, %v3323_v49  ;;  %4565 = vst [vmem:[#allocation45_spill] sm:$0xff] %v3624_v43  ;;  %v3643_v8 = vmul.f32 0.2, %v4571_v15 }
 0x258   :  { %4567 = vst [vmem:[#allocation19_spill] sm:$0xff] %v3627_v1  ;;  %v4572_v1 = vld [vmem:[#allocation9_spill] sm:$0xff]  ;;  %4576 = vst [vmem:[#allocation49_spill] sm:$0xff] %v3655_v35  ;;  %vm1215_vm14 = vcmp.ge.f32.partialorder %v4566_v34, 0.0  ;;  %v3662_v32 = vmul.f32 0.2, %v3351_v20 }
 0x259   :  { %4563 = vst [vmem:[#allocation43_spill] sm:$0xff] %v3611_v3  ;;  %v4568_v3 = vld [vmem:[#allocation6_spill] sm:$0xff]  ;;  %v3646_v43 = vmul.f32 0.2, %v4572_v1  ;;  %4581 = vst [vmem:[#allocation53_spill] sm:$0xff] %v3674_v41  ;;  %v4584_v1 = vld [vmem:[#allocation13_spill] sm:$0xff] }
 0x25a   :  { %v3630_v25 = vmul.f32 0.2, %v4568_v3  ;;  %4577 = vst [vmem:[#allocation50_spill] sm:$0xff] %v3662_v32  ;;  %v4578_v22 = vld [vmem:[#allocation10_spill] sm:$0xff]  ;;  %4585 = vst [vmem:[#allocation54_spill] sm:$0xff] %v3687_v40  ;;  %v4586_v44 = vld [vmem:[#allocation15_spill] sm:$0xff] }
 0x25b   :  { %4573 = vst [vmem:[#allocation47_spill] sm:$0xff] %v3646_v43  ;;  %v3665_v43 = vmul.f32 0.2, %v4578_v22  ;;  %v4582_v14 = vld [vmem:[#allocation14_spill] sm:$0xff]  ;;  %v1290_v41 = vmul.f32 0.2, %v4586_v44 }
 0x25c   :  { %4569 = vst [vmem:[#allocation6_spill] sm:$0xff] %v3630_v25  ;;  %v4574_v25 = vld [vmem:[#allocation21_spill] sm:$0xff]  ;;  %v1287_v35 = vmul.f32 0.2, %v4582_v14  ;;  %vm1223_vm0 = vcmp.ge.f32.partialorder %v4582_v14, 0.0  ;;  %v4588_v20 = vld [vmem:[#allocation22_spill] sm:$0xff] }
 0x25d   :  { %v3649_v60 = vmul.f32 0.2, %v4574_v25  ;;  %4579 = vst [vmem:[#allocation51_spill] sm:$0xff] %v3665_v43  ;;  %vm1219_vm15 = vcmp.ge.f32.partialorder %v4574_v25, 0.0  ;;  %v4583_v43 = vld [vmem:[#allocation11_spill] sm:$0xff]  ;;  %v4589_v15 = vld [vmem:[#allocation24_spill] sm:$0xff] }
 0x25e   :  { %v1288_v32 = vmul.f32 0.2, %v4583_v43  ;;  %v1292_v25 = vmul.f32 0.2, %v4588_v20  ;;  %v3700_v38 = vsel %vm1186_vm2, %v3215_v59, %v4589_v15  ;;  %v4591_v28 = vld [vmem:[#allocation3_spill] sm:$0xff]  ;;  %v4592_v40 = vld [vmem:[#allocation2_spill] sm:$0xff]  ;;  %v3713_v59 = vsel %vm1187_vm3, %v3219_v48, %v3470_v42 }
 0x25f   :  { %4575 = vst [vmem:[#allocation48_spill] sm:$0xff] %v3649_v60  ;;  %v3668_v60 = vmul.f32 0.2, %v3359_v7  ;;  %v4587_v7 = vld [vmem:[#allocation16_spill] sm:$0xff]  ;;  %vm1229_vm5 = vcmp.ge.f32.partialorder %v4591_v28, 0.0  ;;  %v4593_v43 = vld [vmem:[#allocation5_spill] sm:$0xff]  ;;  %v3740_v42 = vsel %vm1191_vm7, %v3235_v62, %v3488_v18 }
 0x260   :  { %v1291_v22 = vmul.f32 0.2, %v4587_v7  ;;  %4590 = vst [vmem:[#allocation16_spill] sm:$0xff] %v3700_v38  ;;  %vm1227_vm1 = vcmp.ge.f32.partialorder %v4587_v7, 0.0  ;;  %v1293_v44 = vmul.f32 0.2, %v4591_v28  ;;  %v3722_v28 = vsel %vm1188_vm4, %v3223_v55, %v3473_v54 }
 0x261   :  { %4580 = vst [vmem:[#allocation52_spill] sm:$0xff] %v3668_v60  ;;  %v1289_v60 = vmul.f32 0.2, %v4584_v1  ;;  %v1294_v1 = vmul.f32 0.2, %v4592_v40  ;;  %vm1231_vm2 = vcmp.ge.f32.partialorder %v4593_v43, 0.0 }
 0x262   :  { %v1295_v14 = vmul.f32 0.2, %v4593_v43  ;;  %v4594_v15 = vld [vmem:[#allocation17_spill] sm:$0xff]  ;;  %v4595_v40 = vld [vmem:[#allocation26_spill] sm:$0xff]  ;;  %vm4596_vm8 = vcmp.ge.f32.partialorder %v3227_v2, 0.0  ;;  %vm4597_vm3 = vcmp.ge.f32.partialorder %v3231_v9, 0.0 }
 0x263   :  { %vm1232_vm6 = vcmp.ge.f32.partialorder %v4594_v15, 0.0  ;;  %v1296_v38 = vmul.f32 0.2, %v4594_v15  ;;  %v3728_v20 = vsel %vm4596_vm8, %v3227_v2, %v4595_v40  ;;  %v3734_v48 = vsel %vm4597_vm3, %v3231_v9, %v3485_v31  ;;  %v4598_v55 = vld [vmem:[#allocation28_spill] sm:$0xff]  ;;  %v4602_v62 = vld [vmem:[#allocation30_spill] sm:$0xff] }
 0x264   :  { %vm4599_vm4 = vcmp.ge.f32.partialorder %v3239_v5, 0.0  ;;  %vm4600_vm8 = vcmp.ge.f32.partialorder %v3243_v16, 0.0  ;;  %vm4601_vm3 = vcmp.ge.f32.partialorder %v3247_v23, 0.0  ;;  %v3764_v31 = vsel %vm1195_vm9, %v3251_v12, %v4602_v62 }
 0x265   :  { %v3746_v54 = vsel %vm4599_vm4, %v3239_v5, %v4598_v55  ;;  %v3752_v2 = vsel %vm4600_vm8, %v3243_v16, %v3500_v6  ;;  %v3758_v9 = vsel %vm4601_vm3, %v3247_v23, %v3503_v27  ;;  %vm4603_vm7 = vcmp.ge.f32.partialorder %v3255_v19, 0.0  ;;  %v4618_v6 = vld [vmem:[#allocation7_spill] sm:$0xff]  ;;  %v4636_v55 = vld [vmem:[#allocation21_spill] sm:$0xff] }
 0x266   :  { %v3770_v5 = vsel %vm4603_vm7, %v3255_v19, %v3515_v52  ;;  %vm4604_vm4 = vcmp.ge.f32.partialorder %v3259_v30, 0.0  ;;  %vm4605_vm8 = vcmp.ge.f32.partialorder %v3263_v37, 0.0  ;;  %vm1617_vm9 = vcmask 125952  }
 0x267   :  { %v3776_v16 = vsel %vm4604_vm4, %v3259_v30, %v3518_v53  ;;  %v3782_v23 = vsel %vm4605_vm8, %v3263_v37, %v3521_v50  ;;  %v3788_v12 = vsel %vm1199_vm10, %v3267_v26, %v3532_v46  ;;  %vm4606_vm3 = vcmp.ge.f32.partialorder %v3271_v33, 0.0  ;;  %v4607_v30 = vld [vmem:[#allocation33_spill] sm:$0xff] }
 0x268   :  { %v3794_v19 = vsel %vm4606_vm3, %v3271_v33, %v3535_v21  ;;  %vm4608_vm7 = vcmp.ge.f32.partialorder %v3275_v51, 0.0  ;;  %vm4609_vm4 = vcmp.ge.f32.partialorder %v3279_v0, 0.0  ;;  %v3812_v26 = vsel %vm1203_vm11, %v3283_v45, %v3553_v10  ;;  %v4610_v33 = vld [vmem:[#allocation35_spill] sm:$0xff]  ;;  %v4614_v45 = vld [vmem:[#allocation37_spill] sm:$0xff] }
 0x269   :  { %v3800_v18 = vsel %vm4608_vm7, %v3275_v51, %v4607_v30  ;;  %v3806_v37 = vsel %vm4609_vm4, %v3279_v0, %v3550_v13  ;;  %vm4611_vm10 = vcmp.ge.f32.partialorder %v3287_v57, 0.0  ;;  %vm4612_vm8 = vcmp.ge.f32.partialorder %v3291_v11, 0.0  ;;  %v4625_v21 = vld [vmem:[#allocation45_spill] sm:$0xff]  ;;  %v4638_v30 = vld [vmem:[#allocation8_spill] sm:$0xff] }
 0x26a   :  { %v3818_v50 = vsel %vm4611_vm10, %v3287_v57, %v4610_v33  ;;  %v3824_v51 = vsel %vm4612_vm8, %v3291_v11, %v3568_v56  ;;  %vm4613_vm3 = vcmp.ge.f32.partialorder %v3295_v24, 0.0  ;;  %v3836_v10 = vsel %vm1207_vm12, %v3299_v4, %v4614_v45  ;;  %v4620_v4 = vld [vmem:[#allocation41_spill] sm:$0xff]  ;;  %v4641_v45 = vld [vmem:[#allocation10_spill] sm:$0xff] }
 0x26b   :  { %v3830_v0 = vsel %vm4613_vm3, %v3295_v24, %v3571_v61  ;;  %vm4615_vm11 = vcmp.ge.f32.partialorder %v3303_v17, 0.0  ;;  %vm4616_vm7 = vcmp.ge.f32.partialorder %v3307_v36, 0.0  ;;  %v4617_v24 = vld [vmem:[#allocation39_spill] sm:$0xff]  ;;  %vm4619_vm4 = vcmp.ge.f32.partialorder %v4618_v6, 0.0 }
 0x26c   :  { %v3842_v57 = vsel %vm4615_vm11, %v3303_v17, %v3586_v39  ;;  %v3848_v11 = vsel %vm4616_vm7, %v3307_v36, %v3589_v58  ;;  %v3854_v27 = vsel %vm4619_vm4, %v4618_v6, %v4617_v24  ;;  %v3860_v52 = vsel %vm1211_vm13, %v3315_v29, %v4620_v4  ;;  %v4621_v17 = vld [vmem:[#allocation42_spill] sm:$0xff]  ;;  %v4623_v36 = vld [vmem:[#allocation43_spill] sm:$0xff]  ;;  %v4633_v39 = vld [vmem:[#allocation9_spill] sm:$0xff] }
 0x26d   :  { %vm4622_vm12 = vcmp.ge.f32.partialorder %v3319_v47, 0.0  ;;  %vm4624_vm10 = vcmp.ge.f32.partialorder %v3323_v49, 0.0  ;;  %vm4626_vm8 = vcmp.ge.f32.partialorder %v3327_v63, 0.0  ;;  %v4627_v29 = vld [vmem:[#allocation19_spill] sm:$0xff]  ;;  %vm4629_vm13 = vcmp.ge.f32.partialorder %v4568_v3, 0.0  ;;  %v4643_v6 = vld [vmem:[#allocation52_spill] sm:$0xff] }
 0x26e   :  { %v3866_v53 = vsel %vm4622_vm12, %v3319_v47, %v4621_v17  ;;  %v3872_v46 = vsel %vm4624_vm10, %v3323_v49, %v4623_v36  ;;  %v3878_v61 = vsel %vm4626_vm8, %v3327_v63, %v4625_v21  ;;  %v3884_v13 = vsel %vm1215_vm14, %v4566_v34, %v4627_v29  ;;  %v4628_v47 = vld [vmem:[#allocation6_spill] sm:$0xff]  ;;  %v4630_v49 = vld [vmem:[#allocation20_spill] sm:$0xff]  ;;  %v4632_v63 = vld [vmem:[#allocation47_spill] sm:$0xff] }
 0x26f   :  { %v3890_v58 = vsel %vm4629_vm13, %v4568_v3, %v4628_v47  ;;  %vm4631_vm3 = vcmp.ge.f32.partialorder %v4630_v49, 0.0  ;;  %vm4634_vm11 = vcmp.ge.f32.partialorder %v4633_v39, 0.0  ;;  %v4635_v34 = vld [vmem:[#allocation48_spill] sm:$0xff]  ;;  %v4637_v3 = vld [vmem:[#allocation50_spill] sm:$0xff]  ;;  %vm4639_vm14 = vcmp.ge.f32.partialorder %v4638_v30, 0.0  ;;  %v4647_v29 = vld [vmem:[#allocation11_spill] sm:$0xff] }
 0x270   :  { %v3896_v56 = vsel %vm4631_vm3, %v4630_v49, %v3643_v8  ;;  %v3902_v40 = vsel %vm4634_vm11, %v4633_v39, %v4632_v63  ;;  %v3908_v62 = vsel %vm1219_vm15, %v4636_v55, %v4635_v34  ;;  %v3914_v33 = vsel %vm4639_vm14, %v4638_v30, %v4637_v3  ;;  %v4640_v8 = vld [vmem:[#allocation51_spill] sm:$0xff]  ;;  %v4644_v4 = vld [vmem:[#allocation12_spill] sm:$0xff]  ;;  %v4646_v36 = vld [vmem:[#allocation14_spill] sm:$0xff] }
 0x271   :  { %vm4642_vm7 = vcmp.ge.f32.partialorder %v4641_v45, 0.0  ;;  %vm4645_vm4 = vcmp.ge.f32.partialorder %v4644_v4, 0.0  ;;  %v3931_v21 = vsel %vm1223_vm0, %v4646_v36, %v1287_v35  ;;  %vm4648_vm15 = vcmp.ge.f32.partialorder %v4647_v29, 0.0  ;;  %v4649_v49 = vld [vmem:[#allocation13_spill] sm:$0xff]  ;;  %v4651_v39 = vld [vmem:[#allocation15_spill] sm:$0xff]  ;;  %v4653_v55 = vld [vmem:[#allocation22_spill] sm:$0xff] }
 0x272   :  { %v3920_v24 = vsel %vm4642_vm7, %v4641_v45, %v4640_v8  ;;  %v3926_v17 = vsel %vm4645_vm4, %v4644_v4, %v4643_v6  ;;  %v3936_v47 = vsel %vm4648_vm15, %v4647_v29, %v1288_v32  ;;  %vm4650_vm12 = vcmp.ge.f32.partialorder %v4649_v49, 0.0  ;;  %v4655_v3 = vld [vmem:[#allocation3_spill] sm:$0xff]  ;;  %v4656_v30 = vld [vmem:[#allocation2_spill] sm:$0xff]  ;;  %v4661_v4 = vld [vmem:[#allocation25_spill] sm:$0xff] }
 0x273   :  { %v3941_v63 = vsel %vm4650_vm12, %v4649_v49, %v1289_v60  ;;  %vm4652_vm10 = vcmp.ge.f32.partialorder %v4651_v39, 0.0  ;;  %v3951_v35 = vsel %vm1227_vm1, %v4587_v7, %v1291_v22  ;;  %vm4654_vm0 = vcmp.ge.f32.partialorder %v4653_v55, 0.0  ;;  %v4658_v22 = vld [vmem:[#allocation4_spill] sm:$0xff]  ;;  %v4660_v6 = vld [vmem:[#allocation23_spill] sm:$0xff] }
 0x274   :  { %v3946_v34 = vsel %vm4652_vm10, %v4651_v39, %v1290_v41  ;;  %v3956_v32 = vsel %vm4654_vm0, %v4653_v55, %v1292_v25  ;;  %v3961_v60 = vsel %vm1229_vm5, %v4655_v3, %v1293_v44  ;;  %vm4657_vm8 = vcmp.ge.f32.partialorder %v4656_v30, 0.0  ;;  %v4659_v44 = vld [vmem:[#allocation18_spill] sm:$0xff]  ;;  %v4662_v29 = vld [vmem:[#allocation27_spill] sm:$0xff]  ;;  %v4665_v39 = vld [vmem:[#allocation32_spill] sm:$0xff] }
 0x275   :  { %v3966_v41 = vsel %vm4657_vm8, %v4656_v30, %v1294_v1  ;;  %v3971_v7 = vsel %vm1231_vm2, %v4593_v43, %v1295_v14  ;;  %v3976_v25 = vsel %vm1232_vm6, %v4594_v15, %v1296_v38  ;;  %v1791_v8 = vpack.c.bf16 %v4658_v22, %v4658_v22  ;;  %v4663_v14 = vld [vmem:[#allocation29_spill] sm:$0xff]  ;;  %v4664_v38 = vld [vmem:[#allocation31_spill] sm:$0xff]  ;;  %v4666_v3 = vld [vmem:[#allocation34_spill] sm:$0xff] }
 0x276   :  { %v1792_v45 = vpack.c.bf16 %v4659_v44, %v4659_v44  ;;  %v1793_v1 = vpack.c.bf16 %v4660_v6, %v4660_v6  ;;  %v1794_v36 = vpack.c.bf16 %v4661_v4, %v4661_v4  ;;  %v1795_v43 = vpack.c.bf16 %v4662_v29, %v4662_v29  ;;  %v4667_v22 = vld [vmem:[#allocation36_spill] sm:$0xff]  ;;  %v4668_v6 = vld [vmem:[#allocation38_spill] sm:$0xff] }
 0x277   :  { %v1796_v49 = vpack.c.bf16 %v4663_v14, %v4663_v14  ;;  %v1797_v15 = vpack.c.bf16 %v4664_v38, %v4664_v38  ;;  %v1798_v55 = vpack.c.bf16 %v4665_v39, %v4665_v39  ;;  %v1799_v30 = vpack.c.bf16 %v4666_v3, %v4666_v3  ;;  %1618 = vst.msk [vmem:[%s4366_s4] sm:$0xf] %vm1617_vm9, %v1791_v8  ;;  %v4669_v29 = vld [vmem:[#allocation40_spill] sm:$0xff]  ;;  %v4671_v3 = vld [vmem:[#allocation46_spill] sm:$0xff]  ;;  %v4672_v8 = vld [vmem:[#allocation49_spill] sm:$0xff] }
 0x278   :  { %v1800_v44 = vpack.c.bf16 %v4667_v22, %v4667_v22  ;;  %1619 = vst.msk [vmem:[%s4366_s4 + $0x4] sm:$0xf] %vm1617_vm9, %v1792_v45  ;;  %v1801_v4 = vpack.c.bf16 %v4668_v6, %v4668_v6  ;;  %v1802_v14 = vpack.c.bf16 %v4669_v29, %v4669_v29  ;;  %v4670_v38 = vld [vmem:[#allocation44_spill] sm:$0xff]  ;;  %v1804_v22 = vpack.c.bf16 %v4671_v3, %v4671_v3  ;;  %v4673_v6 = vld [vmem:[#allocation53_spill] sm:$0xff]  ;;  %v4674_v29 = vld [vmem:[#allocation54_spill] sm:$0xff] }
 0x279   :  { %v1803_v39 = vpack.c.bf16 %v4670_v38, %v4670_v38  ;;  %1620 = vst.msk [vmem:[%s4366_s4 + $0x8] sm:$0xf] %vm1617_vm9, %v1793_v1  ;;  %1621 = vst.msk [vmem:[%s4366_s4 + $0xc] sm:$0xf] %vm1617_vm9, %v1794_v36  ;;  %v1805_v45 = vpack.c.bf16 %v4672_v8, %v4672_v8  ;;  %v1806_v1 = vpack.c.bf16 %v4673_v6, %v4673_v6  ;;  %v4675_v36 = vld [vmem:[#allocation16_spill] sm:$0xff] }
 0x27a   :  { %1622 = vst.msk [vmem:[%s4366_s4 + $0x10] sm:$0xf] %vm1617_vm9, %v1795_v43  ;;  %1623 = vst.msk [vmem:[%s4366_s4 + $0x14] sm:$0xf] %vm1617_vm9, %v1796_v49  ;;  %v1807_v38 = vpack.c.bf16 %v4674_v29, %v4674_v29  ;;  %v1808_v3 = vpack.c.bf16 %v4675_v36, %v4675_v36  ;;  %v1809_v43 = vpack.c.bf16 %v3713_v59, %v3713_v59 }
 0x27b   :  { %1624 = vst.msk [vmem:[%s4366_s4 + $0x18] sm:$0xf] %vm1617_vm9, %v1797_v15  ;;  %1625 = vst.msk [vmem:[%s4366_s4 + $0x1c] sm:$0xf] %vm1617_vm9, %v1798_v55  ;;  %v1810_v49 = vpack.c.bf16 %v3722_v28, %v3722_v28  ;;  %v1811_v15 = vpack.c.bf16 %v3728_v20, %v3728_v20  ;;  %v1812_v55 = vpack.c.bf16 %v3734_v48, %v3734_v48 }
 0x27c   :  { %1626 = vst.msk [vmem:[%s4366_s4 + $0x20] sm:$0xf] %vm1617_vm9, %v1799_v30  ;;  %1627 = vst.msk [vmem:[%s4366_s4 + $0x24] sm:$0xf] %vm1617_vm9, %v1800_v44  ;;  %v1813_v20 = vpack.c.bf16 %v3740_v42, %v3740_v42  ;;  %v1814_v28 = vpack.c.bf16 %v3746_v54, %v3746_v54  ;;  %v1815_v59 = vpack.c.bf16 %v3752_v2, %v3752_v2 }
 0x27d   :  { %1628 = vst.msk [vmem:[%s4366_s4 + $0x28] sm:$0xf] %vm1617_vm9, %v1801_v4  ;;  %1629 = vst.msk [vmem:[%s4366_s4 + $0x2c] sm:$0xf] %vm1617_vm9, %v1802_v14  ;;  %v1816_v48 = vpack.c.bf16 %v3758_v9, %v3758_v9  ;;  %v1817_v42 = vpack.c.bf16 %v3764_v31, %v3764_v31  ;;  %v1818_v54 = vpack.c.bf16 %v3770_v5, %v3770_v5 }
 0x27e   :  { %1630 = vst.msk [vmem:[%s4366_s4 + $0x30] sm:$0xf] %vm1617_vm9, %v1803_v39  ;;  %1631 = vst.msk [vmem:[%s4366_s4 + $0x34] sm:$0xf] %vm1617_vm9, %v1804_v22  ;;  %v1819_v2 = vpack.c.bf16 %v3776_v16, %v3776_v16  ;;  %v1820_v9 = vpack.c.bf16 %v3782_v23, %v3782_v23  ;;  %v1821_v31 = vpack.c.bf16 %v3788_v12, %v3788_v12 }
 0x27f   :  { %1632 = vst.msk [vmem:[%s4366_s4 + $0x38] sm:$0xf] %vm1617_vm9, %v1805_v45  ;;  %1633 = vst.msk [vmem:[%s4366_s4 + $0x3c] sm:$0xf] %vm1617_vm9, %v1806_v1  ;;  %v1822_v5 = vpack.c.bf16 %v3794_v19, %v3794_v19  ;;  %v1823_v16 = vpack.c.bf16 %v3800_v18, %v3800_v18  ;;  %v1824_v23 = vpack.c.bf16 %v3806_v37, %v3806_v37 }
 0x280   :  { %1634 = vst.msk [vmem:[%s4366_s4 + $0x40] sm:$0xf] %vm1617_vm9, %v1807_v38  ;;  %1635 = vst.msk [vmem:[%s4366_s4 + $0x44] sm:$0xf] %vm1617_vm9, %v1808_v3  ;;  %v1825_v12 = vpack.c.bf16 %v3812_v26, %v3812_v26  ;;  %v1826_v19 = vpack.c.bf16 %v3818_v50, %v3818_v50  ;;  %v1827_v18 = vpack.c.bf16 %v3824_v51, %v3824_v51 }
 0x281   :  { %1636 = vst.msk [vmem:[%s4366_s4 + $0x48] sm:$0xf] %vm1617_vm9, %v1809_v43  ;;  %1637 = vst.msk [vmem:[%s4366_s4 + $0x4c] sm:$0xf] %vm1617_vm9, %v1810_v49  ;;  %v1828_v37 = vpack.c.bf16 %v3830_v0, %v3830_v0  ;;  %v1829_v26 = vpack.c.bf16 %v3836_v10, %v3836_v10  ;;  %v1830_v50 = vpack.c.bf16 %v3842_v57, %v3842_v57 }
 0x282   :  { %1638 = vst.msk [vmem:[%s4366_s4 + $0x50] sm:$0xf] %vm1617_vm9, %v1811_v15  ;;  %1639 = vst.msk [vmem:[%s4366_s4 + $0x54] sm:$0xf] %vm1617_vm9, %v1812_v55  ;;  %v1831_v51 = vpack.c.bf16 %v3848_v11, %v3848_v11  ;;  %v1832_v0 = vpack.c.bf16 %v3854_v27, %v3854_v27  ;;  %v1833_v10 = vpack.c.bf16 %v3860_v52, %v3860_v52 }
 0x283   :  { %1640 = vst.msk [vmem:[%s4366_s4 + $0x58] sm:$0xf] %vm1617_vm9, %v1813_v20  ;;  %1641 = vst.msk [vmem:[%s4366_s4 + $0x5c] sm:$0xf] %vm1617_vm9, %v1814_v28  ;;  %v1834_v57 = vpack.c.bf16 %v3866_v53, %v3866_v53  ;;  %v1835_v11 = vpack.c.bf16 %v3872_v46, %v3872_v46  ;;  %v1836_v27 = vpack.c.bf16 %v3878_v61, %v3878_v61 }
 0x284   :  { %1642 = vst.msk [vmem:[%s4366_s4 + $0x60] sm:$0xf] %vm1617_vm9, %v1815_v59  ;;  %1643 = vst.msk [vmem:[%s4366_s4 + $0x64] sm:$0xf] %vm1617_vm9, %v1816_v48  ;;  %v1837_v52 = vpack.c.bf16 %v3884_v13, %v3884_v13  ;;  %v1838_v53 = vpack.c.bf16 %v3890_v58, %v3890_v58  ;;  %v1839_v46 = vpack.c.bf16 %v3896_v56, %v3896_v56 }
 0x285   :  { %1644 = vst.msk [vmem:[%s4366_s4 + $0x68] sm:$0xf] %vm1617_vm9, %v1817_v42  ;;  %1645 = vst.msk [vmem:[%s4366_s4 + $0x6c] sm:$0xf] %vm1617_vm9, %v1818_v54  ;;  %v1840_v61 = vpack.c.bf16 %v3902_v40, %v3902_v40  ;;  %v1841_v13 = vpack.c.bf16 %v3908_v62, %v3908_v62  ;;  %v1842_v58 = vpack.c.bf16 %v3914_v33, %v3914_v33 }
 0x286   :  { %1646 = vst.msk [vmem:[%s4366_s4 + $0x70] sm:$0xf] %vm1617_vm9, %v1819_v2  ;;  %1647 = vst.msk [vmem:[%s4366_s4 + $0x74] sm:$0xf] %vm1617_vm9, %v1820_v9  ;;  %v1843_v56 = vpack.c.bf16 %v3920_v24, %v3920_v24  ;;  %v1844_v40 = vpack.c.bf16 %v3926_v17, %v3926_v17  ;;  %v1845_v62 = vpack.c.bf16 %v3931_v21, %v3931_v21 }
 0x287   :  { %1648 = vst.msk [vmem:[%s4366_s4 + $0x78] sm:$0xf] %vm1617_vm9, %v1821_v31  ;;  %1649 = vst.msk [vmem:[%s4366_s4 + $0x7c] sm:$0xf] %vm1617_vm9, %v1822_v5  ;;  %v1846_v33 = vpack.c.bf16 %v3936_v47, %v3936_v47  ;;  %v1847_v24 = vpack.c.bf16 %v3941_v63, %v3941_v63  ;;  %v1848_v17 = vpack.c.bf16 %v3946_v34, %v3946_v34 }
 0x288   :  { %1650 = vst.msk [vmem:[%s4366_s4 + $0x80] sm:$0xf] %vm1617_vm9, %v1823_v16  ;;  %1651 = vst.msk [vmem:[%s4366_s4 + $0x84] sm:$0xf] %vm1617_vm9, %v1824_v23  ;;  %v1849_v21 = vpack.c.bf16 %v3951_v35, %v3951_v35  ;;  %v1850_v47 = vpack.c.bf16 %v3956_v32, %v3956_v32  ;;  %v1851_v63 = vpack.c.bf16 %v3961_v60, %v3961_v60 }
 0x289   :  { %1652 = vst.msk [vmem:[%s4366_s4 + $0x88] sm:$0xf] %vm1617_vm9, %v1825_v12  ;;  %1653 = vst.msk [vmem:[%s4366_s4 + $0x8c] sm:$0xf] %vm1617_vm9, %v1826_v19  ;;  %v1852_v34 = vpack.c.bf16 %v3966_v41, %v3966_v41  ;;  %v1853_v35 = vpack.c.bf16 %v3971_v7, %v3971_v7  ;;  %v1854_v32 = vpack.c.bf16 %v3976_v25, %v3976_v25 }
 0x28a   :  { %1654 = vst.msk [vmem:[%s4366_s4 + $0x90] sm:$0xf] %vm1617_vm9, %v1827_v18  ;;  %1655 = vst.msk [vmem:[%s4366_s4 + $0x94] sm:$0xf] %vm1617_vm9, %v1828_v37 }
 0x28b   :  { %1656 = vst.msk [vmem:[%s4366_s4 + $0x98] sm:$0xf] %vm1617_vm9, %v1829_v26  ;;  %1657 = vst.msk [vmem:[%s4366_s4 + $0x9c] sm:$0xf] %vm1617_vm9, %v1830_v50 }
 0x28c   :  { %1658 = vst.msk [vmem:[%s4366_s4 + $0xa0] sm:$0xf] %vm1617_vm9, %v1831_v51  ;;  %1659 = vst.msk [vmem:[%s4366_s4 + $0xa4] sm:$0xf] %vm1617_vm9, %v1832_v0 }
 0x28d   :  { %1660 = vst.msk [vmem:[%s4366_s4 + $0xa8] sm:$0xf] %vm1617_vm9, %v1833_v10  ;;  %1661 = vst.msk [vmem:[%s4366_s4 + $0xac] sm:$0xf] %vm1617_vm9, %v1834_v57 }
 0x28e   :  { %1662 = vst.msk [vmem:[%s4366_s4 + $0xb0] sm:$0xf] %vm1617_vm9, %v1835_v11  ;;  %1663 = vst.msk [vmem:[%s4366_s4 + $0xb4] sm:$0xf] %vm1617_vm9, %v1836_v27 }
 0x28f   :  { %1664 = vst.msk [vmem:[%s4366_s4 + $0xb8] sm:$0xf] %vm1617_vm9, %v1837_v52  ;;  %1665 = vst.msk [vmem:[%s4366_s4 + $0xbc] sm:$0xf] %vm1617_vm9, %v1838_v53 }
 0x290   :  { %1666 = vst.msk [vmem:[%s4366_s4 + $0xc0] sm:$0xf] %vm1617_vm9, %v1839_v46  ;;  %1667 = vst.msk [vmem:[%s4366_s4 + $0xc4] sm:$0xf] %vm1617_vm9, %v1840_v61 }
 0x291   :  { %1668 = vst.msk [vmem:[%s4366_s4 + $0xc8] sm:$0xf] %vm1617_vm9, %v1841_v13  ;;  %1669 = vst.msk [vmem:[%s4366_s4 + $0xcc] sm:$0xf] %vm1617_vm9, %v1842_v58 }
 0x292   :  { %1670 = vst.msk [vmem:[%s4366_s4 + $0xd0] sm:$0xf] %vm1617_vm9, %v1843_v56  ;;  %1671 = vst.msk [vmem:[%s4366_s4 + $0xd4] sm:$0xf] %vm1617_vm9, %v1844_v40 }
 0x293   :  { %1672 = vst.msk [vmem:[%s4366_s4 + $0xd8] sm:$0xf] %vm1617_vm9, %v1845_v62  ;;  %1673 = vst.msk [vmem:[%s4366_s4 + $0xdc] sm:$0xf] %vm1617_vm9, %v1846_v33 }
 0x294   :  { %1674 = vst.msk [vmem:[%s4366_s4 + $0xe0] sm:$0xf] %vm1617_vm9, %v1847_v24  ;;  %1675 = vst.msk [vmem:[%s4366_s4 + $0xe4] sm:$0xf] %vm1617_vm9, %v1848_v17 }
 0x295   :  { %1676 = vst.msk [vmem:[%s4366_s4 + $0xe8] sm:$0xf] %vm1617_vm9, %v1849_v21  ;;  %1677 = vst.msk [vmem:[%s4366_s4 + $0xec] sm:$0xf] %vm1617_vm9, %v1850_v47 }
 0x296   :  { %1678 = vst.msk [vmem:[%s4366_s4 + $0xf0] sm:$0xf] %vm1617_vm9, %v1851_v63  ;;  %1679 = vst.msk [vmem:[%s4366_s4 + $0xf4] sm:$0xf] %vm1617_vm9, %v1852_v34 }
 0x297   :  { %1680 = vst.msk [vmem:[%s4366_s4 + $0xf8] sm:$0xf] %vm1617_vm9, %v1853_v35  ;;  %1681 = vst.msk [vmem:[%s4366_s4 + $0xfc] sm:$0xf] %vm1617_vm9, %v1854_v32 }

// kernel: unet_encoder.6
= control target key start
LH: loop header
LB: loop body
LE: loop exit
PB: predicated region body
PF: predicated region fallthrough
CT: control target
= control target key end

     0   :  { %vm339_vm0 = vcmask 261120   ;;  %s1131_s1 = inlined_call_operand.vmem [shape: bf16[256,32], index: 1, kind: input, shape index: {}]   ;;  %s1132_s0 = inlined_call_operand.vmem [shape: bf16[128,256], index: 0, kind: input, shape index: {}]   ;;  %s1133_s2 = inlined_call_operand.vmem [shape: f32[1,32], index: 2, kind: input, shape index: {}]   ;;  %s1134_s3 = inlined_call_operand.vmem [shape: f32[1,32], index: 3, kind: input, shape index: {}]   ;;  %s1135_s4 = inlined_call_operand.vmem [shape: bf16[128,32], index: 4, kind: output, shape index: {}]  }
   0x1   :  { %v775_v0 = vld [vmem:[%s1131_s1 + $0x78] sm:$0xff]   ;;  %v777_v2 = vld [vmem:[%s1131_s1 + $0x70] sm:$0xff]   ;;  %v779_v4 = vld [vmem:[%s1131_s1 + $0x68] sm:$0xff]  }
   0x2   :  { %v776_v1 = vld [vmem:[%s1131_s1 + $0x38] sm:$0xff]   ;;  %695 = vmatprep.subr.bf16.mxu0 %v775_v0  ;;  %759 = vmatprep.subr.bf16.mxu1 %v775_v0  ;;  %v778_v3 = vld [vmem:[%s1131_s1 + $0x30] sm:$0xff]   ;;  %v780_v5 = vld [vmem:[%s1131_s1 + $0x28] sm:$0xff]  }
   0x3   :  { %696 = vmatpush3.bf16.msra.mxu0 %v776_v1  ;;  %767 = vmatpush3.bf16.msra.mxu1 %v776_v1  ;;  %v781_v6 = vld [vmem:[%s1131_s1 + $0x60] sm:$0xff]   ;;  %v783_v8 = vld [vmem:[%s1131_s1 + $0x58] sm:$0xff]   ;;  %v785_v10 = vld [vmem:[%s1131_s1 + $0x50] sm:$0xff]  }
   0x4   :  { %697 = vmatprep.subr.bf16.mxu0 %v777_v2  ;;  %760 = vmatprep.subr.bf16.mxu1 %v777_v2  ;;  %v782_v7 = vld [vmem:[%s1131_s1 + $0x20] sm:$0xff]   ;;  %v784_v9 = vld [vmem:[%s1131_s1 + $0x18] sm:$0xff]   ;;  %v786_v12 = vld [vmem:[%s1131_s1 + $0x10] sm:$0xff]  }
   0x5   :  { %v793_v11 = vld [vmem:[%s1132_s0 + $0x4] ss:$8 sps:$4 sm:$0xff]   ;;  %v791_v18 = vld [vmem:[%s1132_s0] ss:$8 sps:$4 sm:$0xff]   ;;  %v794_v20 = vld [vmem:[%s1132_s0 + $0x14] ss:$8 sps:$4 sm:$0xff]  }
   0x6   :  { %v799_v13 = vld [vmem:[%s1132_s0 + $0x44] ss:$8 sps:$4 sm:$0xff]   ;;  %274 = vmatprep.mubr.bf16.mxu0 %v793_v11  ;;  %v797_v19 = vld [vmem:[%s1132_s0 + $0x40] ss:$8 sps:$4 sm:$0xff]   ;;  %v803_v21 = vld [vmem:[%s1132_s0 + $0x54] ss:$8 sps:$4 sm:$0xff]  }
   0x7   :  { %698 = vmatpush3.bf16.msra.mxu0 %v778_v3  ;;  %768 = vmatpush3.bf16.msra.mxu1 %v778_v3  ;;  %v787_v14 = vld [vmem:[%s1131_s1 + $0x48] sm:$0xff]   ;;  %v789_v16 = vld [vmem:[%s1131_s1 + $0x40] sm:$0xff]   ;;  %v796_v22 = vld [vmem:[%s1132_s0 + $0x10] ss:$8 sps:$4 sm:$0xff]  }
   0x8   :  { %699 = vmatprep.subr.bf16.mxu0 %v779_v4  ;;  %761 = vmatprep.subr.bf16.mxu1 %v779_v4  ;;  %v788_v15 = vld [vmem:[%s1131_s1 + $0x8] sm:$0xff]   ;;  %v790_v17 = vld [vmem:[%s1131_s1] sm:$0xff]   ;;  %v805_v23 = vld [vmem:[%s1132_s0 + $0x50] ss:$8 sps:$4 sm:$0xff]  }
   0x9   :  { %306 = vmatprep.mubr.bf16.mxu1 %v799_v13  ;;  %v800_v24 = vld [vmem:[%s1132_s0 + $0x24] ss:$8 sps:$4 sm:$0xff]   ;;  %v802_v26 = vld [vmem:[%s1132_s0 + $0x20] ss:$8 sps:$4 sm:$0xff]   ;;  %v806_v28 = vld [vmem:[%s1132_s0 + $0x34] ss:$8 sps:$4 sm:$0xff]  }
   0xa   :  { %v809_v25 = vld [vmem:[%s1132_s0 + $0x64] ss:$8 sps:$4 sm:$0xff]   ;;  %v811_v27 = vld [vmem:[%s1132_s0 + $0x60] ss:$8 sps:$4 sm:$0xff]   ;;  %v812_v29 = vld [vmem:[%s1132_s0 + $0x74] ss:$8 sps:$4 sm:$0xff]  }
   0xb   :  { %700 = vmatpush3.bf16.msra.mxu0 %v780_v5  ;;  %769 = vmatpush3.bf16.msra.mxu1 %v780_v5  ;;  %v808_v30 = vld [vmem:[%s1132_s0 + $0x30] ss:$8 sps:$4 sm:$0xff]  }
   0xc   :  { %701 = vmatprep.subr.bf16.mxu0 %v781_v6  ;;  %762 = vmatprep.subr.bf16.mxu1 %v781_v6  ;;  %v814_v31 = vld [vmem:[%s1132_s0 + $0x70] ss:$8 sps:$4 sm:$0xff]  }
   0xf   :  { %702 = vmatpush3.bf16.msra.mxu0 %v782_v7  ;;  %770 = vmatpush3.bf16.msra.mxu1 %v782_v7 }
  0x10   :  { %703 = vmatprep.subr.bf16.mxu0 %v783_v8  ;;  %763 = vmatprep.subr.bf16.mxu1 %v783_v8 }
  0x13   :  { %704 = vmatpush3.bf16.msra.mxu0 %v784_v9  ;;  %771 = vmatpush3.bf16.msra.mxu1 %v784_v9 }
  0x14   :  { %705 = vmatprep.subr.bf16.mxu0 %v785_v10  ;;  %764 = vmatprep.subr.bf16.mxu1 %v785_v10 }
  0x17   :  { %706 = vmatpush3.bf16.msra.mxu0 %v786_v12  ;;  %772 = vmatpush3.bf16.msra.mxu1 %v786_v12 }
  0x18   :  { %707 = vmatprep.subr.bf16.mxu0 %v787_v14  ;;  %765 = vmatprep.subr.bf16.mxu1 %v787_v14 }
  0x1b   :  { %708 = vmatpush3.bf16.msra.mxu0 %v788_v15  ;;  %773 = vmatpush3.bf16.msra.mxu1 %v788_v15 }
  0x1c   :  { %709 = vmatprep.subr.bf16.mxu0 %v789_v16  ;;  %766 = vmatprep.subr.bf16.mxu1 %v789_v16 }
  0x1f   :  { %710 = vmatpush3.bf16.msra.mxu0 %v790_v17  ;;  %774 = vmatpush3.bf16.msra.mxu1 %v790_v17 }
  0x22   :  { %275 = vmatmul.mubr.bf16.vlgmr.msra.gmra.mxu0 %v791_v18  ;;  %307 = vmatmul.mubr.bf16.vlgmr.msra.gmra.mxu1 %v797_v19 }
  0x23   :  { %282 = vmatprep.mubr.bf16.mxu0 %v794_v20  ;;  %314 = vmatprep.mubr.bf16.mxu1 %v803_v21 }
  0x2a   :  { %283 = vmatmul.mubr.bf16.gmra.mxu0 %v796_v22  ;;  %315 = vmatmul.mubr.bf16.gmra.mxu1 %v805_v23 }
  0x2b   :  { %290 = vmatprep.mubr.bf16.mxu0 %v800_v24  ;;  %322 = vmatprep.mubr.bf16.mxu1 %v809_v25 }
  0x32   :  { %291 = vmatmul.mubr.bf16.gmra.mxu0 %v802_v26  ;;  %323 = vmatmul.mubr.bf16.gmra.mxu1 %v811_v27 }
  0x33   :  { %298 = vmatprep.mubr.bf16.mxu0 %v806_v28  ;;  %330 = vmatprep.mubr.bf16.mxu1 %v812_v29 }
  0x3a   :  { %299 = vmatmul.mubr.bf16.gmra.mxu0 %v808_v30  ;;  %331 = vmatmul.mubr.bf16.gmra.mxu1 %v814_v31 }
  0xe2   :  { %v711_v32 = vpop.f32.mrf.mxu0  ;;  %v735_v33 = vpop.f32.mrf.mxu1 }
  0xe4   :  { %v712_v34 = vpop.f32.mrf.mxu0  ;;  %v736_v35 = vpop.f32.mrf.mxu1 }
  0xe5   :  { %v940_v51 = vadd.f32 %v712_v34, %v711_v32  ;;  %v737_v16 = vadd.f32 %v736_v35, %v735_v33 }
  0xe6   :  { %v714_v36 = vpop.f32.mrf.mxu0  ;;  %v738_v37 = vpop.f32.mrf.mxu1 }
  0xe7   :  { %v340_v58 = vsel %vm339_vm0, %v940_v51, 0.0  ;;  %v355_v23 = vsel %vm339_vm0, %v737_v16, 0.0 }
  0xe8   :  { %v715_v38 = vpop.f32.mrf.mxu0  ;;  %v739_v39 = vpop.f32.mrf.mxu1 }
  0xe9   :  { %v938_v48 = vadd.f32 %v715_v38, %v714_v36  ;;  %v740_v19 = vadd.f32 %v739_v39, %v738_v37 }
  0xea   :  { %v717_v40 = vpop.f32.mrf.mxu0  ;;  %v741_v41 = vpop.f32.mrf.mxu1 }
  0xeb   :  { %v341_v55 = vsel %vm339_vm0, %v938_v48, 0.0  ;;  %v357_v26 = vsel %vm339_vm0, %v740_v19, 0.0 }
  0xec   :  { %v718_v42 = vpop.f32.mrf.mxu0  ;;  %v742_v43 = vpop.f32.mrf.mxu1  ;;  %v342_v61 = vadd.f32 %v341_v55, %v340_v58 }
  0xed   :  { %v942_v52 = vadd.f32 %v718_v42, %v717_v40  ;;  %v743_v24 = vadd.f32 %v742_v43, %v741_v41 }
  0xee   :  { %v720_v44 = vpop.f32.mrf.mxu0  ;;  %v744_v45 = vpop.f32.mrf.mxu1 }
  0xef   :  { %v343_v59 = vsel %vm339_vm0, %v942_v52, 0.0  ;;  %v359_v30 = vsel %vm339_vm0, %v743_v24, 0.0 }
  0xf0   :  { %v721_v46 = vpop.f32.mrf.mxu0  ;;  %v745_v47 = vpop.f32.mrf.mxu1  ;;  %v344_v2 = vadd.f32 %v343_v59, %v342_v61 }
  0xf1   :  { %v946_v56 = vadd.f32 %v721_v46, %v720_v44  ;;  %v746_v27 = vadd.f32 %v745_v47, %v744_v45 }
  0xf2   :  { %v723_v49 = vpop.f32.mrf.mxu0  ;;  %v747_v50 = vpop.f32.mrf.mxu1 }
  0xf3   :  { %v345_v0 = vsel %vm339_vm0, %v946_v56, 0.0  ;;  %v361_v33 = vsel %vm339_vm0, %v746_v27, 0.0 }
  0xf4   :  { %v724_v53 = vpop.f32.mrf.mxu0  ;;  %v748_v54 = vpop.f32.mrf.mxu1  ;;  %v346_v5 = vadd.f32 %v345_v0, %v344_v2 }
  0xf5   :  { %v952_v60 = vadd.f32 %v724_v53, %v723_v49  ;;  %v749_v31 = vadd.f32 %v748_v54, %v747_v50 }
  0xf6   :  { %v726_v57 = vpop.f32.mrf.mxu0  ;;  %v750_v63 = vpop.f32.mrf.mxu1 }
  0xf7   :  { %v347_v4 = vsel %vm339_vm0, %v952_v60, 0.0  ;;  %v363_v37 = vsel %vm339_vm0, %v749_v31, 0.0 }
  0xf8   :  { %v727_v62 = vpop.f32.mrf.mxu0  ;;  %v751_v7 = vpop.f32.mrf.mxu1  ;;  %v348_v10 = vadd.f32 %v347_v4, %v346_v5 }
  0xf9   :  { %v728_v1 = vadd.f32 %v727_v62, %v726_v57  ;;  %v752_v34 = vadd.f32 %v751_v7, %v750_v63 }
  0xfa   :  { %v729_v3 = vpop.f32.mrf.mxu0  ;;  %v753_v15 = vpop.f32.mrf.mxu1 }
  0xfb   :  { %v349_v8 = vsel %vm339_vm0, %v728_v1, 0.0  ;;  %v365_v40 = vsel %vm339_vm0, %v752_v34, 0.0 }
  0xfc   :  { %v730_v6 = vpop.f32.mrf.mxu0  ;;  %v350_v13 = vadd.f32 %v349_v8, %v348_v10  ;;  %v754_v22 = vpop.f32.mrf.mxu1 }
  0xfd   :  { %v731_v9 = vadd.f32 %v730_v6, %v729_v3  ;;  %v755_v38 = vadd.f32 %v754_v22, %v753_v15 }
  0xfe   :  { %v732_v11 = vpop.f32.mrf.mxu0  ;;  %v756_v29 = vpop.f32.mrf.mxu1 }
  0xff   :  { %v351_v12 = vsel %vm339_vm0, %v731_v9, 0.0  ;;  %v367_v43 = vsel %vm339_vm0, %v755_v38, 0.0 }
 0x100   :  { %v733_v14 = vpop.f32.mrf.mxu0  ;;  %v352_v18 = vadd.f32 %v351_v12, %v350_v13  ;;  %v757_v36 = vpop.f32.mrf.mxu1 }
 0x101   :  { %v734_v17 = vadd.f32 %v733_v14, %v732_v11  ;;  %v758_v41 = vadd.f32 %v757_v36, %v756_v29 }
 0x103   :  { %v353_v20 = vsel %vm339_vm0, %v734_v17, 0.0  ;;  %v369_v45 = vsel %vm339_vm0, %v758_v41, 0.0 }
 0x104   :  { %v354_v21 = vadd.f32 %v353_v20, %v352_v18 }
 0x106   :  { %v356_v25 = vadd.f32 %v355_v23, %v354_v21 }
 0x108   :  { %v358_v28 = vadd.f32 %v357_v26, %v356_v25 }
 0x10a   :  { %v360_v32 = vadd.f32 %v359_v30, %v358_v28 }
 0x10c   :  { %v362_v35 = vadd.f32 %v361_v33, %v360_v32 }
 0x10e   :  { %v364_v39 = vadd.f32 %v363_v37, %v362_v35 }
 0x110   :  { %v366_v42 = vadd.f32 %v365_v40, %v364_v39 }
 0x112   :  { %v368_v44 = vadd.f32 %v367_v43, %v366_v42 }
 0x114   :  { %v370_v46 = vadd.f32 %v369_v45, %v368_v44 }
 0x116   :  { %v371_v47 = vrot.slane %v370_v46, 4 }
 0x118   :  { %v372_v49 = vadd.f32 %v371_v47, %v370_v46 }
 0x11a   :  { %v373_v50 = vrot.slane %v372_v49, 2 }
 0x11c   :  { %v374_v53 = vadd.f32 %v373_v50, %v372_v49 }
 0x11e   :  { %v375_v54 = vrot.slane %v374_v53, 1 }
 0x120   :  { %v376_v55 = vadd.f32 %v375_v54, %v374_v53 }
 0x122   :  { %v377_v57 = vmul.f32 0.0078125, %v376_v55 }
 0x124   :  { %v970_v58 = vsub.f32 %v940_v51, %v377_v57  ;;  %v973_v59 = vsub.f32 %v938_v48, %v377_v57  ;;  %v976_v61 = vsub.f32 %v942_v52, %v377_v57  ;;  %v979_v62 = vsub.f32 %v946_v56, %v377_v57 }
 0x125   :  { %v986_v2 = vsub.f32 %v952_v60, %v377_v57  ;;  %v990_v48 = vsub.f32 %v728_v1, %v377_v57  ;;  %v996_v5 = vsub.f32 %v731_v9, %v377_v57  ;;  %v1001_v8 = vsub.f32 %v734_v17, %v377_v57 }
 0x126   :  { %v394_v63 = vmul.f32 %v970_v58, %v970_v58  ;;  %v395_v0 = vmul.f32 %v973_v59, %v973_v59  ;;  %v396_v51 = vmul.f32 %v976_v61, %v976_v61  ;;  %v397_v52 = vmul.f32 %v979_v62, %v979_v62 }
 0x127   :  { %v398_v6 = vmul.f32 %v986_v2, %v986_v2  ;;  %v399_v1 = vmul.f32 %v990_v48, %v990_v48  ;;  %v1006_v12 = vsub.f32 %v737_v16, %v377_v57  ;;  %v400_v9 = vmul.f32 %v996_v5, %v996_v5 }
 0x128   :  { %v410_v56 = vsel %vm339_vm0, %v394_v63, 0.0  ;;  %v411_v3 = vsel %vm339_vm0, %v395_v0, 0.0  ;;  %v413_v60 = vsel %vm339_vm0, %v396_v51, 0.0  ;;  %v415_v10 = vsel %vm339_vm0, %v397_v52, 0.0 }
 0x129   :  { %v412_v4 = vadd.f32 %v411_v3, %v410_v56  ;;  %v417_v13 = vsel %vm339_vm0, %v398_v6, 0.0  ;;  %v1011_v15 = vsub.f32 %v740_v19, %v377_v57  ;;  %v401_v17 = vmul.f32 %v1001_v8, %v1001_v8 }
 0x12a   :  { %v419_v18 = vsel %vm339_vm0, %v399_v1, 0.0  ;;  %v1016_v21 = vsub.f32 %v743_v24, %v377_v57  ;;  %v402_v16 = vmul.f32 %v1006_v12, %v1006_v12  ;;  %v421_v22 = vsel %vm339_vm0, %v400_v9, 0.0 }
 0x12b   :  { %v414_v7 = vadd.f32 %v413_v60, %v412_v4  ;;  %v389_v25 = vsub.f32 %v746_v27, %v377_v57  ;;  %v403_v26 = vmul.f32 %v1011_v15, %v1011_v15  ;;  %v423_v19 = vsel %vm339_vm0, %v401_v17, 0.0 }
 0x12c   :  { %v390_v29 = vsub.f32 %v749_v31, %v377_v57  ;;  %v404_v30 = vmul.f32 %v1016_v21, %v1016_v21  ;;  %v425_v24 = vsel %vm339_vm0, %v402_v16, 0.0  ;;  %v391_v33 = vsub.f32 %v752_v34, %v377_v57 }
 0x12d   :  { %v416_v11 = vadd.f32 %v415_v10, %v414_v7  ;;  %v405_v35 = vmul.f32 %v389_v25, %v389_v25  ;;  %v427_v36 = vsel %vm339_vm0, %v403_v26, 0.0  ;;  %v392_v39 = vsub.f32 %v755_v38, %v377_v57  ;;  %v448_v7 = vld [vmem:[%s1133_s2] sm:$0x1] }
 0x12e   :  { %v406_v27 = vmul.f32 %v390_v29, %v390_v29  ;;  %v429_v40 = vsel %vm339_vm0, %v404_v30, 0.0  ;;  %v393_v43 = vsub.f32 %v758_v41, %v377_v57  ;;  %v407_v44 = vmul.f32 %v391_v33, %v391_v33  ;;  %v662_v26 = vld [vmem:[%s1134_s3] ss:$0 sm:$0xff] }
 0x12f   :  { %v418_v14 = vadd.f32 %v417_v13, %v416_v11  ;;  %v431_v31 = vsel %vm339_vm0, %v405_v35, 0.0  ;;  %v408_v46 = vmul.f32 %v392_v39, %v392_v39  ;;  %v453_v6 = vlaneseq }
 0x130   :  { %v433_v47 = vsel %vm339_vm0, %v406_v27, 0.0  ;;  %v409_v50 = vmul.f32 %v393_v43, %v393_v43  ;;  %v435_v34 = vsel %vm339_vm0, %v407_v44, 0.0 }
 0x131   :  { %v420_v20 = vadd.f32 %v419_v18, %v418_v14  ;;  %v437_v54 = vsel %vm339_vm0, %v408_v46, 0.0  ;;  %v454_v60 = vshrl.u32 %v453_v6, 7 }
 0x132   :  { %v439_v55 = vsel %vm339_vm0, %v409_v50, 0.0 }
 0x133   :  { %v422_v23 = vadd.f32 %v421_v22, %v420_v20  ;;  %v455_v1 = vsub.s32 0, %v454_v60 }
 0x135   :  { %v424_v28 = vadd.f32 %v423_v19, %v422_v23 }
 0x137   :  { %v426_v32 = vadd.f32 %v425_v24, %v424_v28 }
 0x139   :  { %v428_v37 = vadd.f32 %v427_v36, %v426_v32 }
 0x13b   :  { %v430_v42 = vadd.f32 %v429_v40, %v428_v37 }
 0x13d   :  { %v432_v45 = vadd.f32 %v431_v31, %v430_v42 }
 0x13f   :  { %v434_v49 = vadd.f32 %v433_v47, %v432_v45 }
 0x141   :  { %v436_v53 = vadd.f32 %v435_v34, %v434_v49 }
 0x143   :  { %v438_v38 = vadd.f32 %v437_v54, %v436_v53 }
 0x145   :  { %v440_v63 = vadd.f32 %v439_v55, %v438_v38 }
 0x147   :  { %v441_v0 = vrot.slane %v440_v63, 4 }
 0x149   :  { %v442_v41 = vadd.f32 %v441_v0, %v440_v63 }
 0x14b   :  { %v443_v57 = vrot.slane %v442_v41, 2 }
 0x14d   :  { %v444_v51 = vadd.f32 %v443_v57, %v442_v41 }
 0x14f   :  { %v445_v52 = vrot.slane %v444_v51, 1 }
 0x151   :  { %v446_v56 = vadd.f32 %v445_v52, %v444_v51 }
 0x153   :  { %v447_v3 = vmul.f32 0.0078125, %v446_v56 }
 0x155   :  { %v449_v4 = vadd.f32 1e-05, %v447_v3 }
 0x157   :  { %815 = vrsqrt.f32 %v449_v4 }
 0x164   :  { %v816_v10 = vpop.eup %815 }
 0x165   :  { %v451_v11 = vmul.f32 %v816_v10, %v448_v7 }
 0x167   :  { %v456_v9 = vrot.slane %v451_v11, %v455_v1 }
 0x169   :  { %v458_v13 = vmul.f32 %v456_v9, %v970_v58  ;;  %v459_v14 = vmul.f32 %v456_v9, %v973_v59  ;;  %v460_v17 = vmul.f32 %v456_v9, %v976_v61  ;;  %v461_v18 = vmul.f32 %v456_v9, %v979_v62 }
 0x16a   :  { %v462_v20 = vmul.f32 %v456_v9, %v986_v2  ;;  %v463_v16 = vmul.f32 %v456_v9, %v990_v48  ;;  %v464_v22 = vmul.f32 %v456_v9, %v996_v5  ;;  %v465_v23 = vmul.f32 %v456_v9, %v1001_v8 }
 0x16b   :  { %v466_v58 = vmul.f32 %v456_v9, %v1006_v12  ;;  %v467_v59 = vmul.f32 %v456_v9, %v1011_v15  ;;  %v468_v61 = vmul.f32 %v456_v9, %v1016_v21  ;;  %v469_v19 = vmul.f32 %v456_v9, %v389_v25 }
 0x16c   :  { %v470_v62 = vmul.f32 %v456_v9, %v390_v29  ;;  %v471_v28 = vmul.f32 %v456_v9, %v391_v33  ;;  %v472_v2 = vmul.f32 %v456_v9, %v392_v39  ;;  %v473_v30 = vmul.f32 %v456_v9, %v393_v43 }
 0x16d   :  { %v481_v48 = vadd.f32 %v662_v26, %v458_v13  ;;  %v482_v24 = vadd.f32 %v662_v26, %v459_v14  ;;  %v483_v5 = vadd.f32 %v662_v26, %v460_v17  ;;  %v484_v32 = vadd.f32 %v662_v26, %v461_v18 }
 0x16e   :  { %v485_v8 = vadd.f32 %v662_v26, %v462_v20  ;;  %v486_v35 = vadd.f32 %v662_v26, %v463_v16  ;;  %v487_v36 = vadd.f32 %v662_v26, %v464_v22  ;;  %v488_v37 = vadd.f32 %v662_v26, %v465_v23 }
 0x16f   :  { %v489_v27 = vadd.f32 %v662_v26, %v466_v58  ;;  %v490_v40 = vadd.f32 %v662_v26, %v467_v59  ;;  %v491_v12 = vadd.f32 %v662_v26, %v468_v61  ;;  %v492_v42 = vadd.f32 %v662_v26, %v469_v19 }
 0x170   :  { %v493_v15 = vadd.f32 %v662_v26, %v470_v62  ;;  %v494_v44 = vadd.f32 %v662_v26, %v471_v28  ;;  %v495_v21 = vadd.f32 %v662_v26, %v472_v2  ;;  %v496_v25 = vadd.f32 %v662_v26, %v473_v30 }
 0x171   :  { %vm498_vm2 = vcmp.ge.f32.partialorder %v482_v24, 0.0  ;;  %vm499_vm3 = vcmp.ge.f32.partialorder %v483_v5, 0.0  ;;  %vm500_vm4 = vcmp.ge.f32.partialorder %v484_v32, 0.0  ;;  %vm501_vm5 = vcmp.ge.f32.partialorder %v485_v8, 0.0 }
 0x172   :  { %vm502_vm6 = vcmp.ge.f32.partialorder %v486_v35, 0.0  ;;  %vm504_vm8 = vcmp.ge.f32.partialorder %v488_v37, 0.0  ;;  %vm505_vm9 = vcmp.ge.f32.partialorder %v489_v27, 0.0  ;;  %vm506_vm10 = vcmp.ge.f32.partialorder %v490_v40, 0.0 }
 0x173   :  { %vm507_vm11 = vcmp.ge.f32.partialorder %v491_v12, 0.0  ;;  %vm508_vm12 = vcmp.ge.f32.partialorder %v492_v42, 0.0  ;;  %vm509_vm13 = vcmp.ge.f32.partialorder %v493_v15, 0.0  ;;  %vm510_vm14 = vcmp.ge.f32.partialorder %v494_v44, 0.0 }
 0x174   :  { %vm511_vm15 = vcmp.ge.f32.partialorder %v495_v21, 0.0  ;;  %vm512_vm0 = vcmp.ge.f32.partialorder %v496_v25, 0.0  ;;  %v513_v29 = vmul.f32 0.2, %v481_v48  ;;  %v514_v33 = vmul.f32 0.2, %v482_v24 }
 0x175   :  { %v515_v39 = vmul.f32 0.2, %v483_v5  ;;  %v516_v43 = vmul.f32 0.2, %v484_v32  ;;  %v517_v31 = vmul.f32 0.2, %v485_v8 }
 0x176   :  { %v518_v45 = vmul.f32 0.2, %v486_v35  ;;  %v519_v46 = vmul.f32 0.2, %v487_v36  ;;  %v520_v47 = vmul.f32 0.2, %v488_v37  ;;  %v530_v38 = vsel %vm498_vm2, %v482_v24, %v514_v33 }
 0x177   :  { %v521_v49 = vmul.f32 0.2, %v489_v27  ;;  %vm1136_vm7 = vcmp.ge.f32.partialorder %v481_v48, 0.0  ;;  %v522_v34 = vmul.f32 0.2, %v490_v40  ;;  %v531_v41 = vsel %vm499_vm3, %v483_v5, %v515_v39 }
 0x178   :  { %v529_v50 = vsel %vm1136_vm7, %v481_v48, %v513_v29  ;;  %v523_v53 = vmul.f32 0.2, %v491_v12  ;;  %v524_v54 = vmul.f32 0.2, %v492_v42  ;;  %v525_v55 = vmul.f32 0.2, %v493_v15 }
 0x179   :  { %v526_v63 = vmul.f32 0.2, %v494_v44  ;;  %v527_v0 = vmul.f32 0.2, %v495_v21  ;;  %v528_v57 = vmul.f32 0.2, %v496_v25  ;;  %v532_v51 = vsel %vm500_vm4, %v484_v32, %v516_v43 }
 0x17a   :  { %v533_v52 = vsel %vm501_vm5, %v485_v8, %v517_v31  ;;  %v534_v56 = vsel %vm502_vm6, %v486_v35, %v518_v45  ;;  %vm1137_vm1 = vcmp.ge.f32.partialorder %v487_v36, 0.0  ;;  %v536_v4 = vsel %vm504_vm8, %v488_v37, %v520_v47 }
 0x17b   :  { %v535_v3 = vsel %vm1137_vm1, %v487_v36, %v519_v46  ;;  %v537_v6 = vsel %vm505_vm9, %v489_v27, %v521_v49  ;;  %v538_v60 = vsel %vm506_vm10, %v490_v40, %v522_v34  ;;  %v539_v7 = vsel %vm507_vm11, %v491_v12, %v523_v53 }
 0x17c   :  { %v540_v1 = vsel %vm508_vm12, %v492_v42, %v524_v54  ;;  %v541_v10 = vsel %vm509_vm13, %v493_v15, %v525_v55  ;;  %v542_v11 = vsel %vm510_vm14, %v494_v44, %v526_v63  ;;  %v543_v9 = vsel %vm511_vm15, %v495_v21, %v527_v0 }
 0x17d   :  { %v544_v13 = vsel %vm512_vm0, %v496_v25, %v528_v57  ;;  %v679_v14 = vpack.c.bf16 %v529_v50, %v529_v50  ;;  %v680_v17 = vpack.c.bf16 %v530_v38, %v530_v38  ;;  %v681_v18 = vpack.c.bf16 %v531_v41, %v531_v41 }
 0x17e   :  { %v682_v20 = vpack.c.bf16 %v532_v51, %v532_v51  ;;  %v683_v16 = vpack.c.bf16 %v533_v52, %v533_v52  ;;  %v684_v22 = vpack.c.bf16 %v534_v56, %v534_v56  ;;  %v685_v23 = vpack.c.bf16 %v535_v3, %v535_v3 }
 0x17f   :  { %v686_v26 = vpack.c.bf16 %v536_v4, %v536_v4  ;;  %v687_v58 = vpack.c.bf16 %v537_v6, %v537_v6  ;;  %v688_v59 = vpack.c.bf16 %v538_v60, %v538_v60  ;;  %vm1138_vm1 = vcmask 257024  }
 0x180   :  { %610 = vst.msk [vmem:[%s1135_s4] sm:$0xf] %vm1138_vm1, %v679_v14  ;;  %vm1139_vm2 = vmmov %vm1138_vm1  ;;  %v689_v61 = vpack.c.bf16 %v539_v7, %v539_v7  ;;  %v690_v19 = vpack.c.bf16 %v540_v1, %v540_v1  ;;  %v691_v62 = vpack.c.bf16 %v541_v10, %v541_v10  ;;  %v692_v28 = vpack.c.bf16 %v542_v11, %v542_v11 }
 0x181   :  { %611 = vst.msk [vmem:[%s1135_s4 + $0x4] sm:$0xf] %vm1139_vm2, %v680_v17  ;;  %vm1140_vm3 = vmmov %vm1138_vm1  ;;  %v693_v2 = vpack.c.bf16 %v543_v9, %v543_v9  ;;  %v694_v30 = vpack.c.bf16 %v544_v13, %v544_v13 }
 0x182   :  { %612 = vst.msk [vmem:[%s1135_s4 + $0x8] sm:$0xf] %vm1140_vm3, %v681_v18  ;;  %vm1141_vm4 = vmmov %vm1138_vm1 }
 0x183   :  { %613 = vst.msk [vmem:[%s1135_s4 + $0xc] sm:$0xf] %vm1141_vm4, %v682_v20  ;;  %vm1142_vm5 = vmmov %vm1138_vm1 }
 0x184   :  { %614 = vst.msk [vmem:[%s1135_s4 + $0x10] sm:$0xf] %vm1142_vm5, %v683_v16  ;;  %vm1143_vm6 = vmmov %vm1138_vm1 }
 0x185   :  { %615 = vst.msk [vmem:[%s1135_s4 + $0x14] sm:$0xf] %vm1143_vm6, %v684_v22  ;;  %vm1144_vm7 = vmmov %vm1138_vm1 }
 0x186   :  { %616 = vst.msk [vmem:[%s1135_s4 + $0x18] sm:$0xf] %vm1144_vm7, %v685_v23  ;;  %vm1145_vm8 = vmmov %vm1138_vm1 }
 0x187   :  { %617 = vst.msk [vmem:[%s1135_s4 + $0x1c] sm:$0xf] %vm1145_vm8, %v686_v26  ;;  %vm1146_vm9 = vmmov %vm1138_vm1 }
 0x188   :  { %618 = vst.msk [vmem:[%s1135_s4 + $0x20] sm:$0xf] %vm1146_vm9, %v687_v58  ;;  %vm1147_vm10 = vmmov %vm1138_vm1 }
 0x189   :  { %619 = vst.msk [vmem:[%s1135_s4 + $0x24] sm:$0xf] %vm1147_vm10, %v688_v59  ;;  %vm1148_vm11 = vmmov %vm1138_vm1 }
 0x18a   :  { %620 = vst.msk [vmem:[%s1135_s4 + $0x28] sm:$0xf] %vm1148_vm11, %v689_v61  ;;  %vm1149_vm12 = vmmov %vm1138_vm1 }
 0x18b   :  { %621 = vst.msk [vmem:[%s1135_s4 + $0x2c] sm:$0xf] %vm1149_vm12, %v690_v19  ;;  %vm1150_vm13 = vmmov %vm1138_vm1 }
 0x18c   :  { %622 = vst.msk [vmem:[%s1135_s4 + $0x30] sm:$0xf] %vm1150_vm13, %v691_v62  ;;  %vm1151_vm14 = vmmov %vm1138_vm1 }
 0x18d   :  { %623 = vst.msk [vmem:[%s1135_s4 + $0x34] sm:$0xf] %vm1151_vm14, %v692_v28  ;;  %vm1152_vm15 = vmmov %vm1138_vm1 }
 0x18e   :  { %624 = vst.msk [vmem:[%s1135_s4 + $0x38] sm:$0xf] %vm1152_vm15, %v693_v2  ;;  %vm1153_vm0 = vmmov %vm1138_vm1 }
 0x18f   :  { %625 = vst.msk [vmem:[%s1135_s4 + $0x3c] sm:$0xf] %vm1153_vm0, %v694_v30 }

// kernel: unet_encoder.7
= control target key start
LH: loop header
LB: loop body
LE: loop exit
PB: predicated region body
PF: predicated region fallthrough
CT: control target
= control target key end

     0   :  { %vm420_vm0 = vcmask 523264   ;;  %vm510_vm5 = vcmask 519168   ;;  %s841_s1 = inlined_call_operand.vmem [shape: bf16[512,64], index: 1, kind: input, shape index: {}]   ;;  %s842_s0 = inlined_call_operand.vmem [shape: bf16[32,512], index: 0, kind: input, shape index: {}]   ;;  %s843_s2 = inlined_call_operand.vmem [shape: f32[1,64], index: 2, kind: input, shape index: {}]   ;;  %s844_s3 = inlined_call_operand.vmem [shape: f32[1,64], index: 3, kind: input, shape index: {}]   ;;  %s845_s4 = inlined_call_operand.vmem [shape: bf16[32,64], index: 4, kind: output, shape index: {}]  }
   0x1   :  { %v624_v0 = vld [vmem:[%s841_s1 + $0x78] sm:$0xff]   ;;  %v628_v4 = vld [vmem:[%s841_s1 + $0x70] sm:$0xff]   ;;  %v632_v8 = vld [vmem:[%s841_s1 + $0x68] sm:$0xff]  }
   0x2   :  { %v625_v1 = vld [vmem:[%s841_s1 + $0xf8] sm:$0xff]   ;;  %568 = vmatprep.subr.bf16.mxu0 %v624_v0  ;;  %v629_v5 = vld [vmem:[%s841_s1 + $0xf0] sm:$0xff]   ;;  %v633_v9 = vld [vmem:[%s841_s1 + $0xe8] sm:$0xff]  }
   0x3   :  { %v626_v2 = vld [vmem:[%s841_s1 + $0x38] sm:$0xff]   ;;  %596 = vmatprep.subr.bf16.mxu1 %v625_v1  ;;  %v630_v6 = vld [vmem:[%s841_s1 + $0x30] sm:$0xff]   ;;  %v634_v10 = vld [vmem:[%s841_s1 + $0x28] sm:$0xff]  }
   0x4   :  { %v627_v3 = vld [vmem:[%s841_s1 + $0xb8] sm:$0xff]   ;;  %569 = vmatpush3.bf16.msra.mxu0 %v626_v2  ;;  %v631_v7 = vld [vmem:[%s841_s1 + $0xb0] sm:$0xff]   ;;  %v635_v11 = vld [vmem:[%s841_s1 + $0xa8] sm:$0xff]  }
   0x5   :  { %597 = vmatpush3.bf16.msra.mxu1 %v627_v3  ;;  %570 = vmatprep.subr.bf16.mxu0 %v628_v4  ;;  %v636_v12 = vld [vmem:[%s841_s1 + $0x60] sm:$0xff]   ;;  %v640_v16 = vld [vmem:[%s841_s1 + $0x58] sm:$0xff]   ;;  %v644_v20 = vld [vmem:[%s841_s1 + $0x50] sm:$0xff]  }
   0x6   :  { %598 = vmatprep.subr.bf16.mxu1 %v629_v5  ;;  %v637_v13 = vld [vmem:[%s841_s1 + $0xe0] sm:$0xff]   ;;  %v641_v17 = vld [vmem:[%s841_s1 + $0xd8] sm:$0xff]   ;;  %v645_v21 = vld [vmem:[%s841_s1 + $0xd0] sm:$0xff]  }
   0x7   :  { %v638_v14 = vld [vmem:[%s841_s1 + $0x20] sm:$0xff]   ;;  %v642_v18 = vld [vmem:[%s841_s1 + $0x18] sm:$0xff]   ;;  %v646_v22 = vld [vmem:[%s841_s1 + $0x10] sm:$0xff]  }
   0x8   :  { %571 = vmatpush3.bf16.msra.mxu0 %v630_v6  ;;  %v639_v15 = vld [vmem:[%s841_s1 + $0xa0] sm:$0xff]   ;;  %v643_v19 = vld [vmem:[%s841_s1 + $0x98] sm:$0xff]   ;;  %v647_v23 = vld [vmem:[%s841_s1 + $0x90] sm:$0xff]  }
   0x9   :  { %599 = vmatpush3.bf16.msra.mxu1 %v631_v7  ;;  %572 = vmatprep.subr.bf16.mxu0 %v632_v8  ;;  %v648_v24 = vld [vmem:[%s841_s1 + $0x48] sm:$0xff]   ;;  %v652_v28 = vld [vmem:[%s841_s1 + $0x40] sm:$0xff]  }
   0xa   :  { %600 = vmatprep.subr.bf16.mxu1 %v633_v9  ;;  %v649_v25 = vld [vmem:[%s841_s1 + $0xc8] sm:$0xff]   ;;  %v653_v29 = vld [vmem:[%s841_s1 + $0xc0] sm:$0xff]  }
   0xb   :  { %v650_v26 = vld [vmem:[%s841_s1 + $0x8] sm:$0xff]   ;;  %v654_v30 = vld [vmem:[%s841_s1] sm:$0xff]  }
   0xc   :  { %573 = vmatpush3.bf16.msra.mxu0 %v634_v10  ;;  %v651_v27 = vld [vmem:[%s841_s1 + $0x88] sm:$0xff]   ;;  %v655_v31 = vld [vmem:[%s841_s1 + $0x80] sm:$0xff]  }
   0xd   :  { %601 = vmatpush3.bf16.msra.mxu1 %v635_v11  ;;  %574 = vmatprep.subr.bf16.mxu0 %v636_v12  ;;  %v656_v32 = vld [vmem:[%s842_s0] ss:$16 sps:$4 sm:$0xff]   ;;  %v658_v33 = vld [vmem:[%s842_s0 + $0x4] ss:$16 sps:$4 sm:$0xff]   ;;  %v659_v34 = vld [vmem:[%s842_s0 + $0x8] ss:$16 sps:$4 sm:$0xff]  }
   0xe   :  { %602 = vmatprep.subr.bf16.mxu1 %v637_v13  ;;  %v661_v35 = vld [vmem:[%s842_s0 + $0xc] ss:$16 sps:$4 sm:$0xff]   ;;  %354 = vmatprep.mubr.bf16.mxu0 %v658_v33  ;;  %v662_v36 = vld [vmem:[%s842_s0 + $0x24] ss:$16 sps:$4 sm:$0xff]   ;;  %v666_v38 = vld [vmem:[%s842_s0 + $0x20] ss:$16 sps:$4 sm:$0xff]  }
   0xf   :  { %403 = vmatprep.mubr.bf16.mxu1 %v661_v35  ;;  %v664_v37 = vld [vmem:[%s842_s0 + $0x2c] ss:$16 sps:$4 sm:$0xff]   ;;  %v667_v39 = vld [vmem:[%s842_s0 + $0x28] ss:$16 sps:$4 sm:$0xff]  }
  0x10   :  { %575 = vmatpush3.bf16.msra.mxu0 %v638_v14 }
  0x11   :  { %603 = vmatpush3.bf16.msra.mxu1 %v639_v15  ;;  %576 = vmatprep.subr.bf16.mxu0 %v640_v16 }
  0x12   :  { %604 = vmatprep.subr.bf16.mxu1 %v641_v17 }
  0x14   :  { %577 = vmatpush3.bf16.msra.mxu0 %v642_v18 }
  0x15   :  { %605 = vmatpush3.bf16.msra.mxu1 %v643_v19  ;;  %578 = vmatprep.subr.bf16.mxu0 %v644_v20 }
  0x16   :  { %606 = vmatprep.subr.bf16.mxu1 %v645_v21 }
  0x18   :  { %579 = vmatpush3.bf16.msra.mxu0 %v646_v22 }
  0x19   :  { %607 = vmatpush3.bf16.msra.mxu1 %v647_v23  ;;  %580 = vmatprep.subr.bf16.mxu0 %v648_v24 }
  0x1a   :  { %608 = vmatprep.subr.bf16.mxu1 %v649_v25 }
  0x1c   :  { %581 = vmatpush3.bf16.msra.mxu0 %v650_v26 }
  0x1d   :  { %609 = vmatpush3.bf16.msra.mxu1 %v651_v27  ;;  %582 = vmatprep.subr.bf16.mxu0 %v652_v28 }
  0x1e   :  { %610 = vmatprep.subr.bf16.mxu1 %v653_v29 }
  0x20   :  { %583 = vmatpush3.bf16.msra.mxu0 %v654_v30 }
  0x21   :  { %611 = vmatpush3.bf16.msra.mxu1 %v655_v31 }
  0x23   :  { %355 = vmatmul.mubr.bf16.vlgmr.msra.gmra.mxu0 %v656_v32 }
  0x24   :  { %404 = vmatmul.mubr.bf16.vlgmr.msra.gmra.mxu1 %v659_v34  ;;  %362 = vmatprep.mubr.bf16.mxu0 %v662_v36 }
  0x25   :  { %411 = vmatprep.mubr.bf16.mxu1 %v664_v37 }
  0x2b   :  { %363 = vmatmul.mubr.bf16.gmra.mxu0 %v666_v38 }
  0x2c   :  { %412 = vmatmul.mubr.bf16.gmra.mxu1 %v667_v39 }
  0xe3   :  { %v584_v40 = vpop.f32.mrf.mxu0 }
  0xe4   :  { %v612_v41 = vpop.f32.mrf.mxu1 }
  0xe5   :  { %v585_v42 = vpop.f32.mrf.mxu0 }
  0xe6   :  { %v613_v43 = vpop.f32.mrf.mxu1  ;;  %v586_v49 = vadd.f32 %v585_v42, %v584_v40 }
  0xe7   :  { %v587_v44 = vpop.f32.mrf.mxu0  ;;  %v614_v50 = vadd.f32 %v613_v43, %v612_v41  ;;  %v462_v41 = vlaneseq  ;;  %v457_v43 = vld [vmem:[%s843_s2] sm:$0x1] }
  0xe8   :  { %v615_v45 = vpop.f32.mrf.mxu1 }
  0xe9   :  { %v588_v46 = vpop.f32.mrf.mxu0  ;;  %v406_v58 = vadd.f32 %v614_v50, %v586_v49  ;;  %v463_v42 = vshrl.u32 %v462_v41, 7 }
  0xea   :  { %v589_v47 = vadd.f32 %v588_v46, %v587_v44  ;;  %v616_v48 = vpop.f32.mrf.mxu1 }
  0xeb   :  { %v617_v51 = vadd.f32 %v616_v48, %v615_v45  ;;  %v590_v52 = vpop.f32.mrf.mxu0  ;;  %v421_v3 = vsel %vm420_vm0, %v406_v58, 0.0  ;;  %v464_v44 = vsub.s32 0, %v463_v42  ;;  %v559_v48 = vld [vmem:[%s844_s3] ss:$0 sm:$0xff] }
  0xec   :  { %v618_v53 = vpop.f32.mrf.mxu1 }
  0xed   :  { %v409_v54 = vadd.f32 %v617_v51, %v589_v47  ;;  %v591_v55 = vpop.f32.mrf.mxu0 }
  0xee   :  { %v592_v56 = vadd.f32 %v591_v55, %v590_v52  ;;  %v619_v57 = vpop.f32.mrf.mxu1 }
  0xef   :  { %v620_v59 = vadd.f32 %v619_v57, %v618_v53  ;;  %v593_v60 = vpop.f32.mrf.mxu0  ;;  %v422_v62 = vsel %vm420_vm0, %v409_v54, 0.0 }
  0xf0   :  { %v621_v61 = vpop.f32.mrf.mxu1  ;;  %v423_v6 = vadd.f32 %v422_v62, %v421_v3 }
  0xf1   :  { %v414_v63 = vadd.f32 %v620_v59, %v592_v56  ;;  %v594_v0 = vpop.f32.mrf.mxu0 }
  0xf2   :  { %v595_v1 = vadd.f32 %v594_v0, %v593_v60  ;;  %v622_v2 = vpop.f32.mrf.mxu1 }
  0xf3   :  { %v424_v4 = vsel %vm420_vm0, %v414_v63, 0.0  ;;  %v623_v5 = vadd.f32 %v622_v2, %v621_v61 }
  0xf4   :  { %v425_v8 = vadd.f32 %v424_v4, %v423_v6 }
  0xf5   :  { %v417_v7 = vadd.f32 %v623_v5, %v595_v1 }
  0xf7   :  { %v426_v9 = vsel %vm420_vm0, %v417_v7, 0.0 }
  0xf8   :  { %v427_v10 = vadd.f32 %v426_v9, %v425_v8 }
  0xfa   :  { %v428_v11 = vrot.slane %v427_v10, 4 }
  0xfc   :  { %v429_v12 = vadd.f32 %v428_v11, %v427_v10 }
  0xfe   :  { %v430_v13 = vrot.slane %v429_v12, 2 }
 0x100   :  { %v431_v14 = vadd.f32 %v430_v13, %v429_v12 }
 0x102   :  { %v432_v15 = vrot.slane %v431_v14, 1 }
 0x104   :  { %v433_v16 = vadd.f32 %v432_v15, %v431_v14 }
 0x106   :  { %v434_v17 = vmul.f32 0.03125, %v433_v16 }
 0x108   :  { %v435_v18 = vsub.f32 %v406_v58, %v434_v17  ;;  %v436_v19 = vsub.f32 %v409_v54, %v434_v17  ;;  %v437_v20 = vsub.f32 %v414_v63, %v434_v17  ;;  %v438_v21 = vsub.f32 %v417_v7, %v434_v17 }
 0x10a   :  { %v439_v22 = vmul.f32 %v435_v18, %v435_v18  ;;  %v440_v23 = vmul.f32 %v436_v19, %v436_v19  ;;  %v441_v24 = vmul.f32 %v437_v20, %v437_v20  ;;  %v442_v25 = vmul.f32 %v438_v21, %v438_v21 }
 0x10c   :  { %v443_v26 = vsel %vm420_vm0, %v439_v22, 0.0  ;;  %v444_v27 = vsel %vm420_vm0, %v440_v23, 0.0  ;;  %v446_v29 = vsel %vm420_vm0, %v441_v24, 0.0  ;;  %v448_v31 = vsel %vm420_vm0, %v442_v25, 0.0 }
 0x10d   :  { %v445_v28 = vadd.f32 %v444_v27, %v443_v26 }
 0x10f   :  { %v447_v30 = vadd.f32 %v446_v29, %v445_v28 }
 0x111   :  { %v449_v32 = vadd.f32 %v448_v31, %v447_v30 }
 0x113   :  { %v450_v33 = vrot.slane %v449_v32, 4 }
 0x115   :  { %v451_v34 = vadd.f32 %v450_v33, %v449_v32 }
 0x117   :  { %v452_v35 = vrot.slane %v451_v34, 2 }
 0x119   :  { %v453_v36 = vadd.f32 %v452_v35, %v451_v34 }
 0x11b   :  { %v454_v37 = vrot.slane %v453_v36, 1 }
 0x11d   :  { %v455_v38 = vadd.f32 %v454_v37, %v453_v36 }
 0x11f   :  { %v456_v39 = vmul.f32 0.03125, %v455_v38 }
 0x121   :  { %v458_v40 = vadd.f32 1e-05, %v456_v39 }
 0x123   :  { %668 = vrsqrt.f32 %v458_v40 }
 0x130   :  { %v669_v45 = vpop.eup %668 }
 0x131   :  { %v460_v46 = vmul.f32 %v669_v45, %v457_v43 }
 0x133   :  { %v465_v47 = vrot.slane %v460_v46, %v464_v44 }
 0x135   :  { %v467_v49 = vmul.f32 %v465_v47, %v435_v18  ;;  %v468_v50 = vmul.f32 %v465_v47, %v436_v19  ;;  %v469_v51 = vmul.f32 %v465_v47, %v437_v20  ;;  %v470_v52 = vmul.f32 %v465_v47, %v438_v21 }
 0x137   :  { %v478_v53 = vadd.f32 %v559_v48, %v467_v49  ;;  %v479_v54 = vadd.f32 %v559_v48, %v468_v50  ;;  %v480_v55 = vadd.f32 %v559_v48, %v469_v51  ;;  %v481_v56 = vadd.f32 %v559_v48, %v470_v52 }
 0x139   :  { %vm482_vm1 = vcmp.ge.f32.partialorder %v478_v53, 0.0  ;;  %vm483_vm2 = vcmp.ge.f32.partialorder %v479_v54, 0.0  ;;  %vm484_vm3 = vcmp.ge.f32.partialorder %v480_v55, 0.0  ;;  %vm485_vm4 = vcmp.ge.f32.partialorder %v481_v56, 0.0 }
 0x13a   :  { %v486_v57 = vmul.f32 0.2, %v478_v53  ;;  %v487_v58 = vmul.f32 0.2, %v479_v54  ;;  %v488_v59 = vmul.f32 0.2, %v480_v55 }
 0x13b   :  { %v489_v60 = vmul.f32 0.2, %v481_v56 }
 0x13c   :  { %v490_v61 = vsel %vm482_vm1, %v478_v53, %v486_v57  ;;  %v491_v62 = vsel %vm483_vm2, %v479_v54, %v487_v58  ;;  %v492_v63 = vsel %vm484_vm3, %v480_v55, %v488_v59 }
 0x13d   :  { %v493_v0 = vsel %vm485_vm4, %v481_v56, %v489_v60  ;;  %v564_v1 = vpack.c.bf16 %v490_v61, %v490_v61  ;;  %v565_v2 = vpack.c.bf16 %v491_v62, %v491_v62  ;;  %v566_v3 = vpack.c.bf16 %v492_v63, %v492_v63 }
 0x13e   :  { %v567_v4 = vpack.c.bf16 %v493_v0, %v493_v0 }
 0x13f   :  { %511 = vst.msk [vmem:[%s845_s4] sm:$0xf] %vm510_vm5, %v564_v1  ;;  %512 = vst.msk [vmem:[%s845_s4 + $0x4] sm:$0xf] %vm510_vm5, %v565_v2 }
 0x140   :  { %513 = vst.msk [vmem:[%s845_s4 + $0x8] sm:$0xf] %vm510_vm5, %v566_v3  ;;  %514 = vst.msk [vmem:[%s845_s4 + $0xc] sm:$0xf] %vm510_vm5, %v567_v4 }

</bundles_post_ra>
